<compile_context>
chip_gen: v7x
topology: tpu7x:2x2x1
jax: 0.10.0
libtpu: 0.0.40
codegen_flags: <defaults>
</compile_context>

<pallas_src>
import functools
import itertools

import numpy as np
import jax
import jax.numpy as jnp
from jax.experimental import pallas as pl
from jax.experimental.pallas import tpu as pltpu


def _round_up(x, m):
    return (x + m - 1) // m * m


# ----------------------- backbone stub + new_fc kernel -----------------------

def _backbone_kernel(x_ref, wb_ref, bb_ref, wn_ref, bn_ref, o_ref, acc_ref):
    f = pl.program_id(0)

    @pl.when(f == 0)
    def _():
        acc_ref[...] = jnp.zeros_like(acc_ref)

    feat = (jnp.dot(x_ref[...], wb_ref[...], preferred_element_type=jnp.float32)
            + bb_ref[...])
    # Dropout(p=0.8) replacing the backbone's last FC is identity in eval mode.
    acc_ref[...] += jnp.dot(feat.astype(jnp.bfloat16), wn_ref[...],
                            preferred_element_type=jnp.float32)

    @pl.when(f == pl.num_programs(0) - 1)
    def _():
        # Fuse the leading ReLU of every relation MLP here (base_out is only
        # ever consumed through that ReLU) and emit bf16 MXU-ready features.
        o_ref[...] = jnp.maximum(acc_ref[...] + bn_ref[...],
                                 0.0).astype(jnp.bfloat16)


def pallas_backbone(x, wb, bb, wn, bn):
    M, K = x.shape
    _, F = wb.shape
    _, D = wn.shape
    f_tile = 256 if F % 256 == 0 else F
    n_f = F // f_tile
    return pl.pallas_call(
        _backbone_kernel,
        out_shape=jax.ShapeDtypeStruct((M, D), jnp.bfloat16),
        grid=(n_f,),
        in_specs=[
            pl.BlockSpec((M, K), lambda f: (0, 0)),
            pl.BlockSpec((K, f_tile), lambda f: (0, f)),
            pl.BlockSpec((1, f_tile), lambda f: (0, f)),
            pl.BlockSpec((f_tile, D), lambda f: (f, 0)),
            pl.BlockSpec((1, D), lambda f: (0, 0)),
        ],
        out_specs=pl.BlockSpec((M, D), lambda f: (0, 0)),
        scratch_shapes=[pltpu.VMEM((M, D), jnp.float32)],
        compiler_params=pltpu.CompilerParams(
            dimension_semantics=("arbitrary",)),
    )(x, wb, bb, wn, bn)


# -------------------- multi-scale relation consensus kernel --------------------

def _make_consensus_kernel(num_segments, max_tuples, bs_pad, d_feat):
    def kernel(tbl_ref, ntup_ref, base_ref, w1_ref, b1_ref, w2_ref, b2_ref,
               o_ref, lhs_ref):
        s = pl.program_id(0)

        @pl.when(s == 0)
        def _():
            o_ref[...] = jnp.zeros_like(o_ref)

        # Gather the frames of every (tuple, slot) pair of this scale into one
        # wide bf16 LHS (max_tuples*bs_pad, num_segments*D).  Padded frame
        # slots read frame 0 but multiply zero-padded K rows of W1, so they
        # contribute exactly 0; padded tuple slots are masked out below.
        tbase = s * (max_tuples * num_segments)
        for r in range(max_tuples):
            for j in range(num_segments):
                fidx = tbl_ref[tbase + r * num_segments + j]
                lhs_ref[r * bs_pad:(r + 1) * bs_pad,
                        j * d_feat:(j + 1) * d_feat] = base_ref[fidx]

        # fc_fusion: (ReLU already fused into base) -> Linear -> ReLU -> Linear.
        h = (jnp.dot(lhs_ref[...], w1_ref[0],
                     preferred_element_type=jnp.float32) + b1_ref[0])
        h = jnp.maximum(h, 0.0).astype(jnp.bfloat16)
        out = (jnp.dot(h, w2_ref[0], preferred_element_type=jnp.float32)
               + b2_ref[0])

        ntup = ntup_ref[s]
        acc = o_ref[...]
        for r in range(max_tuples):
            gate = jnp.where(r < ntup, 1.0, 0.0).astype(jnp.float32)
            acc = acc + gate * out[r * bs_pad:(r + 1) * bs_pad, :]
        o_ref[...] = acc

    return kernel


def pallas_consensus(frame_tbl, ntup, base, w1_all, b1_all, w2_all, b2_all):
    T, bs_pad, D = base.shape
    n_scales, K_max, _ = w1_all.shape
    _, _, C_pad = w2_all.shape
    max_tuples = frame_tbl.shape[0] // (n_scales * T)
    kernel = _make_consensus_kernel(T, max_tuples, bs_pad, D)
    return pl.pallas_call(
        kernel,
        out_shape=jax.ShapeDtypeStruct((bs_pad, C_pad), jnp.float32),
        grid_spec=pltpu.PrefetchScalarGridSpec(
            num_scalar_prefetch=2,
            grid=(n_scales,),
            in_specs=[
                pl.BlockSpec((T, bs_pad, D), lambda s, tbl, nt: (0, 0, 0)),
                pl.BlockSpec((1, K_max, D), lambda s, tbl, nt: (s, 0, 0)),
                pl.BlockSpec((1, 1, D), lambda s, tbl, nt: (s, 0, 0)),
                pl.BlockSpec((1, D, C_pad), lambda s, tbl, nt: (s, 0, 0)),
                pl.BlockSpec((1, 1, C_pad), lambda s, tbl, nt: (s, 0, 0)),
            ],
            out_specs=pl.BlockSpec((bs_pad, C_pad), lambda s, tbl, nt: (0, 0)),
            scratch_shapes=[
                pltpu.VMEM((max_tuples * bs_pad, K_max), jnp.bfloat16)],
        ),
        compiler_params=pltpu.CompilerParams(
            dimension_semantics=("arbitrary",)),
    )(frame_tbl, ntup, base, w1_all, b1_all, w2_all, b2_all)


# ------------------------------ jitted forward ------------------------------

def _trn_forward(params, x, frame_tbl, ntup, *, num_segments, sample_len,
                 num_class):
    bs = x.shape[0]
    H, W = x.shape[-2], x.shape[-1]
    T = num_segments
    D = 256
    d_in = sample_len * H * W
    bs_pad = _round_up(bs, 8)

    # input.view((-1, sample_len) + HW) -> frame-major rows, batch padded to 8.
    xr = x.reshape(bs, T, d_in)
    xr = jnp.transpose(xr, (1, 0, 2))                       # (T, bs, d_in)
    if bs_pad != bs:
        xr = jnp.pad(xr, ((0, 0), (0, bs_pad - bs), (0, 0)))
    xr = xr.reshape(T * bs_pad, d_in).astype(jnp.bfloat16)  # (T*bs_pad, d_in)

    base = pallas_backbone(xr, params["w_base"], params["b_base"],
                           params["w_newfc"], params["b_newfc"])  # (T*bs_pad, 256) bf16
    base = base.reshape(T, bs_pad, D)                        # free, layout-compatible

    act = pallas_consensus(frame_tbl, ntup, base,
                           params["w1_all"], params["b1_all"],
                           params["w2_all"], params["b2_all"])    # (bs_pad, C_pad) f32
    act = act[:bs, :num_class]
    if num_class == 1:  # torch .squeeze(1)
        act = jnp.squeeze(act, axis=1)
    return act


# ------------------------------- TRN module -------------------------------

class TRNPallas:
    """JAX/Pallas re-implementation of TRN.forward (eval mode, deterministic)."""

    def __init__(self, num_class, num_segments, modality="RGB", new_length=None,
                 img_hw=16, feature_dim=1024, key=jax.random.PRNGKey(0)):
        self.num_class = num_class
        self.num_segments = num_segments
        self.modality = modality
        if new_length is None:
            self.new_length = 1 if modality == "RGB" else 5
        else:
            self.new_length = new_length
        self.sample_len = (3 if modality == "RGB" else 2) * self.new_length
        self.img_hw = img_hw
        self.feature_dim = feature_dim
        self.img_feature_dim = 256          # consensus operates on 256-d features
        self.num_bottleneck = 256

        D = self.img_feature_dim
        d_in = self.sample_len * img_hw * img_hw

        # --- backbone stub + new_fc (same init as _prepare_tsn) ---
        k_base, k_newfc = jax.random.split(jax.random.fold_in(key, 0), 2)
        w_base = (jax.random.normal(k_base, (d_in, feature_dim)) * 0.02
                  ).astype(jnp.float32)
        b_base = jnp.zeros((feature_dim,), jnp.float32)
        # new_fc: weight ~ N(0, 0.001), bias = 0
        w_newfc = (jax.random.normal(k_newfc, (feature_dim, D)) * 0.001
                   ).astype(jnp.float32)
        b_newfc = jnp.zeros((D,), jnp.float32)

        # --- RelationModuleMultiScale structure ---
        self.subsample_num = 3
        self.scales = list(range(num_segments, 1, -1))
        self.relations_scales = [
            list(itertools.combinations(range(num_segments), s)) for s in self.scales
        ]
        self.subsample_scales = [
            min(self.subsample_num, len(r)) for r in self.relations_scales
        ]
        self.max_tuples = 1
        if len(self.scales) > 1:
            self.max_tuples = max(1, max(self.subsample_scales[1:]))

        # fc_fusion_scales, stacked and zero-padded for the fused consensus kernel:
        #   W1 padded along K to num_segments*D (zero rows => padded frame slots
        #   contribute 0), W2/b2 padded along classes to a 128-lane multiple.
        n_scales = len(self.scales)
        K_max = num_segments * D
        self.c_pad = _round_up(max(num_class, 1), 128)
        w1_all = np.zeros((n_scales, K_max, D), np.float32)
        b1_all = np.zeros((n_scales, 1, D), np.float32)
        w2_all = np.zeros((n_scales, D, self.c_pad), np.float32)
        b2_all = np.zeros((n_scales, 1, self.c_pad), np.float32)
        for i, s in enumerate(self.scales):
            kk = jax.random.fold_in(key, 100 + i)
            k1, k2, k3, k4 = jax.random.split(kk, 4)
            fan1 = s * D
            lim1 = 1.0 / np.sqrt(fan1)
            w1 = jax.random.uniform(k1, (fan1, self.num_bottleneck),
                                    minval=-lim1, maxval=lim1)
            b1 = jax.random.uniform(k2, (self.num_bottleneck,),
                                    minval=-lim1, maxval=lim1)
            lim2 = 1.0 / np.sqrt(self.num_bottleneck)
            w2 = jax.random.uniform(k3, (self.num_bottleneck, num_class),
                                    minval=-lim2, maxval=lim2)
            b2 = jax.random.uniform(k4, (num_class,),
                                    minval=-lim2, maxval=lim2)
            w1_all[i, :fan1, :] = np.asarray(w1, np.float32)
            b1_all[i, 0, :] = np.asarray(b1, np.float32)
            w2_all[i, :, :num_class] = np.asarray(w2, np.float32)
            b2_all[i, 0, :num_class] = np.asarray(b2, np.float32)

        # bf16 matmul operands (f32 accumulation in-kernel); biases stay f32.
        self.params = {
            "w_base": w_base.astype(jnp.bfloat16),
            "b_base": b_base.reshape(1, feature_dim),
            "w_newfc": w_newfc.astype(jnp.bfloat16),
            "b_newfc": b_newfc.reshape(1, D),
            "w1_all": jnp.asarray(w1_all, jnp.bfloat16),
            "b1_all": jnp.asarray(b1_all, jnp.float32),
            "w2_all": jnp.asarray(w2_all, jnp.bfloat16),
            "b2_all": jnp.asarray(b2_all, jnp.float32),
        }

        self._forward = jax.jit(functools.partial(
            _trn_forward, num_segments=num_segments,
            sample_len=self.sample_len, num_class=num_class))

    # --- relation subsampling (np.random.choice in the reference; fixed seed) ---
    def _sample_relations(self, seed):
        rng = np.random.RandomState(seed)
        T = self.num_segments
        n_scales = len(self.scales)
        tbl = np.zeros((n_scales, self.max_tuples, T), np.int32)
        ntup = np.zeros((n_scales,), np.int32)
        # scale 0: the single full-length relation (no subsampling in reference).
        tbl[0, 0, :self.scales[0]] = np.asarray(self.relations_scales[0][0],
                                                np.int32)
        ntup[0] = 1
        for sid in range(1, n_scales):
            chosen = rng.choice(len(self.relations_scales[sid]),
                                self.subsample_scales[sid], replace=False)
            ntup[sid] = len(chosen)
            for r, idx in enumerate(chosen):
                frames = self.relations_scales[sid][int(idx)]
                tbl[sid, r, :len(frames)] = np.asarray(frames, np.int32)
        # flatten to 1-D to avoid 2-D SMEM padding blow-up
        return jnp.asarray(tbl.reshape(-1)), jnp.asarray(ntup)

    def __call__(self, x, relation_seed=0):
        frame_tbl, ntup = self._sample_relations(relation_seed)
        return self._forward(self.params, x, frame_tbl, ntup)


# ---------------------------------- main -----------------------------------

if __name__ == "__main__":
    num_class = 16
    num_segments = 8
    img_hw = 16

    key = jax.random.PRNGKey(0)
    k_param, k_in = jax.random.split(key)

    model = TRNPallas(num_class=num_class, num_segments=num_segments,
                      modality="RGB", img_hw=img_hw, key=k_param)

    # PyTorch-style NCHW input: (B, num_segments * sample_len, H, W)
    x = jax.random.normal(
        k_in, (2, num_segments * model.sample_len, img_hw, img_hw), jnp.float32)

    out = model(x)
    out = jax.block_until_ready(out)
    assert out.shape == (2, num_class), out.shape
    assert out.dtype == jnp.float32
    print("KERNEL_OK")
</pallas_src>

<mosaic_0001>
module attributes {stable_mosaic.version = 11 : i64} {
  func.func @_backbone_kernel(%arg0: i32, %arg1: memref<64x768xbf16, #tpu.memory_space<vmem>>, %arg2: memref<768x256xbf16, #tpu.memory_space<vmem>>, %arg3: memref<1x256xf32, #tpu.memory_space<vmem>>, %arg4: memref<256x256xbf16, #tpu.memory_space<vmem>>, %arg5: memref<1x256xf32, #tpu.memory_space<vmem>>, %arg6: memref<64x256xbf16, #tpu.memory_space<vmem>>, %arg7: memref<64x256xf32, #tpu.memory_space<vmem>>) attributes {dimension_semantics = [#tpu.dimension_semantics<arbitrary>], iteration_bounds = array<i64: 4>, scalar_prefetch = 0 : i64, scratch_operands = 1 : i64, tpu.core_type = #tpu.core_type<tc>, window_params = [{pipeline_mode = #tpu.pipeline_mode<synchronous>, transform_indices = @transform_0, window_bounds = array<i64: 64, 768>}, {transform_indices = @transform_1, window_bounds = array<i64: 768, 256>}, {transform_indices = @transform_2, window_bounds = array<i64: 1, 256>}, {transform_indices = @transform_3, window_bounds = array<i64: 256, 256>}, {pipeline_mode = #tpu.pipeline_mode<synchronous>, transform_indices = @transform_4, window_bounds = array<i64: 1, 256>}, {pipeline_mode = #tpu.pipeline_mode<synchronous>, transform_indices = @transform_5, window_bounds = array<i64: 64, 256>}]} {
    %c0_i32 = arith.constant 0 : i32
    %0 = arith.cmpi eq, %arg0, %c0_i32 : i32
    %1 = arith.extui %0 : i1 to i32
    %c0_i32_0 = arith.constant 0 : i32
    %2 = arith.cmpi ne, %1, %c0_i32_0 : i32
    scf.if %2 {
      %cst_14 = arith.constant 0.000000e+00 : f32
      %18 = vector.broadcast %cst_14 : f32 to vector<64x256xf32>
      %c0_15 = arith.constant 0 : index
      %c0_16 = arith.constant 0 : index
      %19 = vector.load %arg7[%c0_15, %c0_16] : memref<64x256xf32, #tpu.memory_space<vmem>>, vector<64x256xf32>
      tpu.vector_store %arg7[%c0_15, %c0_16], %18 {strides = array<i32>} : memref<64x256xf32, #tpu.memory_space<vmem>>, vector<64x256xf32>,
    } else {
    }
    %c0 = arith.constant 0 : index
    %c0_1 = arith.constant 0 : index
    %3 = vector.load %arg1[%c0, %c0_1] : memref<64x768xbf16, #tpu.memory_space<vmem>>, vector<64x768xbf16>
    %c0_2 = arith.constant 0 : index
    %c0_3 = arith.constant 0 : index
    %4 = vector.load %arg2[%c0_2, %c0_3] : memref<768x256xbf16, #tpu.memory_space<vmem>>, vector<768x256xbf16>
    %cst = arith.constant dense<0.000000e+00> : vector<64x256xf32>
    %5 = tpu.matmul %3, %4, %cst {dimension_numbers = #tpu.dot_dimension_numbers<[1], [0], [0], [1], [0, 0, 1, 1], [], []>} : vector<64x768xbf16>, vector<768x256xbf16>, vector<64x256xf32> -> vector<64x256xf32>
    %c0_4 = arith.constant 0 : index
    %c0_5 = arith.constant 0 : index
    %6 = vector.load %arg3[%c0_4, %c0_5] : memref<1x256xf32, #tpu.memory_space<vmem>>, vector<1x256xf32>
    %7 = vector.broadcast %6 : vector<1x256xf32> to vector<64x256xf32>
    %8 = arith.addf %5, %7 : vector<64x256xf32>
    %c0_6 = arith.constant 0 : index
    %c0_7 = arith.constant 0 : index
    %9 = vector.load %arg7[%c0_6, %c0_7] : memref<64x256xf32, #tpu.memory_space<vmem>>, vector<64x256xf32>
    %10 = arith.truncf %8 : vector<64x256xf32> to vector<64x256xbf16>
    %c0_8 = arith.constant 0 : index
    %c0_9 = arith.constant 0 : index
    %11 = vector.load %arg4[%c0_8, %c0_9] : memref<256x256xbf16, #tpu.memory_space<vmem>>, vector<256x256xbf16>
    %cst_10 = arith.constant dense<0.000000e+00> : vector<64x256xf32>
    %12 = tpu.matmul %10, %11, %cst_10 {dimension_numbers = #tpu.dot_dimension_numbers<[1], [0], [0], [1], [0, 0, 1, 1], [], []>} : vector<64x256xbf16>, vector<256x256xbf16>, vector<64x256xf32> -> vector<64x256xf32>
    %13 = arith.addf %9, %12 : vector<64x256xf32>
    %c0_11 = arith.constant 0 : index
    %c0_12 = arith.constant 0 : index
    %14 = vector.load %arg7[%c0_11, %c0_12] : memref<64x256xf32, #tpu.memory_space<vmem>>, vector<64x256xf32>
    tpu.vector_store %arg7[%c0_11, %c0_12], %13 {strides = array<i32>} : memref<64x256xf32, #tpu.memory_space<vmem>>, vector<64x256xf32>,
    %c3_i32 = arith.constant 3 : i32
    %15 = arith.cmpi eq, %arg0, %c3_i32 : i32
    %16 = arith.extui %15 : i1 to i32
    %c0_i32_13 = arith.constant 0 : i32
    %17 = arith.cmpi ne, %16, %c0_i32_13 : i32
    scf.if %17 {
      %c0_14 = arith.constant 0 : index
      %c0_15 = arith.constant 0 : index
      %18 = vector.load %arg7[%c0_14, %c0_15] : memref<64x256xf32, #tpu.memory_space<vmem>>, vector<64x256xf32>
      %c0_16 = arith.constant 0 : index
      %c0_17 = arith.constant 0 : index
      %19 = vector.load %arg5[%c0_16, %c0_17] : memref<1x256xf32, #tpu.memory_space<vmem>>, vector<1x256xf32>
      %20 = vector.broadcast %19 : vector<1x256xf32> to vector<64x256xf32>
      %21 = arith.addf %18, %20 : vector<64x256xf32>
      %cst_18 = arith.constant 0.000000e+00 : f32
      %22 = vector.broadcast %cst_18 : f32 to vector<64x256xf32>
      %23 = arith.maximumf %21, %22 : vector<64x256xf32>
      %24 = arith.truncf %23 : vector<64x256xf32> to vector<64x256xbf16>
      %c0_19 = arith.constant 0 : index
      %c0_20 = arith.constant 0 : index
      %25 = vector.load %arg6[%c0_19, %c0_20] : memref<64x256xbf16, #tpu.memory_space<vmem>>, vector<64x256xbf16>
      tpu.vector_store %arg6[%c0_19, %c0_20], %24 {strides = array<i32>} : memref<64x256xbf16, #tpu.memory_space<vmem>>, vector<64x256xbf16>,
    } else {
    }
    return
  }
  func.func @transform_0(%arg0: i32) -> (i32, i32) {
    %c0_i32 = arith.constant 0 : i32
    %c0_i32_0 = arith.constant 0 : i32
    %c0_i32_1 = arith.constant 0 : i32
    return %c0_i32, %c0_i32_0 : i32, i32
  }
  func.func @transform_1(%arg0: i32) -> (i32, i32) {
    %c0_i32 = arith.constant 0 : i32
    %c0_i32_0 = arith.constant 0 : i32
    return %c0_i32, %arg0 : i32, i32
  }
  func.func @transform_2(%arg0: i32) -> (i32, i32) {
    %c0_i32 = arith.constant 0 : i32
    %c0_i32_0 = arith.constant 0 : i32
    return %c0_i32, %arg0 : i32, i32
  }
  func.func @transform_3(%arg0: i32) -> (i32, i32) {
    %c0_i32 = arith.constant 0 : i32
    %c0_i32_0 = arith.constant 0 : i32
    return %arg0, %c0_i32 : i32, i32
  }
  func.func @transform_4(%arg0: i32) -> (i32, i32) {
    %c0_i32 = arith.constant 0 : i32
    %c0_i32_0 = arith.constant 0 : i32
    %c0_i32_1 = arith.constant 0 : i32
    return %c0_i32, %c0_i32_0 : i32, i32
  }
  func.func @transform_5(%arg0: i32) -> (i32, i32) {
    %c0_i32 = arith.constant 0 : i32
    %c0_i32_0 = arith.constant 0 : i32
    %c0_i32_1 = arith.constant 0 : i32
    return %c0_i32, %c0_i32_0 : i32, i32
  }
}

module attributes {stable_mosaic.version = 11 : i64} {
  func.func @kernel(%arg0: i32, %arg1: memref<168xi32, #tpu.memory_space<smem>>, %arg2: memref<7xi32, #tpu.memory_space<smem>>, %arg3: memref<8x8x256xbf16, #tpu.memory_space<vmem>>, %arg4: memref<1x2048x256xbf16, #tpu.memory_space<vmem>>, %arg5: memref<1x1x256xf32, #tpu.memory_space<vmem>>, %arg6: memref<1x256x128xbf16, #tpu.memory_space<vmem>>, %arg7: memref<1x1x128xf32, #tpu.memory_space<vmem>>, %arg8: memref<8x128xf32, #tpu.memory_space<vmem>>, %arg9: memref<24x2048xbf16, #tpu.memory_space<vmem>>) attributes {dimension_semantics = [#tpu.dimension_semantics<arbitrary>], iteration_bounds = array<i64: 7>, scalar_prefetch = 2 : i64, scratch_operands = 1 : i64, tpu.core_type = #tpu.core_type<tc>, window_params = [{pipeline_mode = #tpu.pipeline_mode<synchronous>, transform_indices = @transform_0, window_bounds = array<i64: 8, 8, 256>}, {transform_indices = @transform_1, window_bounds = array<i64: 1, 2048, 256>}, {transform_indices = @transform_2, window_bounds = array<i64: 1, 1, 256>}, {transform_indices = @transform_3, window_bounds = array<i64: 1, 256, 128>}, {transform_indices = @transform_4, window_bounds = array<i64: 1, 1, 128>}, {pipeline_mode = #tpu.pipeline_mode<synchronous>, transform_indices = @transform_5, window_bounds = array<i64: 8, 128>}]} {
    %c0_i32 = arith.constant 0 : i32
    %0 = arith.cmpi eq, %arg0, %c0_i32 : i32
    %1 = arith.extui %0 : i1 to i32
    %c0_i32_0 = arith.constant 0 : i32
    %2 = arith.cmpi ne, %1, %c0_i32_0 : i32
    scf.if %2 {
      %cst_155 = arith.constant 0.000000e+00 : f32
      %236 = vector.broadcast %cst_155 : f32 to vector<8x128xf32>
      %c0_156 = arith.constant 0 : index
      %c0_157 = arith.constant 0 : index
      %237 = vector.load %arg8[%c0_156, %c0_157] : memref<8x128xf32, #tpu.memory_space<vmem>>, vector<8x128xf32>
      tpu.vector_store %arg8[%c0_156, %c0_157], %236 {strides = array<i32>} : memref<8x128xf32, #tpu.memory_space<vmem>>, vector<8x128xf32>,
    } else {
    }
    %c24_i32 = arith.constant 24 : i32
    %3 = arith.muli %arg0, %c24_i32 : i32
    %c0_i32_1 = arith.constant 0 : i32
    %4 = arith.addi %3, %c0_i32_1 : i32
    %c0_i32_2 = arith.constant 0 : i32
    %5 = arith.addi %4, %c0_i32_2 : i32
    %6 = arith.index_cast %5 : i32 to index
    %7 = memref.load %arg1[%6] : memref<168xi32, #tpu.memory_space<smem>>
    %8 = arith.index_cast %7 : i32 to index
    %c0 = arith.constant 0 : index
    %c0_3 = arith.constant 0 : index
    %9 = vector.load %arg3[%8, %c0, %c0_3] : memref<8x8x256xbf16, #tpu.memory_space<vmem>>, vector<1x8x256xbf16>
    %10 = vector.shape_cast %9 : vector<1x8x256xbf16> to vector<8x256xbf16>
    %c0_4 = arith.constant 0 : index
    %c0_5 = arith.constant 0 : index
    %11 = vector.load %arg9[%c0_4, %c0_5] : memref<24x2048xbf16, #tpu.memory_space<vmem>>, vector<8x256xbf16>
    tpu.vector_store %arg9[%c0_4, %c0_5], %10 {strides = array<i32>} : memref<24x2048xbf16, #tpu.memory_space<vmem>>, vector<8x256xbf16>,
    %c0_i32_6 = arith.constant 0 : i32
    %12 = arith.addi %3, %c0_i32_6 : i32
    %c1_i32 = arith.constant 1 : i32
    %13 = arith.addi %12, %c1_i32 : i32
    %14 = arith.index_cast %13 : i32 to index
    %15 = memref.load %arg1[%14] : memref<168xi32, #tpu.memory_space<smem>>
    %16 = arith.index_cast %15 : i32 to index
    %c0_7 = arith.constant 0 : index
    %c0_8 = arith.constant 0 : index
    %17 = vector.load %arg3[%16, %c0_7, %c0_8] : memref<8x8x256xbf16, #tpu.memory_space<vmem>>, vector<1x8x256xbf16>
    %18 = vector.shape_cast %17 : vector<1x8x256xbf16> to vector<8x256xbf16>
    %c0_9 = arith.constant 0 : index
    %c256 = arith.constant 256 : index
    %19 = vector.load %arg9[%c0_9, %c256] : memref<24x2048xbf16, #tpu.memory_space<vmem>>, vector<8x256xbf16>
    tpu.vector_store %arg9[%c0_9, %c256], %18 {strides = array<i32>} : memref<24x2048xbf16, #tpu.memory_space<vmem>>, vector<8x256xbf16>,
    %c0_i32_10 = arith.constant 0 : i32
    %20 = arith.addi %3, %c0_i32_10 : i32
    %c2_i32 = arith.constant 2 : i32
    %21 = arith.addi %20, %c2_i32 : i32
    %22 = arith.index_cast %21 : i32 to index
    %23 = memref.load %arg1[%22] : memref<168xi32, #tpu.memory_space<smem>>
    %24 = arith.index_cast %23 : i32 to index
    %c0_11 = arith.constant 0 : index
    %c0_12 = arith.constant 0 : index
    %25 = vector.load %arg3[%24, %c0_11, %c0_12] : memref<8x8x256xbf16, #tpu.memory_space<vmem>>, vector<1x8x256xbf16>
    %26 = vector.shape_cast %25 : vector<1x8x256xbf16> to vector<8x256xbf16>
    %c0_13 = arith.constant 0 : index
    %c512 = arith.constant 512 : index
    %27 = vector.load %arg9[%c0_13, %c512] : memref<24x2048xbf16, #tpu.memory_space<vmem>>, vector<8x256xbf16>
    tpu.vector_store %arg9[%c0_13, %c512], %26 {strides = array<i32>} : memref<24x2048xbf16, #tpu.memory_space<vmem>>, vector<8x256xbf16>,
    %c0_i32_14 = arith.constant 0 : i32
    %28 = arith.addi %3, %c0_i32_14 : i32
    %c3_i32 = arith.constant 3 : i32
    %29 = arith.addi %28, %c3_i32 : i32
    %30 = arith.index_cast %29 : i32 to index
    %31 = memref.load %arg1[%30] : memref<168xi32, #tpu.memory_space<smem>>
    %32 = arith.index_cast %31 : i32 to index
    %c0_15 = arith.constant 0 : index
    %c0_16 = arith.constant 0 : index
    %33 = vector.load %arg3[%32, %c0_15, %c0_16] : memref<8x8x256xbf16, #tpu.memory_space<vmem>>, vector<1x8x256xbf16>
    %34 = vector.shape_cast %33 : vector<1x8x256xbf16> to vector<8x256xbf16>
    %c0_17 = arith.constant 0 : index
    %c768 = arith.constant 768 : index
    %35 = vector.load %arg9[%c0_17, %c768] : memref<24x2048xbf16, #tpu.memory_space<vmem>>, vector<8x256xbf16>
    tpu.vector_store %arg9[%c0_17, %c768], %34 {strides = array<i32>} : memref<24x2048xbf16, #tpu.memory_space<vmem>>, vector<8x256xbf16>,
    %c0_i32_18 = arith.constant 0 : i32
    %36 = arith.addi %3, %c0_i32_18 : i32
    %c4_i32 = arith.constant 4 : i32
    %37 = arith.addi %36, %c4_i32 : i32
    %38 = arith.index_cast %37 : i32 to index
    %39 = memref.load %arg1[%38] : memref<168xi32, #tpu.memory_space<smem>>
    %40 = arith.index_cast %39 : i32 to index
    %c0_19 = arith.constant 0 : index
    %c0_20 = arith.constant 0 : index
    %41 = vector.load %arg3[%40, %c0_19, %c0_20] : memref<8x8x256xbf16, #tpu.memory_space<vmem>>, vector<1x8x256xbf16>
    %42 = vector.shape_cast %41 : vector<1x8x256xbf16> to vector<8x256xbf16>
    %c0_21 = arith.constant 0 : index
    %c1024 = arith.constant 1024 : index
    %43 = vector.load %arg9[%c0_21, %c1024] : memref<24x2048xbf16, #tpu.memory_space<vmem>>, vector<8x256xbf16>
    tpu.vector_store %arg9[%c0_21, %c1024], %42 {strides = array<i32>} : memref<24x2048xbf16, #tpu.memory_space<vmem>>, vector<8x256xbf16>,
    %c0_i32_22 = arith.constant 0 : i32
    %44 = arith.addi %3, %c0_i32_22 : i32
    %c5_i32 = arith.constant 5 : i32
    %45 = arith.addi %44, %c5_i32 : i32
    %46 = arith.index_cast %45 : i32 to index
    %47 = memref.load %arg1[%46] : memref<168xi32, #tpu.memory_space<smem>>
    %48 = arith.index_cast %47 : i32 to index
    %c0_23 = arith.constant 0 : index
    %c0_24 = arith.constant 0 : index
    %49 = vector.load %arg3[%48, %c0_23, %c0_24] : memref<8x8x256xbf16, #tpu.memory_space<vmem>>, vector<1x8x256xbf16>
    %50 = vector.shape_cast %49 : vector<1x8x256xbf16> to vector<8x256xbf16>
    %c0_25 = arith.constant 0 : index
    %c1280 = arith.constant 1280 : index
    %51 = vector.load %arg9[%c0_25, %c1280] : memref<24x2048xbf16, #tpu.memory_space<vmem>>, vector<8x256xbf16>
    tpu.vector_store %arg9[%c0_25, %c1280], %50 {strides = array<i32>} : memref<24x2048xbf16, #tpu.memory_space<vmem>>, vector<8x256xbf16>,
    %c0_i32_26 = arith.constant 0 : i32
    %52 = arith.addi %3, %c0_i32_26 : i32
    %c6_i32 = arith.constant 6 : i32
    %53 = arith.addi %52, %c6_i32 : i32
    %54 = arith.index_cast %53 : i32 to index
    %55 = memref.load %arg1[%54] : memref<168xi32, #tpu.memory_space<smem>>
    %56 = arith.index_cast %55 : i32 to index
    %c0_27 = arith.constant 0 : index
    %c0_28 = arith.constant 0 : index
    %57 = vector.load %arg3[%56, %c0_27, %c0_28] : memref<8x8x256xbf16, #tpu.memory_space<vmem>>, vector<1x8x256xbf16>
    %58 = vector.shape_cast %57 : vector<1x8x256xbf16> to vector<8x256xbf16>
    %c0_29 = arith.constant 0 : index
    %c1536 = arith.constant 1536 : index
    %59 = vector.load %arg9[%c0_29, %c1536] : memref<24x2048xbf16, #tpu.memory_space<vmem>>, vector<8x256xbf16>
    tpu.vector_store %arg9[%c0_29, %c1536], %58 {strides = array<i32>} : memref<24x2048xbf16, #tpu.memory_space<vmem>>, vector<8x256xbf16>,
    %c0_i32_30 = arith.constant 0 : i32
    %60 = arith.addi %3, %c0_i32_30 : i32
    %c7_i32 = arith.constant 7 : i32
    %61 = arith.addi %60, %c7_i32 : i32
    %62 = arith.index_cast %61 : i32 to index
    %63 = memref.load %arg1[%62] : memref<168xi32, #tpu.memory_space<smem>>
    %64 = arith.index_cast %63 : i32 to index
    %c0_31 = arith.constant 0 : index
    %c0_32 = arith.constant 0 : index
    %65 = vector.load %arg3[%64, %c0_31, %c0_32] : memref<8x8x256xbf16, #tpu.memory_space<vmem>>, vector<1x8x256xbf16>
    %66 = vector.shape_cast %65 : vector<1x8x256xbf16> to vector<8x256xbf16>
    %c0_33 = arith.constant 0 : index
    %c1792 = arith.constant 1792 : index
    %67 = vector.load %arg9[%c0_33, %c1792] : memref<24x2048xbf16, #tpu.memory_space<vmem>>, vector<8x256xbf16>
    tpu.vector_store %arg9[%c0_33, %c1792], %66 {strides = array<i32>} : memref<24x2048xbf16, #tpu.memory_space<vmem>>, vector<8x256xbf16>,
    %c8_i32 = arith.constant 8 : i32
    %68 = arith.addi %3, %c8_i32 : i32
    %c0_i32_34 = arith.constant 0 : i32
    %69 = arith.addi %68, %c0_i32_34 : i32
    %70 = arith.index_cast %69 : i32 to index
    %71 = memref.load %arg1[%70] : memref<168xi32, #tpu.memory_space<smem>>
    %72 = arith.index_cast %71 : i32 to index
    %c0_35 = arith.constant 0 : index
    %c0_36 = arith.constant 0 : index
    %73 = vector.load %arg3[%72, %c0_35, %c0_36] : memref<8x8x256xbf16, #tpu.memory_space<vmem>>, vector<1x8x256xbf16>
    %74 = vector.shape_cast %73 : vector<1x8x256xbf16> to vector<8x256xbf16>
    %c8 = arith.constant 8 : index
    %c0_37 = arith.constant 0 : index
    %75 = vector.load %arg9[%c8, %c0_37] : memref<24x2048xbf16, #tpu.memory_space<vmem>>, vector<8x256xbf16>
    tpu.vector_store %arg9[%c8, %c0_37], %74 {strides = array<i32>} : memref<24x2048xbf16, #tpu.memory_space<vmem>>, vector<8x256xbf16>,
    %c8_i32_38 = arith.constant 8 : i32
    %76 = arith.addi %3, %c8_i32_38 : i32
    %c1_i32_39 = arith.constant 1 : i32
    %77 = arith.addi %76, %c1_i32_39 : i32
    %78 = arith.index_cast %77 : i32 to index
    %79 = memref.load %arg1[%78] : memref<168xi32, #tpu.memory_space<smem>>
    %80 = arith.index_cast %79 : i32 to index
    %c0_40 = arith.constant 0 : index
    %c0_41 = arith.constant 0 : index
    %81 = vector.load %arg3[%80, %c0_40, %c0_41] : memref<8x8x256xbf16, #tpu.memory_space<vmem>>, vector<1x8x256xbf16>
    %82 = vector.shape_cast %81 : vector<1x8x256xbf16> to vector<8x256xbf16>
    %c8_42 = arith.constant 8 : index
    %c256_43 = arith.constant 256 : index
    %83 = vector.load %arg9[%c8_42, %c256_43] : memref<24x2048xbf16, #tpu.memory_space<vmem>>, vector<8x256xbf16>
    tpu.vector_store %arg9[%c8_42, %c256_43], %82 {strides = array<i32>} : memref<24x2048xbf16, #tpu.memory_space<vmem>>, vector<8x256xbf16>,
    %c8_i32_44 = arith.constant 8 : i32
    %84 = arith.addi %3, %c8_i32_44 : i32
    %c2_i32_45 = arith.constant 2 : i32
    %85 = arith.addi %84, %c2_i32_45 : i32
    %86 = arith.index_cast %85 : i32 to index
    %87 = memref.load %arg1[%86] : memref<168xi32, #tpu.memory_space<smem>>
    %88 = arith.index_cast %87 : i32 to index
    %c0_46 = arith.constant 0 : index
    %c0_47 = arith.constant 0 : index
    %89 = vector.load %arg3[%88, %c0_46, %c0_47] : memref<8x8x256xbf16, #tpu.memory_space<vmem>>, vector<1x8x256xbf16>
    %90 = vector.shape_cast %89 : vector<1x8x256xbf16> to vector<8x256xbf16>
    %c8_48 = arith.constant 8 : index
    %c512_49 = arith.constant 512 : index
    %91 = vector.load %arg9[%c8_48, %c512_49] : memref<24x2048xbf16, #tpu.memory_space<vmem>>, vector<8x256xbf16>
    tpu.vector_store %arg9[%c8_48, %c512_49], %90 {strides = array<i32>} : memref<24x2048xbf16, #tpu.memory_space<vmem>>, vector<8x256xbf16>,
    %c8_i32_50 = arith.constant 8 : i32
    %92 = arith.addi %3, %c8_i32_50 : i32
    %c3_i32_51 = arith.constant 3 : i32
    %93 = arith.addi %92, %c3_i32_51 : i32
    %94 = arith.index_cast %93 : i32 to index
    %95 = memref.load %arg1[%94] : memref<168xi32, #tpu.memory_space<smem>>
    %96 = arith.index_cast %95 : i32 to index
    %c0_52 = arith.constant 0 : index
    %c0_53 = arith.constant 0 : index
    %97 = vector.load %arg3[%96, %c0_52, %c0_53] : memref<8x8x256xbf16, #tpu.memory_space<vmem>>, vector<1x8x256xbf16>
    %98 = vector.shape_cast %97 : vector<1x8x256xbf16> to vector<8x256xbf16>
    %c8_54 = arith.constant 8 : index
    %c768_55 = arith.constant 768 : index
    %99 = vector.load %arg9[%c8_54, %c768_55] : memref<24x2048xbf16, #tpu.memory_space<vmem>>, vector<8x256xbf16>
    tpu.vector_store %arg9[%c8_54, %c768_55], %98 {strides = array<i32>} : memref<24x2048xbf16, #tpu.memory_space<vmem>>, vector<8x256xbf16>,
    %c8_i32_56 = arith.constant 8 : i32
    %100 = arith.addi %3, %c8_i32_56 : i32
    %c4_i32_57 = arith.constant 4 : i32
    %101 = arith.addi %100, %c4_i32_57 : i32
    %102 = arith.index_cast %101 : i32 to index
    %103 = memref.load %arg1[%102] : memref<168xi32, #tpu.memory_space<smem>>
    %104 = arith.index_cast %103 : i32 to index
    %c0_58 = arith.constant 0 : index
    %c0_59 = arith.constant 0 : index
    %105 = vector.load %arg3[%104, %c0_58, %c0_59] : memref<8x8x256xbf16, #tpu.memory_space<vmem>>, vector<1x8x256xbf16>
    %106 = vector.shape_cast %105 : vector<1x8x256xbf16> to vector<8x256xbf16>
    %c8_60 = arith.constant 8 : index
    %c1024_61 = arith.constant 1024 : index
    %107 = vector.load %arg9[%c8_60, %c1024_61] : memref<24x2048xbf16, #tpu.memory_space<vmem>>, vector<8x256xbf16>
    tpu.vector_store %arg9[%c8_60, %c1024_61], %106 {strides = array<i32>} : memref<24x2048xbf16, #tpu.memory_space<vmem>>, vector<8x256xbf16>,
    %c8_i32_62 = arith.constant 8 : i32
    %108 = arith.addi %3, %c8_i32_62 : i32
    %c5_i32_63 = arith.constant 5 : i32
    %109 = arith.addi %108, %c5_i32_63 : i32
    %110 = arith.index_cast %109 : i32 to index
    %111 = memref.load %arg1[%110] : memref<168xi32, #tpu.memory_space<smem>>
    %112 = arith.index_cast %111 : i32 to index
    %c0_64 = arith.constant 0 : index
    %c0_65 = arith.constant 0 : index
    %113 = vector.load %arg3[%112, %c0_64, %c0_65] : memref<8x8x256xbf16, #tpu.memory_space<vmem>>, vector<1x8x256xbf16>
    %114 = vector.shape_cast %113 : vector<1x8x256xbf16> to vector<8x256xbf16>
    %c8_66 = arith.constant 8 : index
    %c1280_67 = arith.constant 1280 : index
    %115 = vector.load %arg9[%c8_66, %c1280_67] : memref<24x2048xbf16, #tpu.memory_space<vmem>>, vector<8x256xbf16>
    tpu.vector_store %arg9[%c8_66, %c1280_67], %114 {strides = array<i32>} : memref<24x2048xbf16, #tpu.memory_space<vmem>>, vector<8x256xbf16>,
    %c8_i32_68 = arith.constant 8 : i32
    %116 = arith.addi %3, %c8_i32_68 : i32
    %c6_i32_69 = arith.constant 6 : i32
    %117 = arith.addi %116, %c6_i32_69 : i32
    %118 = arith.index_cast %117 : i32 to index
    %119 = memref.load %arg1[%118] : memref<168xi32, #tpu.memory_space<smem>>
    %120 = arith.index_cast %119 : i32 to index
    %c0_70 = arith.constant 0 : index
    %c0_71 = arith.constant 0 : index
    %121 = vector.load %arg3[%120, %c0_70, %c0_71] : memref<8x8x256xbf16, #tpu.memory_space<vmem>>, vector<1x8x256xbf16>
    %122 = vector.shape_cast %121 : vector<1x8x256xbf16> to vector<8x256xbf16>
    %c8_72 = arith.constant 8 : index
    %c1536_73 = arith.constant 1536 : index
    %123 = vector.load %arg9[%c8_72, %c1536_73] : memref<24x2048xbf16, #tpu.memory_space<vmem>>, vector<8x256xbf16>
    tpu.vector_store %arg9[%c8_72, %c1536_73], %122 {strides = array<i32>} : memref<24x2048xbf16, #tpu.memory_space<vmem>>, vector<8x256xbf16>,
    %c8_i32_74 = arith.constant 8 : i32
    %124 = arith.addi %3, %c8_i32_74 : i32
    %c7_i32_75 = arith.constant 7 : i32
    %125 = arith.addi %124, %c7_i32_75 : i32
    %126 = arith.index_cast %125 : i32 to index
    %127 = memref.load %arg1[%126] : memref<168xi32, #tpu.memory_space<smem>>
    %128 = arith.index_cast %127 : i32 to index
    %c0_76 = arith.constant 0 : index
    %c0_77 = arith.constant 0 : index
    %129 = vector.load %arg3[%128, %c0_76, %c0_77] : memref<8x8x256xbf16, #tpu.memory_space<vmem>>, vector<1x8x256xbf16>
    %130 = vector.shape_cast %129 : vector<1x8x256xbf16> to vector<8x256xbf16>
    %c8_78 = arith.constant 8 : index
    %c1792_79 = arith.constant 1792 : index
    %131 = vector.load %arg9[%c8_78, %c1792_79] : memref<24x2048xbf16, #tpu.memory_space<vmem>>, vector<8x256xbf16>
    tpu.vector_store %arg9[%c8_78, %c1792_79], %130 {strides = array<i32>} : memref<24x2048xbf16, #tpu.memory_space<vmem>>, vector<8x256xbf16>,
    %c16_i32 = arith.constant 16 : i32
    %132 = arith.addi %3, %c16_i32 : i32
    %c0_i32_80 = arith.constant 0 : i32
    %133 = arith.addi %132, %c0_i32_80 : i32
    %134 = arith.index_cast %133 : i32 to index
    %135 = memref.load %arg1[%134] : memref<168xi32, #tpu.memory_space<smem>>
    %136 = arith.index_cast %135 : i32 to index
    %c0_81 = arith.constant 0 : index
    %c0_82 = arith.constant 0 : index
    %137 = vector.load %arg3[%136, %c0_81, %c0_82] : memref<8x8x256xbf16, #tpu.memory_space<vmem>>, vector<1x8x256xbf16>
    %138 = vector.shape_cast %137 : vector<1x8x256xbf16> to vector<8x256xbf16>
    %c16 = arith.constant 16 : index
    %c0_83 = arith.constant 0 : index
    %139 = vector.load %arg9[%c16, %c0_83] : memref<24x2048xbf16, #tpu.memory_space<vmem>>, vector<8x256xbf16>
    tpu.vector_store %arg9[%c16, %c0_83], %138 {strides = array<i32>} : memref<24x2048xbf16, #tpu.memory_space<vmem>>, vector<8x256xbf16>,
    %c16_i32_84 = arith.constant 16 : i32
    %140 = arith.addi %3, %c16_i32_84 : i32
    %c1_i32_85 = arith.constant 1 : i32
    %141 = arith.addi %140, %c1_i32_85 : i32
    %142 = arith.index_cast %141 : i32 to index
    %143 = memref.load %arg1[%142] : memref<168xi32, #tpu.memory_space<smem>>
    %144 = arith.index_cast %143 : i32 to index
    %c0_86 = arith.constant 0 : index
    %c0_87 = arith.constant 0 : index
    %145 = vector.load %arg3[%144, %c0_86, %c0_87] : memref<8x8x256xbf16, #tpu.memory_space<vmem>>, vector<1x8x256xbf16>
    %146 = vector.shape_cast %145 : vector<1x8x256xbf16> to vector<8x256xbf16>
    %c16_88 = arith.constant 16 : index
    %c256_89 = arith.constant 256 : index
    %147 = vector.load %arg9[%c16_88, %c256_89] : memref<24x2048xbf16, #tpu.memory_space<vmem>>, vector<8x256xbf16>
    tpu.vector_store %arg9[%c16_88, %c256_89], %146 {strides = array<i32>} : memref<24x2048xbf16, #tpu.memory_space<vmem>>, vector<8x256xbf16>,
    %c16_i32_90 = arith.constant 16 : i32
    %148 = arith.addi %3, %c16_i32_90 : i32
    %c2_i32_91 = arith.constant 2 : i32
    %149 = arith.addi %148, %c2_i32_91 : i32
    %150 = arith.index_cast %149 : i32 to index
    %151 = memref.load %arg1[%150] : memref<168xi32, #tpu.memory_space<smem>>
    %152 = arith.index_cast %151 : i32 to index
    %c0_92 = arith.constant 0 : index
    %c0_93 = arith.constant 0 : index
    %153 = vector.load %arg3[%152, %c0_92, %c0_93] : memref<8x8x256xbf16, #tpu.memory_space<vmem>>, vector<1x8x256xbf16>
    %154 = vector.shape_cast %153 : vector<1x8x256xbf16> to vector<8x256xbf16>
    %c16_94 = arith.constant 16 : index
    %c512_95 = arith.constant 512 : index
    %155 = vector.load %arg9[%c16_94, %c512_95] : memref<24x2048xbf16, #tpu.memory_space<vmem>>, vector<8x256xbf16>
    tpu.vector_store %arg9[%c16_94, %c512_95], %154 {strides = array<i32>} : memref<24x2048xbf16, #tpu.memory_space<vmem>>, vector<8x256xbf16>,
    %c16_i32_96 = arith.constant 16 : i32
    %156 = arith.addi %3, %c16_i32_96 : i32
    %c3_i32_97 = arith.constant 3 : i32
    %157 = arith.addi %156, %c3_i32_97 : i32
    %158 = arith.index_cast %157 : i32 to index
    %159 = memref.load %arg1[%158] : memref<168xi32, #tpu.memory_space<smem>>
    %160 = arith.index_cast %159 : i32 to index
    %c0_98 = arith.constant 0 : index
    %c0_99 = arith.constant 0 : index
    %161 = vector.load %arg3[%160, %c0_98, %c0_99] : memref<8x8x256xbf16, #tpu.memory_space<vmem>>, vector<1x8x256xbf16>
    %162 = vector.shape_cast %161 : vector<1x8x256xbf16> to vector<8x256xbf16>
    %c16_100 = arith.constant 16 : index
    %c768_101 = arith.constant 768 : index
    %163 = vector.load %arg9[%c16_100, %c768_101] : memref<24x2048xbf16, #tpu.memory_space<vmem>>, vector<8x256xbf16>
    tpu.vector_store %arg9[%c16_100, %c768_101], %162 {strides = array<i32>} : memref<24x2048xbf16, #tpu.memory_space<vmem>>, vector<8x256xbf16>,
    %c16_i32_102 = arith.constant 16 : i32
    %164 = arith.addi %3, %c16_i32_102 : i32
    %c4_i32_103 = arith.constant 4 : i32
    %165 = arith.addi %164, %c4_i32_103 : i32
    %166 = arith.index_cast %165 : i32 to index
    %167 = memref.load %arg1[%166] : memref<168xi32, #tpu.memory_space<smem>>
    %168 = arith.index_cast %167 : i32 to index
    %c0_104 = arith.constant 0 : index
    %c0_105 = arith.constant 0 : index
    %169 = vector.load %arg3[%168, %c0_104, %c0_105] : memref<8x8x256xbf16, #tpu.memory_space<vmem>>, vector<1x8x256xbf16>
    %170 = vector.shape_cast %169 : vector<1x8x256xbf16> to vector<8x256xbf16>
    %c16_106 = arith.constant 16 : index
    %c1024_107 = arith.constant 1024 : index
    %171 = vector.load %arg9[%c16_106, %c1024_107] : memref<24x2048xbf16, #tpu.memory_space<vmem>>, vector<8x256xbf16>
    tpu.vector_store %arg9[%c16_106, %c1024_107], %170 {strides = array<i32>} : memref<24x2048xbf16, #tpu.memory_space<vmem>>, vector<8x256xbf16>,
    %c16_i32_108 = arith.constant 16 : i32
    %172 = arith.addi %3, %c16_i32_108 : i32
    %c5_i32_109 = arith.constant 5 : i32
    %173 = arith.addi %172, %c5_i32_109 : i32
    %174 = arith.index_cast %173 : i32 to index
    %175 = memref.load %arg1[%174] : memref<168xi32, #tpu.memory_space<smem>>
    %176 = arith.index_cast %175 : i32 to index
    %c0_110 = arith.constant 0 : index
    %c0_111 = arith.constant 0 : index
    %177 = vector.load %arg3[%176, %c0_110, %c0_111] : memref<8x8x256xbf16, #tpu.memory_space<vmem>>, vector<1x8x256xbf16>
    %178 = vector.shape_cast %177 : vector<1x8x256xbf16> to vector<8x256xbf16>
    %c16_112 = arith.constant 16 : index
    %c1280_113 = arith.constant 1280 : index
    %179 = vector.load %arg9[%c16_112, %c1280_113] : memref<24x2048xbf16, #tpu.memory_space<vmem>>, vector<8x256xbf16>
    tpu.vector_store %arg9[%c16_112, %c1280_113], %178 {strides = array<i32>} : memref<24x2048xbf16, #tpu.memory_space<vmem>>, vector<8x256xbf16>,
    %c16_i32_114 = arith.constant 16 : i32
    %180 = arith.addi %3, %c16_i32_114 : i32
    %c6_i32_115 = arith.constant 6 : i32
    %181 = arith.addi %180, %c6_i32_115 : i32
    %182 = arith.index_cast %181 : i32 to index
    %183 = memref.load %arg1[%182] : memref<168xi32, #tpu.memory_space<smem>>
    %184 = arith.index_cast %183 : i32 to index
    %c0_116 = arith.constant 0 : index
    %c0_117 = arith.constant 0 : index
    %185 = vector.load %arg3[%184, %c0_116, %c0_117] : memref<8x8x256xbf16, #tpu.memory_space<vmem>>, vector<1x8x256xbf16>
    %186 = vector.shape_cast %185 : vector<1x8x256xbf16> to vector<8x256xbf16>
    %c16_118 = arith.constant 16 : index
    %c1536_119 = arith.constant 1536 : index
    %187 = vector.load %arg9[%c16_118, %c1536_119] : memref<24x2048xbf16, #tpu.memory_space<vmem>>, vector<8x256xbf16>
    tpu.vector_store %arg9[%c16_118, %c1536_119], %186 {strides = array<i32>} : memref<24x2048xbf16, #tpu.memory_space<vmem>>, vector<8x256xbf16>,
    %c16_i32_120 = arith.constant 16 : i32
    %188 = arith.addi %3, %c16_i32_120 : i32
    %c7_i32_121 = arith.constant 7 : i32
    %189 = arith.addi %188, %c7_i32_121 : i32
    %190 = arith.index_cast %189 : i32 to index
    %191 = memref.load %arg1[%190] : memref<168xi32, #tpu.memory_space<smem>>
    %192 = arith.index_cast %191 : i32 to index
    %c0_122 = arith.constant 0 : index
    %c0_123 = arith.constant 0 : index
    %193 = vector.load %arg3[%192, %c0_122, %c0_123] : memref<8x8x256xbf16, #tpu.memory_space<vmem>>, vector<1x8x256xbf16>
    %194 = vector.shape_cast %193 : vector<1x8x256xbf16> to vector<8x256xbf16>
    %c16_124 = arith.constant 16 : index
    %c1792_125 = arith.constant 1792 : index
    %195 = vector.load %arg9[%c16_124, %c1792_125] : memref<24x2048xbf16, #tpu.memory_space<vmem>>, vector<8x256xbf16>
    tpu.vector_store %arg9[%c16_124, %c1792_125], %194 {strides = array<i32>} : memref<24x2048xbf16, #tpu.memory_space<vmem>>, vector<8x256xbf16>,
    %c0_126 = arith.constant 0 : index
    %c0_127 = arith.constant 0 : index
    %196 = vector.load %arg9[%c0_126, %c0_127] : memref<24x2048xbf16, #tpu.memory_space<vmem>>, vector<24x2048xbf16>
    %c0_128 = arith.constant 0 : index
    %c0_129 = arith.constant 0 : index
    %c0_130 = arith.constant 0 : index
    %197 = vector.load %arg4[%c0_128, %c0_129, %c0_130] : memref<1x2048x256xbf16, #tpu.memory_space<vmem>>, vector<1x2048x256xbf16>
    %198 = vector.shape_cast %197 : vector<1x2048x256xbf16> to vector<2048x256xbf16>
    %cst = arith.constant dense<0.000000e+00> : vector<24x256xf32>
    %199 = tpu.matmul %196, %198, %cst {dimension_numbers = #tpu.dot_dimension_numbers<[1], [0], [0], [1], [0, 0, 1, 1], [], []>} : vector<24x2048xbf16>, vector<2048x256xbf16>, vector<24x256xf32> -> vector<24x256xf32>
    %c0_131 = arith.constant 0 : index
    %c0_132 = arith.constant 0 : index
    %c0_133 = arith.constant 0 : index
    %200 = vector.load %arg5[%c0_131, %c0_132, %c0_133] : memref<1x1x256xf32, #tpu.memory_space<vmem>>, vector<1x1x256xf32>
    %201 = vector.shape_cast %200 : vector<1x1x256xf32> to vector<1x256xf32>
    %202 = vector.broadcast %201 : vector<1x256xf32> to vector<24x256xf32>
    %203 = arith.addf %199, %202 : vector<24x256xf32>
    %cst_134 = arith.constant 0.000000e+00 : f32
    %204 = vector.broadcast %cst_134 : f32 to vector<24x256xf32>
    %205 = arith.maximumf %203, %204 : vector<24x256xf32>
    %206 = arith.truncf %205 : vector<24x256xf32> to vector<24x256xbf16>
    %c0_135 = arith.constant 0 : index
    %c0_136 = arith.constant 0 : index
    %c0_137 = arith.constant 0 : index
    %207 = vector.load %arg6[%c0_135, %c0_136, %c0_137] : memref<1x256x128xbf16, #tpu.memory_space<vmem>>, vector<1x256x128xbf16>
    %208 = vector.shape_cast %207 : vector<1x256x128xbf16> to vector<256x128xbf16>
    %cst_138 = arith.constant dense<0.000000e+00> : vector<24x128xf32>
    %209 = tpu.matmul %206, %208, %cst_138 {dimension_numbers = #tpu.dot_dimension_numbers<[1], [0], [0], [1], [0, 0, 1, 1], [], []>} : vector<24x256xbf16>, vector<256x128xbf16>, vector<24x128xf32> -> vector<24x128xf32>
    %c0_139 = arith.constant 0 : index
    %c0_140 = arith.constant 0 : index
    %c0_141 = arith.constant 0 : index
    %210 = vector.load %arg7[%c0_139, %c0_140, %c0_141] : memref<1x1x128xf32, #tpu.memory_space<vmem>>, vector<1x1x128xf32>
    %211 = vector.shape_cast %210 : vector<1x1x128xf32> to vector<1x128xf32>
    %212 = vector.broadcast %211 : vector<1x128xf32> to vector<24x128xf32>
    %213 = arith.addf %209, %212 : vector<24x128xf32>
    %214 = arith.index_cast %arg0 : i32 to index
    %215 = memref.load %arg2[%214] : memref<7xi32, #tpu.memory_space<smem>>
    %c0_142 = arith.constant 0 : index
    %c0_143 = arith.constant 0 : index
    %216 = vector.load %arg8[%c0_142, %c0_143] : memref<8x128xf32, #tpu.memory_space<vmem>>, vector<8x128xf32>
    %c0_i32_144 = arith.constant 0 : i32
    %217 = arith.cmpi sgt, %215, %c0_i32_144 : i32
    %cst_145 = arith.constant 1.000000e+00 : f32
    %cst_146 = arith.constant 0.000000e+00 : f32
    %218 = arith.select %217, %cst_145, %cst_146 : f32
    %219 = vector.extract_strided_slice %213 {offsets = [0, 0], sizes = [8, 128], strides = [1, 1]} : vector<24x128xf32> to vector<8x128xf32>
    %220 = vector.broadcast %218 : f32 to vector<8x128xf32>
    %221 = arith.mulf %220, %219 : vector<8x128xf32>
    %222 = arith.addf %216, %221 : vector<8x128xf32>
    %c1_i32_147 = arith.constant 1 : i32
    %223 = arith.cmpi sgt, %215, %c1_i32_147 : i32
    %cst_148 = arith.constant 1.000000e+00 : f32
    %cst_149 = arith.constant 0.000000e+00 : f32
    %224 = arith.select %223, %cst_148, %cst_149 : f32
    %225 = vector.extract_strided_slice %213 {offsets = [8, 0], sizes = [8, 128], strides = [1, 1]} : vector<24x128xf32> to vector<8x128xf32>
    %226 = vector.broadcast %224 : f32 to vector<8x128xf32>
    %227 = arith.mulf %226, %225 : vector<8x128xf32>
    %228 = arith.addf %222, %227 : vector<8x128xf32>
    %c2_i32_150 = arith.constant 2 : i32
    %229 = arith.cmpi sgt, %215, %c2_i32_150 : i32
    %cst_151 = arith.constant 1.000000e+00 : f32
    %cst_152 = arith.constant 0.000000e+00 : f32
    %230 = arith.select %229, %cst_151, %cst_152 : f32
    %231 = vector.extract_strided_slice %213 {offsets = [16, 0], sizes = [8, 128], strides = [1, 1]} : vector<24x128xf32> to vector<8x128xf32>
    %232 = vector.broadcast %230 : f32 to vector<8x128xf32>
    %233 = arith.mulf %232, %231 : vector<8x128xf32>
    %234 = arith.addf %228, %233 : vector<8x128xf32>
    %c0_153 = arith.constant 0 : index
    %c0_154 = arith.constant 0 : index
    %235 = vector.load %arg8[%c0_153, %c0_154] : memref<8x128xf32, #tpu.memory_space<vmem>>, vector<8x128xf32>
    tpu.vector_store %arg8[%c0_153, %c0_154], %234 {strides = array<i32>} : memref<8x128xf32, #tpu.memory_space<vmem>>, vector<8x128xf32>,
    return
  }
  func.func @transform_0(%arg0: i32, %arg1: memref<168xi32, #tpu.memory_space<smem>>, %arg2: memref<7xi32, #tpu.memory_space<smem>>) -> (i32, i32, i32) {
    %c0_i32 = arith.constant 0 : i32
    %c0_i32_0 = arith.constant 0 : i32
    %c0_i32_1 = arith.constant 0 : i32
    %c0_i32_2 = arith.constant 0 : i32
    return %c0_i32, %c0_i32_0, %c0_i32_1 : i32, i32, i32
  }
  func.func @transform_1(%arg0: i32, %arg1: memref<168xi32, #tpu.memory_space<smem>>, %arg2: memref<7xi32, #tpu.memory_space<smem>>) -> (i32, i32, i32) {
    %c0_i32 = arith.constant 0 : i32
    %c0_i32_0 = arith.constant 0 : i32
    %c0_i32_1 = arith.constant 0 : i32
    return %arg0, %c0_i32, %c0_i32_0 : i32, i32, i32
  }
  func.func @transform_2(%arg0: i32, %arg1: memref<168xi32, #tpu.memory_space<smem>>, %arg2: memref<7xi32, #tpu.memory_space<smem>>) -> (i32, i32, i32) {
    %c0_i32 = arith.constant 0 : i32
    %c0_i32_0 = arith.constant 0 : i32
    %c0_i32_1 = arith.constant 0 : i32
    return %arg0, %c0_i32, %c0_i32_0 : i32, i32, i32
  }
  func.func @transform_3(%arg0: i32, %arg1: memref<168xi32, #tpu.memory_space<smem>>, %arg2: memref<7xi32, #tpu.memory_space<smem>>) -> (i32, i32, i32) {
    %c0_i32 = arith.constant 0 : i32
    %c0_i32_0 = arith.constant 0 : i32
    %c0_i32_1 = arith.constant 0 : i32
    return %arg0, %c0_i32, %c0_i32_0 : i32, i32, i32
  }
  func.func @transform_4(%arg0: i32, %arg1: memref<168xi32, #tpu.memory_space<smem>>, %arg2: memref<7xi32, #tpu.memory_space<smem>>) -> (i32, i32, i32) {
    %c0_i32 = arith.constant 0 : i32
    %c0_i32_0 = arith.constant 0 : i32
    %c0_i32_1 = arith.constant 0 : i32
    return %arg0, %c0_i32, %c0_i32_0 : i32, i32, i32
  }
  func.func @transform_5(%arg0: i32, %arg1: memref<168xi32, #tpu.memory_space<smem>>, %arg2: memref<7xi32, #tpu.memory_space<smem>>) -> (i32, i32) {
    %c0_i32 = arith.constant 0 : i32
    %c0_i32_0 = arith.constant 0 : i32
    %c0_i32_1 = arith.constant 0 : i32
    return %c0_i32, %c0_i32_0 : i32, i32
  }
}

</mosaic_0001>

<bundles_post_ra>
// kernel: _trn_forward.2
= control target key start
LH: loop header
LB: loop body
LE: loop exit
PB: predicated region body
PF: predicated region fallthrough
CT: control target
= control target key end

     0   :  { %s3032_s0 = inlined_call_operand.vmem [shape: bf16[64,768], index: 0, kind: input, shape index: {}]   ;;  %s3033_s1 = inlined_call_operand.hbm [shape: bf16[768,1024], index: 1, kind: input, shape index: {}]   ;;  %s3034_s2 = inlined_call_operand.hbm [shape: f32[1,1024], index: 2, kind: input, shape index: {}]   ;;  %s3035_s3 = inlined_call_operand.hbm [shape: bf16[1024,256], index: 3, kind: input, shape index: {}]   ;;  %s3036_s4 = inlined_call_operand.hbm [shape: f32[1,256], index: 4, kind: input, shape index: {}]   ;;  %s3037_s5 = inlined_call_operand.vmem [shape: bf16[64,256], index: 5, kind: output, shape index: {}]  }
   0x1   :  { %3045 = sst [smem:[#allocation13_spill]] %s3034_s2 }
   0x2   :  { %10 = vsyncpa [#allocation4], 0 }
   0x3   :  { %12 = vsyncpa [#allocation4 + $0x1], 0 }
   0x4   :  { %13 = vsyncpa [#allocation6], 0 }
   0x5   :  { %15 = vsyncpa [#allocation6 + $0x1], 0 }
   0x6   :  { %16 = vsyncpa [#allocation9], 0  ;;  %s2561_s18 = smov 0   ;;  %s2563_s19 = smov 0  }
   0x7   :  { %s2565_s20 = smov 0   ;;  %s2567_s21 = smov 0  }
   0x8 LB: > { %s2582_s22 = sadd.s32 1, %s2521_s21   ;;  %s50_s23 = sadd.s32 1, %s2517_s20  ;;  %s2521_s21 = sphi %s2567_s21, %s3063_s21   ;;  %s2517_s20 = sphi %s2565_s20, %s3062_s20   ;;  %s2513_s19 = sphi %s2563_s19, %s3061_s19   ;;  %s2509_s18 = sphi %s2561_s18, %s3060_s18  }
   0x9   : > { %s47_s24 = ssub.s32 %s2521_s21, %s2582_s22  ;;  %p57_p0 = scmp.ne.s32.totalorder %s2517_s20, %s2513_s19 }
   0xa   : > { %p48_p1 = scmp.eq.s32.totalorder %s47_s24, 0  ;;  %p58_p2 = scmp.eq.s32.totalorder %s2521_s21, 0 }
   0xb   : > { %p2094_p3 = scmp.lt.s32.totalorder %s2521_s21, 4  ;;  %s2595_s26 = sand.u32 1, %s2517_s20  }
   0xc   : > { %s2592_s25 = scalar_select %p48_p1, %s2517_s20, %s50_s23  }
   0xd   : > { %p59_p4 = por %p58_p2, %p57_p0  ;;  %s2067_s27 = smul.u32 768, %s2595_s26 }
   0xe   : > { %s216_s28 = sand.u32 1, %s2521_s21   ;;  %s1832_s30 = sshll.u32 %s2595_s26, 1 }
   0xf   : > { %p2599_p5 = pnand %p2094_p3, %p59_p4  ;;  %s2008_s6 = sshll.u32 %s2521_s21, 5 }
  0x10   : > { %s3047_s2 = sld [smem:[#allocation13_spill]]  ;;  %s220_s10 = scalar_lea.vmem [#allocation5], %s1832_s30 }
  0x11   : > { %s3046_s29 = scalar_select %p2599_p5, 1, 0 }
  0x12   : > { %s228_s11 = sshll.u32 %s220_s10, 4  ;;  %s2613_s13 = scalar_lea.sflag [#allocation6], %s216_s28  ;;  %s2610_s11 = int_to_ptr.vmem [resolvable:$true] %s228_s11 }
  0x13   : > { %p2619_p7 = pneg %p2599_p5 }
  0x15   : > { %s3048_s15 = scalar_select %p2619_p7, 1, 0 }
  0x16   : > { %s2608_s9 = scalar_lea.hbm %s3047_s2, %s2008_s6  ;;  %s2366_s23 = scalar_lea.hbm %s3047_s2, 128 }
  0x17   : > { %s2361_s14 = scalar_lea.hbm %s2608_s9, 32  ;;  %p2367_p10 = scmp.lt.u32.totalorder %s2608_s9, %s3047_s2 }
  0x18   : > { %p2362_p6 = scmp.ne.s32.totalorder %s2608_s9, %s2361_s14  ;;  %p2368_p11 = scmp.lt.u32.totalorder %s2366_s23, %s2361_s14 }
  0x19   : > { %p2370_p13 = scmp.lt.u32.totalorder %s2361_s14, %s2608_s9 }
  0x1a   : > { %p2364_p8 = pnand %p2619_p7, %p2362_p6  ;;  %p2369_p12 = por %p2368_p11, %p2367_p10 }
  0x1c   : > { %p2365_p9 = pneg %p2364_p8  ;;  %p2371_p0 = por %p2370_p13, %p2369_p12 }
  0x1e   : > { %p2372_p1 = pnand %p2371_p0, %p2365_p9 }
  0x20   : > { %2375 = shalt.err (!%p2372_p1)
}
  0x21   : > { %s2376_s28 = scalar_lea.vmem %s2610_s11, 32  ;;  %s2523_s6 = smov [#allocation5]  }
  0x22   : > { %p2377_p2 = scmp.ne.s32.totalorder %s2610_s11, %s2376_s28  ;;  %s2381_s7 = sshll.u32 %s2523_s6, 4  ;;  %s2382_s7 = int_to_ptr.vmem [resolvable:$false] %s2381_s7 }
  0x23   : > { %s2383_s8 = scalar_lea.vmem %s2382_s7, 64  ;;  %p2384_p6 = scmp.lt.s32.totalorder %s2610_s11, %s2382_s7 }
  0x24   : > { %p2379_p3 = pnand %p2377_p2, %p2619_p7  ;;  %p2385_p8 = scmp.lt.s32.totalorder %s2383_s8, %s2376_s28 }
  0x26   : > { %p2380_p4 = pneg %p2379_p3  ;;  %p2386_p10 = por %p2385_p8, %p2384_p6 }
  0x28   : > { %p2387_p11 = pnand %p2386_p10, %p2380_p4 }
  0x2a   : > { %2390 = shalt.err (!%p2387_p11)
}
  0x2b   : > { %2089 = dma.hbm_to_vmem [thread:$0]  (!%p2599_p5), %s2608_s9, 32, %s2610_s11, %s2613_s13  }
  0x2c   : > { %s2644_s10 = sadd.s32 4294967295, %s2521_s21   ;;  %p63_p12 = scmp.ne.s32.totalorder %s2513_s19, %s2509_s18 }
  0x2d   : > { %p3038_p9 = scmp.eq.s32.totalorder %s2644_s10, 0  ;;  %p1827_p13 = scmp.ge.s32.totalorder %s2521_s21, 1 }
  0x2e   : > { %p168_p0 = scmp.lt.s32.totalorder %s2521_s21, 5  ;;  %s2524_s9 = smov [#allocation8]  }
  0x2f   : > { %p2654_p2 = por %p3038_p9, %p63_p12  ;;  %s184_s11 = sshll.u32 %s2524_s9, 4  ;;  %s185_s11 = int_to_ptr.vmem [resolvable:$true] %s184_s11 }
  0x30   : > { %p2658_p3 = pnand %p1827_p13, %p168_p0  ;;  %s2007_s17 = sshll.u32 %s2521_s21, 7 }
  0x31   : > { %s3049_s14 = scalar_select %p2654_p2, 1, 0 }
  0x32   : > { %s3050_s16 = scalar_select %p2658_p3, 1, 0 }
  0x33   : > { %p2079_p4 = pneg %p2658_p3  ;;  %s199_s18 = scalar_lea.vmem [#allocation3], %s2067_s27 }
  0x34   : > { %s206_s23 = sshll.u32 %s199_s18, 4  ;;  %s2676_s6 = scalar_lea.hbm %s3033_s1, %s2007_s17  ;;  %s2678_s23 = int_to_ptr.vmem [resolvable:$true] %s206_s23 }
  0x35   : > { %p2669_p6 = pnand %p2079_p4, %p3038_p9  ;;  %s2391_s9 = scalar_lea.hbm %s3036_s4, 32 }
  0x36   : > { %p2392_p8 = scmp.ne.s32.totalorder %s3036_s4, %s2391_s9  ;;  %p2398_p13 = scmp.lt.u32.totalorder %s2391_s9, %s3036_s4 }
  0x37   : > { %p2393_p10 = pneg %p2669_p6 }
  0x39   : > { %p2394_p11 = pnand %p2393_p10, %p2392_p8 }
  0x3b   : > { %p2395_p12 = pneg %p2394_p11 }
  0x3d   : > { %p2400_p0 = pnand %p2398_p13, %p2395_p12 }
  0x3f   : > { %2403 = shalt.err (!%p2400_p0)
}
  0x40   : > { %s2404_s17 = scalar_lea.vmem %s185_s11, 32  ;;  %p2412_p2 = scmp.lt.s32.totalorder %s185_s11, %s185_s11 }
  0x41   : > { %p2405_p4 = scmp.ne.s32.totalorder %s185_s11, %s2404_s17  ;;  %p2413_p3 = scmp.lt.s32.totalorder %s2404_s17, %s2404_s17 }
  0x43   : > { %p2407_p1 = pnand %p2405_p4, %p2393_p10  ;;  %p2414_p5 = por %p2413_p3, %p2412_p2 }
  0x45   : > { %p2408_p9 = pneg %p2407_p1 }
  0x47   : > { %p2415_p7 = pnand %p2414_p5, %p2408_p9 }
  0x49   : > { %2418 = shalt.err (!%p2415_p7)
}
  0x4a   : > { %2082 = dma.hbm_to_vmem [thread:$0]  (!%p2669_p6), %s3036_s4, 32, %s185_s11, [#allocation9]  }
  0x4b   : > { %s196_s2 = scalar_lea.sflag [#allocation4], %s2595_s26  ;;  %s2419_s28 = scalar_lea.hbm %s2676_s6, 12288 }
  0x4c   : > { %p2420_p1 = scmp.ne.s32.totalorder %s2676_s6, %s2419_s28  ;;  %p3052_p8 = scmp.ne.s32.totalorder %s3048_s15, 0 }
  0x4d   : > { %s2424_s24 = scalar_lea.hbm %s3033_s1, 49152  ;;  %p2425_p5 = scmp.lt.u32.totalorder %s2676_s6, %s3033_s1 }
  0x4e   : > { %p2422_p10 = pnand %p2420_p1, %p3052_p8  ;;  %p2426_p7 = scmp.lt.u32.totalorder %s2424_s24, %s2419_s28 }
  0x4f   : > { %p2428_p3 = scmp.lt.u32.totalorder %s2419_s28, %s2676_s6 }
  0x50   : > { %p2423_p2 = pneg %p2422_p10  ;;  %p2427_p9 = por %p2426_p7, %p2425_p5 }
  0x52   : > { %p2429_p11 = por %p2428_p3, %p2427_p9 }
  0x54   : > { %p2430_p12 = pnand %p2429_p11, %p2423_p2 }
  0x56   : > { %2433 = shalt.err (!%p2430_p12)
}
  0x57   : > { %s2434_s11 = scalar_lea.vmem %s2678_s23, 12288  ;;  %s2525_s18 = smov [#allocation3]  }
  0x58   : > { %p2435_p6 = scmp.ne.s32.totalorder %s2678_s23, %s2434_s11  ;;  %s2439_s17 = sshll.u32 %s2525_s18, 4  ;;  %s2440_s17 = int_to_ptr.vmem [resolvable:$false] %s2439_s17 }
  0x59   : > { %s2441_s12 = scalar_lea.vmem %s2440_s17, 24576  ;;  %p2442_p4 = scmp.lt.s32.totalorder %s2678_s23, %s2440_s17 }
  0x5a   : > { %p2437_p13 = pnand %p2435_p6, %p3052_p8  ;;  %p2443_p1 = scmp.lt.s32.totalorder %s2441_s12, %s2434_s11 }
  0x5c   : > { %p2438_p0 = pneg %p2437_p13  ;;  %p2444_p10 = por %p2443_p1, %p2442_p4 }
  0x5e   : > { %p2445_p5 = pnand %p2444_p10, %p2438_p0 }
  0x60   : > { %2448 = shalt.err (!%p2445_p5)
}
  0x61   : > { %s2526_s30 = smov 512   ;;  %s2527_s28 = smov 128  }
  0x62   : > { %s2528_s7 = smov 8   ;;  %p3053_p2 = scmp.ne.s32.totalorder %s3046_s29, 0 }
  0x63   : > { %s2010_s8 = sshll.u32 %s2521_s21, 12  ;;  %s3054_s24 = sshll.u32 %s2595_s26, 8 }
  0x64   : > { %2086 = dma.hbm_to_vmem [thread:$0]  (!%p3053_p2), %s2676_s6, 12288, %s2678_s23, %s196_s2, %s2526_s30, %s2527_s28, %s2528_s7  }
  0x65   : > { %s239_s9 = scalar_lea.vmem [#allocation7], %s3054_s24  ;;  %s2728_s17 = scalar_lea.hbm %s3035_s3, %s2010_s8 }
  0x66   : > { %s247_s27 = sshll.u32 %s239_s9, 4  ;;  %s2449_s12 = scalar_lea.hbm %s2728_s17, 4096  ;;  %s2730_s27 = int_to_ptr.vmem [resolvable:$true] %s247_s27 }
  0x67   : > { %p2450_p7 = scmp.ne.s32.totalorder %s2728_s17, %s2449_s12  ;;  %s2454_s23 = scalar_lea.hbm %s3035_s3, 16384 }
  0x68   : > { %p2455_p11 = scmp.lt.u32.totalorder %s2728_s17, %s3035_s3  ;;  %p2456_p12 = scmp.lt.u32.totalorder %s2454_s23, %s2449_s12 }
  0x69   : > { %p2452_p9 = pnand %p2450_p7, %p3052_p8  ;;  %p2458_p13 = scmp.lt.u32.totalorder %s2449_s12, %s2728_s17 }
  0x6a   : > { %p2457_p6 = por %p2456_p12, %p2455_p11 }
  0x6b   : > { %p2453_p3 = pneg %p2452_p9 }
  0x6c   : > { %p2459_p0 = por %p2458_p13, %p2457_p6 }
  0x6e   : > { %p2460_p4 = pnand %p2459_p0, %p2453_p3 }
  0x70   : > { %2463 = shalt.err (!%p2460_p4)
}
  0x71   : > { %s2464_s30 = scalar_lea.vmem %s2730_s27, 4096  ;;  %s2529_s8 = smov [#allocation7]  }
  0x72   : > { %p2465_p1 = scmp.ne.s32.totalorder %s2730_s27, %s2464_s30  ;;  %s2469_s24 = sshll.u32 %s2529_s8, 4  ;;  %s2470_s24 = int_to_ptr.vmem [resolvable:$false] %s2469_s24 }
  0x73   : > { %s2471_s9 = scalar_lea.vmem %s2470_s24, 8192  ;;  %p2472_p7 = scmp.lt.s32.totalorder %s2730_s27, %s2470_s24 }
  0x74   : > { %p2467_p10 = pnand %p2465_p1, %p3052_p8  ;;  %p2473_p9 = scmp.lt.s32.totalorder %s2471_s9, %s2464_s30 }
  0x76   : > { %p2468_p5 = pneg %p2467_p10  ;;  %p2474_p11 = por %p2473_p9, %p2472_p7 }
  0x78   : > { %p2475_p12 = pnand %p2474_p11, %p2468_p5 }
  0x7a   : > { %2478 = shalt.err (!%p2475_p12)
}
  0x7b   : > { %2092 = dma.hbm_to_vmem [thread:$0]  (!%p3053_p2), %s2728_s17, 4096, %s2730_s27, %s2613_s13, %s2527_s28, %s2527_s28, %s2528_s7  }
  0x7c   : > { %p3055_p8 = scmp.ne.s32.totalorder %s3050_s16, 0 }
  0x7d   : > { %s261_s15 = sand.u32 (!%p3055_p8), 1, %s2513_s19   ;;  %p3056_p3 = scmp.ne.s32.totalorder (!%p3055_p8), %s3049_s14, 0 }
  0x7e   : > { %259 = sbr.rel (%p3055_p8) target bundleno = 755 (0x2f3), region = 40  ;;  %s262_s18 = scalar_lea.sflag (!%p3055_p8), [#allocation4], %s261_s15 }
  0x7f   : > { %s2068_s11 = smul.u32 (!%p3055_p8), 768, %s261_s15 }
  0x81   : > { %s2760_s12 = scalar_lea.vmem (!%p3055_p8), [#allocation3], %s2068_s11 }
  0x85   : > { %2496 = dma.done.wait (%p3056_p3), %s262_s18, 12288  }
  0x86   : > { %2498 = vsyncadd (%p3056_p3), %s262_s18, 4294955008  ;;  %s270_s29 = sand.u32 1, %s2644_s10   ;;  %s1840_s21 = sshll.u32 %s261_s15, 1 }
  0x87   : > { %s271_s13 = scalar_lea.sflag [#allocation6], %s270_s29  ;;  %s2767_s28 = scalar_lea.vmem [#allocation5], %s1840_s21 }
  0x88   : > { %2500 = dma.done.wait (%p3056_p3), %s271_s13, 4128  }
  0x89   : > { %2502 = vsyncadd (%p3056_p3), %s271_s13, 4294963168  ;;  %s1841_s16 = sshll.u32 %s261_s15, 8  ;;  %p3057_p2 = scmp.eq.s32.totalorder %s2644_s10, 0 }
  0x8a   : > { %s2773_s7 = scalar_lea.vmem [#allocation7], %s1841_s16 }
  0x8b   : > { %2504 = dma.done.wait (%p3057_p2), [#allocation9], 32   ;;  %p3058_p6 = pmov %p3057_p2 }
  0x8c   : > { %p3059_p13 = scmp.ne.s32.totalorder %s2644_s10, 0 }
  0x8d   : > { %2506 = vsyncadd (%p3058_p6), [#allocation9], 4294967264  ;;  %v2530_v0 = vmov (!%p3059_p13), 0.0  }
  0x8e   : > { %325 = sbr.rel (%p3059_p13) target bundleno = 150 (0x96), region = 60  ;;  %326 = vst [vmem:[#allocation2] sm:$0xff] (!%p3059_p13), %v2530_v0  ;;  %327 = vst [vmem:[#allocation2 + $0x8] sm:$0xff] (!%p3059_p13), %v2530_v0 }
  0x8f   : > { %328 = vst [vmem:[#allocation2 + $0x10] sm:$0xff] (!%p3059_p13), %v2530_v0  ;;  %329 = vst [vmem:[#allocation2 + $0x18] sm:$0xff] (!%p3059_p13), %v2530_v0 }
  0x90   : > { %330 = vst [vmem:[#allocation2 + $0x20] sm:$0xff] (!%p3059_p13), %v2530_v0  ;;  %331 = vst [vmem:[#allocation2 + $0x28] sm:$0xff] (!%p3059_p13), %v2530_v0 }
  0x91   : > { %332 = vst [vmem:[#allocation2 + $0x30] sm:$0xff] (!%p3059_p13), %v2530_v0  ;;  %333 = vst [vmem:[#allocation2 + $0x38] sm:$0xff] (!%p3059_p13), %v2530_v0 }
  0x92   : > { %334 = vst [vmem:[#allocation2 + $0x40] sm:$0xff] (!%p3059_p13), %v2530_v0  ;;  %335 = vst [vmem:[#allocation2 + $0x48] sm:$0xff] (!%p3059_p13), %v2530_v0 }
  0x93   : > { %336 = vst [vmem:[#allocation2 + $0x50] sm:$0xff] (!%p3059_p13), %v2530_v0  ;;  %337 = vst [vmem:[#allocation2 + $0x58] sm:$0xff] (!%p3059_p13), %v2530_v0 }
  0x94   : > { %338 = vst [vmem:[#allocation2 + $0x60] sm:$0xff] (!%p3059_p13), %v2530_v0  ;;  %339 = vst [vmem:[#allocation2 + $0x68] sm:$0xff] (!%p3059_p13), %v2530_v0 }
  0x95   : > { %340 = vst [vmem:[#allocation2 + $0x70] sm:$0xff] %v2530_v0  ;;  %341 = vst [vmem:[#allocation2 + $0x78] sm:$0xff] %v2530_v0 }
  0x96 PF: > { %v2133_v1 = vld [vmem:[%s2760_s12 + $0x104] ss:$8 sps:$4 sm:$0xff]   ;;  %v2135_v2 = vld [vmem:[%s2760_s12 + $0x100] ss:$8 sps:$4 sm:$0xff]   ;;  %v2136_v3 = vld [vmem:[%s2760_s12 + $0x114] ss:$8 sps:$4 sm:$0xff]  }
  0x97   : > { %1147 = vmatprep.subr.bf16.mxu0 %v2133_v1  ;;  %v2138_v4 = vld [vmem:[%s2760_s12 + $0x110] ss:$8 sps:$4 sm:$0xff]   ;;  %v2139_v5 = vld [vmem:[%s2760_s12 + $0x124] ss:$8 sps:$4 sm:$0xff]   ;;  %v2141_v6 = vld [vmem:[%s2760_s12 + $0x120] ss:$8 sps:$4 sm:$0xff]  }
  0x98   : > { %1148 = vmatpush1.bf16.msra.mxu0 %v2135_v2  ;;  %v2142_v7 = vld [vmem:[%s2760_s12 + $0x134] ss:$8 sps:$4 sm:$0xff]   ;;  %v2144_v8 = vld [vmem:[%s2760_s12 + $0x130] ss:$8 sps:$4 sm:$0xff]   ;;  %v2145_v9 = vld [vmem:[%s2760_s12 + $0x144] ss:$8 sps:$4 sm:$0xff]  }
  0x99   : > { %1149 = vmatprep.subr.bf16.mxu0 %v2136_v3  ;;  %v2147_v10 = vld [vmem:[%s2760_s12 + $0x140] ss:$8 sps:$4 sm:$0xff]   ;;  %v2148_v11 = vld [vmem:[%s2760_s12 + $0x154] ss:$8 sps:$4 sm:$0xff]   ;;  %v2150_v12 = vld [vmem:[%s2760_s12 + $0x150] ss:$8 sps:$4 sm:$0xff]  }
  0x9a   : > { %v2151_v13 = vld [vmem:[%s2760_s12 + $0x164] ss:$8 sps:$4 sm:$0xff]   ;;  %v2180_v15 = vld [vmem:[%s2760_s12] ss:$8 sps:$4 sm:$0xff]   ;;  %v2184_v17 = vld [vmem:[%s2760_s12 + $0x14] ss:$8 sps:$4 sm:$0xff]  }
  0x9b   : > { %v2178_v14 = vld [vmem:[%s2760_s12 + $0x4] ss:$8 sps:$4 sm:$0xff]   ;;  %v2153_v16 = vld [vmem:[%s2760_s12 + $0x160] ss:$8 sps:$4 sm:$0xff]   ;;  %v2186_v18 = vld [vmem:[%s2760_s12 + $0x10] ss:$8 sps:$4 sm:$0xff]  }
  0x9c   : > { %1150 = vmatpush1.bf16.msra.mxu0 %v2138_v4  ;;  %1074 = vmatprep.subr.bf16.mxu1 %v2178_v14  ;;  %v2154_v19 = vld [vmem:[%s2760_s12 + $0x174] ss:$8 sps:$4 sm:$0xff]   ;;  %v2189_v20 = vld [vmem:[%s3032_s0 + $0xc] ss:$24 sps:$4 sm:$0xff]   ;;  %v2156_v21 = vld [vmem:[%s2760_s12 + $0x170] ss:$8 sps:$4 sm:$0xff]  }
  0x9d   : > { %1151 = vmatprep.subr.bf16.mxu0 %v2139_v5  ;;  %1075 = vmatpush1.bf16.msra.mxu1 %v2180_v15  ;;  %v2193_v22 = vld [vmem:[%s2760_s12 + $0x24] ss:$8 sps:$4 sm:$0xff]   ;;  %v2195_v23 = vld [vmem:[%s2760_s12 + $0x20] ss:$8 sps:$4 sm:$0xff]   ;;  %v2199_v26 = vld [vmem:[%s2760_s12 + $0x34] ss:$8 sps:$4 sm:$0xff]  }
  0x9e   : > { %1076 = vmatprep.subr.bf16.mxu1 %v2184_v17  ;;  %v2157_v24 = vld [vmem:[%s2760_s12 + $0x184] ss:$8 sps:$4 sm:$0xff]   ;;  %1179 = vmatprep.mubr.bf16.mxu0 %v2189_v20  ;;  %v2159_v25 = vld [vmem:[%s2760_s12 + $0x180] ss:$8 sps:$4 sm:$0xff]   ;;  %v2160_v27 = vld [vmem:[%s2760_s12 + $0x194] ss:$8 sps:$4 sm:$0xff]  }
  0x9f   : > { %v2201_v28 = vld [vmem:[%s2760_s12 + $0x30] ss:$8 sps:$4 sm:$0xff]   ;;  %v2205_v29 = vld [vmem:[%s2760_s12 + $0x44] ss:$8 sps:$4 sm:$0xff]   ;;  %v2207_v32 = vld [vmem:[%s2760_s12 + $0x40] ss:$8 sps:$4 sm:$0xff]  }
  0xa0   : > { %1152 = vmatpush1.bf16.msra.mxu0 %v2141_v6  ;;  %v2162_v30 = vld [vmem:[%s2760_s12 + $0x190] ss:$8 sps:$4 sm:$0xff]   ;;  %v2163_v31 = vld [vmem:[%s2760_s12 + $0x1a4] ss:$8 sps:$4 sm:$0xff]   ;;  %v2211_v33 = vld [vmem:[%s2760_s12 + $0x54] ss:$8 sps:$4 sm:$0xff]  }
  0xa1   : > { %1153 = vmatprep.subr.bf16.mxu0 %v2142_v7  ;;  %1077 = vmatpush1.bf16.msra.mxu1 %v2186_v18  ;;  %v2165_v34 = vld [vmem:[%s2760_s12 + $0x1a0] ss:$8 sps:$4 sm:$0xff]   ;;  %v2166_v35 = vld [vmem:[%s2760_s12 + $0x1b4] ss:$8 sps:$4 sm:$0xff]   ;;  %v2213_v36 = vld [vmem:[%s2760_s12 + $0x50] ss:$8 sps:$4 sm:$0xff]  }
  0xa2   : > { %1078 = vmatprep.subr.bf16.mxu1 %v2193_v22  ;;  %v2217_v37 = vld [vmem:[%s2760_s12 + $0x64] ss:$8 sps:$4 sm:$0xff]   ;;  %v2168_v38 = vld [vmem:[%s2760_s12 + $0x1b0] ss:$8 sps:$4 sm:$0xff]   ;;  %v2219_v40 = vld [vmem:[%s2760_s12 + $0x60] ss:$8 sps:$4 sm:$0xff]  }
  0xa3   : > { %v2169_v39 = vld [vmem:[%s2760_s12 + $0x1c4] ss:$8 sps:$4 sm:$0xff]   ;;  %v2223_v41 = vld [vmem:[%s2760_s12 + $0x74] ss:$8 sps:$4 sm:$0xff]   ;;  %v2171_v42 = vld [vmem:[%s2760_s12 + $0x1c0] ss:$8 sps:$4 sm:$0xff]  }
  0xa4   : > { %1154 = vmatpush1.bf16.msra.mxu0 %v2144_v8  ;;  %v2172_v43 = vld [vmem:[%s2760_s12 + $0x1d4] ss:$8 sps:$4 sm:$0xff]   ;;  %v2225_v44 = vld [vmem:[%s2760_s12 + $0x70] ss:$8 sps:$4 sm:$0xff]   ;;  %v2229_v45 = vld [vmem:[%s2760_s12 + $0x84] ss:$8 sps:$4 sm:$0xff]  }
  0xa5   : > { %1155 = vmatprep.subr.bf16.mxu0 %v2145_v9  ;;  %1079 = vmatpush1.bf16.msra.mxu1 %v2195_v23  ;;  %v2174_v46 = vld [vmem:[%s2760_s12 + $0x1d0] ss:$8 sps:$4 sm:$0xff]   ;;  %v2231_v47 = vld [vmem:[%s2760_s12 + $0x80] ss:$8 sps:$4 sm:$0xff]   ;;  %v2175_v48 = vld [vmem:[%s2760_s12 + $0x1e4] ss:$8 sps:$4 sm:$0xff]  }
  0xa6   : > { %1080 = vmatprep.subr.bf16.mxu1 %v2199_v26  ;;  %v2235_v49 = vld [vmem:[%s2760_s12 + $0x94] ss:$8 sps:$4 sm:$0xff]   ;;  %v2177_v50 = vld [vmem:[%s2760_s12 + $0x1e0] ss:$8 sps:$4 sm:$0xff]   ;;  %v2237_v52 = vld [vmem:[%s2760_s12 + $0x90] ss:$8 sps:$4 sm:$0xff]  }
  0xa7   : > { %v2181_v51 = vld [vmem:[%s2760_s12 + $0x1f4] ss:$8 sps:$4 sm:$0xff]   ;;  %v2241_v53 = vld [vmem:[%s2760_s12 + $0xa4] ss:$8 sps:$4 sm:$0xff]   ;;  %v2183_v54 = vld [vmem:[%s2760_s12 + $0x1f0] ss:$8 sps:$4 sm:$0xff]  }
  0xa8   : > { %1156 = vmatpush1.bf16.msra.mxu0 %v2147_v10  ;;  %v2192_v55 = vld [vmem:[%s2760_s12 + $0x204] ss:$8 sps:$4 sm:$0xff]   ;;  %v2243_v56 = vld [vmem:[%s2760_s12 + $0xa0] ss:$8 sps:$4 sm:$0xff]   ;;  %v2247_v57 = vld [vmem:[%s2760_s12 + $0xb4] ss:$8 sps:$4 sm:$0xff]  }
  0xa9   : > { %1157 = vmatprep.subr.bf16.mxu0 %v2148_v11  ;;  %1081 = vmatpush1.bf16.msra.mxu1 %v2201_v28  ;;  %v2187_v58 = vld [vmem:[%s3032_s0 + $0x8] ss:$24 sps:$4 sm:$0xff]   ;;  %v2198_v60 = vld [vmem:[%s2760_s12 + $0x214] ss:$8 sps:$4 sm:$0xff]   ;;  %v2251_v62 = vld [vmem:[%s2760_s12 + $0xb0] ss:$8 sps:$4 sm:$0xff]  }
  0xaa   : > { %1082 = vmatprep.subr.bf16.mxu1 %v2205_v29  ;;  %v2190_v59 = vld [vmem:[%s2760_s12 + $0x200] ss:$8 sps:$4 sm:$0xff]   ;;  %v2249_v61 = vld [vmem:[%s3032_s0 + $0x3c] ss:$24 sps:$4 sm:$0xff]   ;;  %v2256_v63 = vld [vmem:[%s2760_s12 + $0xc4] ss:$8 sps:$4 sm:$0xff]  }
  0xab   : > { %v2196_v0 = vld [vmem:[%s2760_s12 + $0x210] ss:$8 sps:$4 sm:$0xff]   ;;  %v2204_v1 = vld [vmem:[%s2760_s12 + $0x224] ss:$8 sps:$4 sm:$0xff]   ;;  %v2258_v2 = vld [vmem:[%s2760_s12 + $0xc0] ss:$8 sps:$4 sm:$0xff]  }
  0xac   : > { %1158 = vmatpush1.bf16.msra.mxu0 %v2150_v12  ;;  %v2262_v3 = vld [vmem:[%s2760_s12 + $0xd4] ss:$8 sps:$4 sm:$0xff]   ;;  %v2202_v5 = vld [vmem:[%s2760_s12 + $0x220] ss:$8 sps:$4 sm:$0xff]   ;;  %v2252_v6 = vld [vmem:[%s3032_s0 + $0x38] ss:$24 sps:$4 sm:$0xff]  }
  0xad   : > { %1159 = vmatprep.subr.bf16.mxu0 %v2151_v13  ;;  %1083 = vmatpush1.bf16.msra.mxu1 %v2207_v32  ;;  %v2288_v4 = vld [vmem:[%s3032_s0 + $0x4] ss:$24 sps:$4 sm:$0xff]   ;;  %v2266_v9 = vld [vmem:[%s2760_s12 + $0xd0] ss:$8 sps:$4 sm:$0xff]   ;;  %v2273_v13 = vld [vmem:[%s2760_s12 + $0xe0] ss:$8 sps:$4 sm:$0xff]  }
  0xae   : > { %1084 = vmatprep.subr.bf16.mxu1 %v2211_v33  ;;  %v2210_v7 = vld [vmem:[%s2760_s12 + $0x234] ss:$8 sps:$4 sm:$0xff]   ;;  %v2264_v8 = vld [vmem:[%s3032_s0 + $0x6c] ss:$24 sps:$4 sm:$0xff]   ;;  %1106 = vmatprep.mubr.bf16.mxu1 %v2288_v4  ;;  %v2208_v11 = vld [vmem:[%s2760_s12 + $0x230] ss:$8 sps:$4 sm:$0xff]  }
  0xaf   : > { %v2271_v10 = vld [vmem:[%s2760_s12 + $0xe4] ss:$8 sps:$4 sm:$0xff]   ;;  %v2277_v14 = vld [vmem:[%s2760_s12 + $0xf4] ss:$8 sps:$4 sm:$0xff]   ;;  %v2214_v15 = vld [vmem:[%s2760_s12 + $0x240] ss:$8 sps:$4 sm:$0xff]  }
  0xb0   : > { %1160 = vmatpush1.bf16.msra.mxu0 %v2153_v16  ;;  %v2216_v12 = vld [vmem:[%s2760_s12 + $0x244] ss:$8 sps:$4 sm:$0xff]   ;;  %v2267_v16 = vld [vmem:[%s3032_s0 + $0x68] ss:$24 sps:$4 sm:$0xff]   ;;  %v2222_v17 = vld [vmem:[%s2760_s12 + $0x254] ss:$8 sps:$4 sm:$0xff]  }
  0xb1   : > { %1161 = vmatprep.subr.bf16.mxu0 %v2154_v19  ;;  %1085 = vmatpush1.bf16.msra.mxu1 %v2213_v36  ;;  %v2279_v18 = vld [vmem:[%s3032_s0 + $0x9c] ss:$24 sps:$4 sm:$0xff]   ;;  %v2281_v19 = vld [vmem:[%s2760_s12 + $0xf0] ss:$8 sps:$4 sm:$0xff]   ;;  %v2228_v22 = vld [vmem:[%s2760_s12 + $0x264] ss:$8 sps:$4 sm:$0xff]  }
  0xb2   : > { %1086 = vmatprep.subr.bf16.mxu1 %v2217_v37  ;;  %v2315_v20 = vld [vmem:[%s2773_s7 + $0x4] ss:$8 sps:$4 sm:$0xff]   ;;  %v2286_v23 = vld [vmem:[%s3032_s0] ss:$24 sps:$4 sm:$0xff]   ;;  %v2294_v29 = vld [vmem:[%s3032_s0 + $0x14] ss:$24 sps:$4 sm:$0xff]  }
  0xb3   : > { %v2282_v26 = vld [vmem:[%s3032_s0 + $0x98] ss:$24 sps:$4 sm:$0xff]   ;;  %v2226_v28 = vld [vmem:[%s2760_s12 + $0x260] ss:$8 sps:$4 sm:$0xff]   ;;  %v2301_v36 = vld [vmem:[%s3032_s0 + $0x64] ss:$24 sps:$4 sm:$0xff]  }
  0xb4   : > { %1162 = vmatpush1.bf16.msra.mxu0 %v2156_v21  ;;  %v2220_v21 = vld [vmem:[%s2760_s12 + $0x250] ss:$8 sps:$4 sm:$0xff]   ;;  %v2319_v37 = vld [vmem:[%s2773_s7 + $0x20] ss:$8 sps:$4 sm:$0xff]   ;;  %v2340_v4 = vld [vmem:[%s2773_s7 + $0x90] ss:$8 sps:$4 sm:$0xff]  }
  0xb5   : > { %1163 = vmatprep.subr.bf16.mxu0 %v2157_v24  ;;  %1087 = vmatpush1.bf16.msra.mxu1 %v2219_v40  ;;  %v2295_v24 = vld [vmem:[%s3032_s0 + $0x34] ss:$24 sps:$4 sm:$0xff]   ;;  %v2232_v32 = vld [vmem:[%s2760_s12 + $0x270] ss:$8 sps:$4 sm:$0xff]   ;;  %p1996_p0 = scmp.ne.s32.totalorder %s2644_s10, 3 }
  0xb6   : > { %1088 = vmatprep.subr.bf16.mxu1 %v2223_v41  ;;  %v2321_v33 = vld [vmem:[%s2773_s7 + $0x24] ss:$8 sps:$4 sm:$0xff]   ;;  %v2246_v40 = vld [vmem:[%s2760_s12 + $0x294] ss:$8 sps:$4 sm:$0xff]  }
  0xb7   : > { %v2244_v41 = vld [vmem:[%s2760_s12 + $0x290] ss:$8 sps:$4 sm:$0xff]  }
  0xb8   : > { %1164 = vmatpush1.bf16.msra.mxu0 %v2159_v25  ;;  %v2313_v25 = vld [vmem:[%s2773_s7] ss:$8 sps:$4 sm:$0xff]  }
  0xb9   : > { %1165 = vmatprep.subr.bf16.mxu0 %v2160_v27  ;;  %1089 = vmatpush1.bf16.msra.mxu1 %v2225_v44  ;;  %v2318_v27 = vld [vmem:[%s2773_s7 + $0x14] ss:$8 sps:$4 sm:$0xff]  }
  0xba   : > { %1090 = vmatprep.subr.bf16.mxu1 %v2229_v45  ;;  %v2303_v44 = vld [vmem:[%s3032_s0 + $0x60] ss:$24 sps:$4 sm:$0xff]   ;;  %v2255_v45 = vld [vmem:[%s2760_s12 + $0x2a4] ss:$8 sps:$4 sm:$0xff]  }
  0xbc   : > { %1166 = vmatpush1.bf16.msra.mxu0 %v2162_v30  ;;  %v2234_v30 = vld [vmem:[%s2760_s12 + $0x274] ss:$8 sps:$4 sm:$0xff]  }
  0xbd   : > { %1167 = vmatprep.subr.bf16.mxu0 %v2163_v31  ;;  %1091 = vmatpush1.bf16.msra.mxu1 %v2231_v47  ;;  %v2316_v31 = vld [vmem:[%s2773_s7 + $0x10] ss:$8 sps:$4 sm:$0xff]   ;;  %v2325_v47 = vld [vmem:[%s2773_s7 + $0x40] ss:$8 sps:$4 sm:$0xff]  }
  0xbe   : > { %1092 = vmatprep.subr.bf16.mxu1 %v2235_v49  ;;  %v2253_v49 = vld [vmem:[%s2760_s12 + $0x2a0] ss:$8 sps:$4 sm:$0xff]  }
  0xc0   : > { %1168 = vmatpush1.bf16.msra.mxu0 %v2165_v34  ;;  %v2240_v34 = vld [vmem:[%s2760_s12 + $0x284] ss:$8 sps:$4 sm:$0xff]  }
  0xc1   : > { %1169 = vmatprep.subr.bf16.mxu0 %v2166_v35  ;;  %1093 = vmatpush1.bf16.msra.mxu1 %v2237_v52  ;;  %v2297_v35 = vld [vmem:[%s3032_s0 + $0x30] ss:$24 sps:$4 sm:$0xff]  }
  0xc2   : > { %1094 = vmatprep.subr.bf16.mxu1 %v2241_v53  ;;  %v2333_v52 = vld [vmem:[%s2773_s7 + $0x64] ss:$8 sps:$4 sm:$0xff]  }
  0xc3   : > { %v2259_v53 = vld [vmem:[%s2760_s12 + $0x2b0] ss:$8 sps:$4 sm:$0xff]  }
  0xc4   : > { %1170 = vmatpush1.bf16.msra.mxu0 %v2168_v38  ;;  %v2324_v38 = vld [vmem:[%s2773_s7 + $0x34] ss:$8 sps:$4 sm:$0xff]  }
  0xc5   : > { %1171 = vmatprep.subr.bf16.mxu0 %v2169_v39  ;;  %1095 = vmatpush1.bf16.msra.mxu1 %v2243_v56  ;;  %v2238_v39 = vld [vmem:[%s2760_s12 + $0x280] ss:$8 sps:$4 sm:$0xff]   ;;  %v2331_v56 = vld [vmem:[%s2773_s7 + $0x60] ss:$8 sps:$4 sm:$0xff]  }
  0xc6   : > { %1096 = vmatprep.subr.bf16.mxu1 %v2247_v57  ;;  %v2336_v57 = vld [vmem:[%s2773_s7 + $0x74] ss:$8 sps:$4 sm:$0xff]  }
  0xc8   : > { %1172 = vmatpush1.bf16.msra.mxu0 %v2171_v42  ;;  %v2322_v42 = vld [vmem:[%s2773_s7 + $0x30] ss:$8 sps:$4 sm:$0xff]  }
  0xc9   : > { %1173 = vmatprep.subr.bf16.mxu0 %v2172_v43  ;;  %1097 = vmatpush1.bf16.msra.mxu1 %v2251_v62  ;;  %v2327_v43 = vld [vmem:[%s2773_s7 + $0x44] ss:$8 sps:$4 sm:$0xff]  }
  0xca   : > { %1098 = vmatprep.subr.bf16.mxu1 %v2256_v63  ;;  %v2274_v62 = vld [vmem:[%s2760_s12 + $0x2d0] ss:$8 sps:$4 sm:$0xff]   ;;  %v2285_v63 = vld [vmem:[%s2760_s12 + $0x2e4] ss:$8 sps:$4 sm:$0xff]  }
  0xcc   : > { %1174 = vmatpush1.bf16.msra.mxu0 %v2174_v46  ;;  %v2307_v46 = vld [vmem:[%s3032_s0 + $0x94] ss:$24 sps:$4 sm:$0xff]  }
  0xcd   : > { %1175 = vmatprep.subr.bf16.mxu0 %v2175_v48  ;;  %1099 = vmatpush1.bf16.msra.mxu1 %v2258_v2  ;;  %v2330_v48 = vld [vmem:[%s2773_s7 + $0x54] ss:$8 sps:$4 sm:$0xff]  }
  0xce   : > { %1100 = vmatprep.subr.bf16.mxu1 %v2262_v3  ;;  %v2283_v2 = vld [vmem:[%s2760_s12 + $0x2e0] ss:$8 sps:$4 sm:$0xff]   ;;  %v2291_v3 = vld [vmem:[%s2760_s12 + $0x2f4] ss:$8 sps:$4 sm:$0xff]  }
  0xd0   : > { %1176 = vmatpush1.bf16.msra.mxu0 %v2177_v50  ;;  %v2261_v50 = vld [vmem:[%s2760_s12 + $0x2b4] ss:$8 sps:$4 sm:$0xff]  }
  0xd1   : > { %1177 = vmatprep.subr.bf16.mxu0 %v2181_v51  ;;  %1101 = vmatpush1.bf16.msra.mxu1 %v2266_v9  ;;  %v2328_v51 = vld [vmem:[%s2773_s7 + $0x50] ss:$8 sps:$4 sm:$0xff]   ;;  %v2348_v9 = vld [vmem:[%s2773_s7 + $0xb4] ss:$8 sps:$4 sm:$0xff]  }
  0xd2   : > { %1102 = vmatprep.subr.bf16.mxu1 %v2271_v10  ;;  %v2298_v10 = vld [vmem:[%s3032_s0 + $0x44] ss:$24 sps:$4 sm:$0xff]  }
  0xd4   : > { %1178 = vmatpush1.bf16.msra.mxu0 %v2183_v54  ;;  %v2309_v54 = vld [vmem:[%s3032_s0 + $0x90] ss:$24 sps:$4 sm:$0xff]  }
  0xd5   : > { %1220 = vmatprep.subr.bf16.mxu0 %v2192_v55  ;;  %1103 = vmatpush1.bf16.msra.mxu1 %v2273_v13  ;;  %v2270_v55 = vld [vmem:[%s2760_s12 + $0x2c4] ss:$8 sps:$4 sm:$0xff]  }
  0xd6   : > { %1104 = vmatprep.subr.bf16.mxu1 %v2277_v14  ;;  %v2349_v13 = vld [vmem:[%s2773_s7 + $0xc0] ss:$8 sps:$4 sm:$0xff]   ;;  %v2300_v14 = vld [vmem:[%s3032_s0 + $0x40] ss:$24 sps:$4 sm:$0xff]  }
  0xd7   : > { %1180 = vmatmul.mubr.bf16.vlgmr.msra.gmra.mrb[0].mxu0 %v2187_v58  ;;  %v2268_v58 = vld [vmem:[%s2760_s12 + $0x2c0] ss:$8 sps:$4 sm:$0xff]  }
  0xd8   : > { %1221 = vmatpush1.bf16.msra.mxu0 %v2190_v59  ;;  %1189 = vmatprep.mubr.bf16.mxu0 %v2249_v61  ;;  %v2276_v59 = vld [vmem:[%s2760_s12 + $0x2d4] ss:$8 sps:$4 sm:$0xff]   ;;  %v2339_v61 = vld [vmem:[%s2773_s7 + $0x84] ss:$8 sps:$4 sm:$0xff]  }
  0xd9   : > { %1222 = vmatprep.subr.bf16.mxu0 %v2198_v60  ;;  %1105 = vmatpush1.bf16.msra.mxu1 %v2281_v19  ;;  %v2334_v60 = vld [vmem:[%s2773_s7 + $0x70] ss:$8 sps:$4 sm:$0xff]  }
  0xda   : > { %1509 = vmatprep.subr.bf16.mxu1 %v2315_v20  ;;  %v2352_v19 = vld [vmem:[%s2773_s7 + $0xd0] ss:$8 sps:$4 sm:$0xff]   ;;  %v2354_v20 = vld [vmem:[%s2773_s7 + $0xd4] ss:$8 sps:$4 sm:$0xff]  }
  0xdc   : > { %1223 = vmatpush1.bf16.msra.mxu0 %v2196_v0  ;;  %1107 = vmatmul.mubr.bf16.vlgmr.msra.gmra.mrb[0].mxu1 %v2286_v23  ;;  %v2337_v0 = vld [vmem:[%s2773_s7 + $0x80] ss:$8 sps:$4 sm:$0xff]   ;;  %v2360_v23 = vld [vmem:[%s2773_s7 + $0xf4] ss:$8 sps:$4 sm:$0xff]  }
  0xdd   : > { %1224 = vmatprep.subr.bf16.mxu0 %v2204_v1  ;;  %1116 = vmatprep.mubr.bf16.mxu1 %v2295_v24  ;;  %v2342_v1 = vld [vmem:[%s2773_s7 + $0x94] ss:$8 sps:$4 sm:$0xff]   ;;  %v2358_v24 = vld [vmem:[%s2773_s7 + $0xf0] ss:$8 sps:$4 sm:$0xff]  }
  0xde   : > { %1510 = vmatpush1.bf16.msra.mxu1 %v2313_v25 }
  0xdf   : > { %1190 = vmatmul.mubr.bf16.gmra.mrb[4].mxu0 %v2252_v6  ;;  %1511 = vmatprep.subr.bf16.mxu1 %v2318_v27  ;;  %v2289_v6 = vld [vmem:[%s2760_s12 + $0x2f0] ss:$8 sps:$4 sm:$0xff]  }
  0xe0   : > { %1225 = vmatpush1.bf16.msra.mxu0 %v2202_v5  ;;  %1199 = vmatprep.mubr.bf16.mxu0 %v2264_v8  ;;  %v2345_v5 = vld [vmem:[%s2773_s7 + $0xa4] ss:$8 sps:$4 sm:$0xff]  }
  0xe1   : > { %1226 = vmatprep.subr.bf16.mxu0 %v2210_v7  ;;  %v2343_v7 = vld [vmem:[%s2773_s7 + $0xa0] ss:$8 sps:$4 sm:$0xff]   ;;  %v2292_v8 = vld [vmem:[%s3032_s0 + $0x10] ss:$24 sps:$4 sm:$0xff]  }
  0xe2   : > { %1512 = vmatpush1.bf16.msra.mxu1 %v2316_v31 }
  0xe3   : > { %1513 = vmatprep.subr.bf16.mxu1 %v2321_v33 }
  0xe4   : > { %1227 = vmatpush1.bf16.msra.mxu0 %v2208_v11  ;;  %1117 = vmatmul.mubr.bf16.gmra.mrb[4].mxu1 %v2297_v35  ;;  %v2346_v11 = vld [vmem:[%s2773_s7 + $0xb0] ss:$8 sps:$4 sm:$0xff]  }
  0xe5   : > { %1228 = vmatprep.subr.bf16.mxu0 %v2216_v12  ;;  %1126 = vmatprep.mubr.bf16.mxu1 %v2301_v36  ;;  %v2351_v12 = vld [vmem:[%s2773_s7 + $0xc4] ss:$8 sps:$4 sm:$0xff]  }
  0xe6   : > { %1514 = vmatpush1.bf16.msra.mxu1 %v2319_v37  ;;  %v464_v37 = vlaneseq }
  0xe7   : > { %1200 = vmatmul.mubr.bf16.gmra.mrb[8].mxu0 %v2267_v16  ;;  %1515 = vmatprep.subr.bf16.mxu1 %v2324_v38  ;;  %v2306_v16 = vld [vmem:[%s3032_s0 + $0x70] ss:$24 sps:$4 sm:$0xff]  }
  0xe8   : > { %1229 = vmatpush1.bf16.msra.mxu0 %v2214_v15  ;;  %1209 = vmatprep.mubr.bf16.mxu0 %v2279_v18  ;;  %v2304_v15 = vld [vmem:[%s3032_s0 + $0x74] ss:$24 sps:$4 sm:$0xff]   ;;  %v2312_v18 = vld [vmem:[%s3032_s0 + $0xa0] ss:$24 sps:$4 sm:$0xff]  }
  0xe9   : > { %1230 = vmatprep.subr.bf16.mxu0 %v2222_v17  ;;  %v2310_v17 = vld [vmem:[%s3032_s0 + $0xa4] ss:$24 sps:$4 sm:$0xff]  }
  0xea   : > { %1516 = vmatpush1.bf16.msra.mxu1 %v2322_v42  ;;  %v2981_v42 = vshrl.u32 %v464_v37, 7 }
  0xeb   : > { %1517 = vmatprep.subr.bf16.mxu1 %v2327_v43 }
  0xec   : > { %1231 = vmatpush1.bf16.msra.mxu0 %v2220_v21  ;;  %1127 = vmatmul.mubr.bf16.gmra.mrb[8].mxu1 %v2303_v44  ;;  %v2357_v21 = vld [vmem:[%s2773_s7 + $0xe4] ss:$8 sps:$4 sm:$0xff]   ;;  %v466_v43 = vsub.s32 0, %v2981_v42  ;;  %v462_v44 = vld [vmem:[%s2767_s28] sm:$0x3] }
  0xed   : > { %1232 = vmatprep.subr.bf16.mxu0 %v2228_v22  ;;  %1136 = vmatprep.mubr.bf16.mxu1 %v2307_v46  ;;  %v2355_v22 = vld [vmem:[%s2773_s7 + $0xe0] ss:$8 sps:$4 sm:$0xff]  }
  0xee   : > { %1518 = vmatpush1.bf16.msra.mxu1 %v2325_v47  ;;  %v467_v46 = vrot.slane %v462_v44, %v466_v43 }
  0xef   : > { %1210 = vmatmul.mubr.bf16.gmra.mrb[12].mxu0 %v2282_v26  ;;  %1519 = vmatprep.subr.bf16.mxu1 %v2330_v48 }
  0xf0   : > { %1233 = vmatpush1.bf16.msra.mxu0 %v2226_v28  ;;  %1252 = vmatprep.mubr.bf16.mxu0 %v2294_v29 }
  0xf1   : > { %1234 = vmatprep.subr.bf16.mxu0 %v2234_v30 }
  0xf2   : > { %1520 = vmatpush1.bf16.msra.mxu1 %v2328_v51 }
  0xf3   : > { %1521 = vmatprep.subr.bf16.mxu1 %v2333_v52 }
  0xf4   : > { %1235 = vmatpush1.bf16.msra.mxu0 %v2232_v32  ;;  %1137 = vmatmul.mubr.bf16.gmra.mrb[12].mxu1 %v2309_v54 }
  0xf5   : > { %1236 = vmatprep.subr.bf16.mxu0 %v2240_v34 }
  0xf6   : > { %1522 = vmatpush1.bf16.msra.mxu1 %v2331_v56 }
  0xf7   : > { %1523 = vmatprep.subr.bf16.mxu1 %v2336_v57 }
  0xf8   : > { %1237 = vmatpush1.bf16.msra.mxu0 %v2238_v39 }
  0xf9   : > { %1238 = vmatprep.subr.bf16.mxu0 %v2246_v40 }
  0xfa   : > { %1524 = vmatpush1.bf16.msra.mxu1 %v2334_v60 }
  0xfb   : > { %1525 = vmatprep.subr.bf16.mxu1 %v2339_v61 }
  0xfc   : > { %1239 = vmatpush1.bf16.msra.mxu0 %v2244_v41 }
  0xfd   : > { %1240 = vmatprep.subr.bf16.mxu0 %v2255_v45  ;;  %v470_v45 = vsub.s32 1, %v2981_v42 }
  0xfe   : > { %1526 = vmatpush1.bf16.msra.mxu1 %v2337_v0 }
  0xff   : > { %1527 = vmatprep.subr.bf16.mxu1 %v2342_v1  ;;  %v471_v47 = vrot.slane %v462_v44, %v470_v45 }
 0x100   : > { %1241 = vmatpush1.bf16.msra.mxu0 %v2253_v49 }
 0x101   : > { %1242 = vmatprep.subr.bf16.mxu0 %v2261_v50 }
 0x102   : > { %1528 = vmatpush1.bf16.msra.mxu1 %v2340_v4 }
 0x103   : > { %1529 = vmatprep.subr.bf16.mxu1 %v2345_v5 }
 0x104   : > { %1243 = vmatpush1.bf16.msra.mxu0 %v2259_v53 }
 0x105   : > { %1244 = vmatprep.subr.bf16.mxu0 %v2270_v55 }
 0x106   : > { %1530 = vmatpush1.bf16.msra.mxu1 %v2343_v7 }
 0x107   : > { %1531 = vmatprep.subr.bf16.mxu1 %v2348_v9 }
 0x108   : > { %1245 = vmatpush1.bf16.msra.mxu0 %v2268_v58 }
 0x109   : > { %1246 = vmatprep.subr.bf16.mxu0 %v2276_v59 }
 0x10a   : > { %1532 = vmatpush1.bf16.msra.mxu1 %v2346_v11 }
 0x10b   : > { %1533 = vmatprep.subr.bf16.mxu1 %v2351_v12 }
 0x10c   : > { %1247 = vmatpush1.bf16.msra.mxu0 %v2274_v62 }
 0x10d   : > { %1248 = vmatprep.subr.bf16.mxu0 %v2285_v63 }
 0x10e   : > { %1534 = vmatpush1.bf16.msra.mxu1 %v2349_v13 }
 0x10f   : > { %1535 = vmatprep.subr.bf16.mxu1 %v2354_v20 }
 0x110   : > { %1249 = vmatpush1.bf16.msra.mxu0 %v2283_v2 }
 0x111   : > { %1250 = vmatprep.subr.bf16.mxu0 %v2291_v3 }
 0x112   : > { %1536 = vmatpush1.bf16.msra.mxu1 %v2352_v19 }
 0x113   : > { %1537 = vmatprep.subr.bf16.mxu1 %v2357_v21 }
 0x114   : > { %1251 = vmatpush1.bf16.msra.mxu0 %v2289_v6 }
 0x116   : > { %1538 = vmatpush1.bf16.msra.mxu1 %v2355_v22 }
 0x117   : > { %1253 = vmatmul.mubr.bf16.vlgmr.msra.gmra.mrb[0].mxu0 %v2292_v8  ;;  %1539 = vmatprep.subr.bf16.mxu1 %v2360_v23 }
 0x118   : > { %1262 = vmatprep.mubr.bf16.mxu0 %v2298_v10 }
 0x11a   : > { %1540 = vmatpush1.bf16.msra.mxu1 %v2358_v24 }
 0x11f   : > { %1263 = vmatmul.mubr.bf16.gmra.mrb[4].mxu0 %v2300_v14 }
 0x120   : > { %1272 = vmatprep.mubr.bf16.mxu0 %v2304_v15 }
 0x127   : > { %1273 = vmatmul.mubr.bf16.gmra.mrb[8].mxu0 %v2306_v16 }
 0x128   : > { %1282 = vmatprep.mubr.bf16.mxu0 %v2310_v17 }
 0x12f   : > { %1283 = vmatmul.mubr.bf16.gmra.mrb[12].mxu0 %v2312_v18 }
 0x1af   : > { %v1108_v25 = vpop.f32.mrb[0].mxu1 }
 0x1b0   : > { %v1110_v26 = vpop.f32.mrb[1].mxu1  ;;  %v1109_v48 = vadd.f32 %v1108_v25, %v467_v46 }
 0x1b1   : > { %v1112_v27 = vpop.f32.mrb[2].mxu1  ;;  %v1111_v49 = vadd.f32 %v1110_v26, %v471_v47 }
 0x1b2   : > { %v1114_v28 = vpop.f32.mrb[3].mxu1  ;;  %v1113_v51 = vadd.f32 %v1112_v27, %v467_v46 }
 0x1b3   : > { %v1115_v54 = vadd.f32 %v1114_v28, %v471_v47 }
 0x1b7   : > { %v1118_v29 = vpop.f32.mrb[4].mxu1 }
 0x1b8   : > { %v1120_v30 = vpop.f32.mrb[5].mxu1  ;;  %v1119_v61 = vadd.f32 %v1118_v29, %v467_v46 }
 0x1b9   : > { %v1122_v31 = vpop.f32.mrb[6].mxu1  ;;  %v1121_v63 = vadd.f32 %v1120_v30, %v471_v47 }
 0x1ba   : > { %v1124_v32 = vpop.f32.mrb[7].mxu1  ;;  %v1123_v1 = vadd.f32 %v1122_v31, %v467_v46 }
 0x1bb   : > { %v1125_v4 = vadd.f32 %v1124_v32, %v471_v47 }
 0x1bf   : > { %v1128_v33 = vpop.f32.mrb[8].mxu1 }
 0x1c0   : > { %v1130_v34 = vpop.f32.mrb[9].mxu1  ;;  %v1129_v11 = vadd.f32 %v1128_v33, %v467_v46 }
 0x1c1   : > { %v1132_v35 = vpop.f32.mrb[10].mxu1  ;;  %v1131_v13 = vadd.f32 %v1130_v34, %v471_v47 }
 0x1c2   : > { %v1134_v36 = vpop.f32.mrb[11].mxu1  ;;  %v1133_v15 = vadd.f32 %v1132_v35, %v467_v46 }
 0x1c3   : > { %v1135_v18 = vadd.f32 %v1134_v36, %v471_v47 }
 0x1c7   : > { %v1138_v38 = vpop.f32.mrb[12].mxu1 }
 0x1c8   : > { %v1140_v39 = vpop.f32.mrb[13].mxu1  ;;  %v1139_v25 = vadd.f32 %v1138_v38, %v467_v46  ;;  %v1294_v38 = vld [vmem:[#allocation2 + $0x8] sm:$0xff] }
 0x1c9   : > { %v1142_v40 = vpop.f32.mrb[14].mxu1  ;;  %v1141_v27 = vadd.f32 %v1140_v39, %v471_v47  ;;  %v1295_v39 = vld [vmem:[#allocation2 + $0x10] sm:$0xff] }
 0x1ca   : > { %v1144_v41 = vpop.f32.mrb[15].mxu1  ;;  %v1143_v29 = vadd.f32 %v1142_v40, %v467_v46  ;;  %v1296_v40 = vld [vmem:[#allocation2 + $0x18] sm:$0xff] }
 0x1cb   : > { %v1145_v32 = vadd.f32 %v1144_v41, %v471_v47 }
 0x1ea   : > { %v1254_v50 = vpop.f32.mrb[0].mxu0 }
 0x1eb   : > { %v2020_v52 = vadd.f32 %v1254_v50, %v1109_v48  ;;  %v1256_v53 = vpop.f32.mrb[1].mxu0 }
 0x1ec   : > { %v2022_v55 = vadd.f32 %v1256_v53, %v1111_v49  ;;  %v1258_v56 = vpop.f32.mrb[2].mxu0  ;;  %v1293_v49 = vld [vmem:[#allocation2] sm:$0xff] }
 0x1ed   : > { %v2024_v57 = vadd.f32 %v1258_v56, %v1113_v51  ;;  %v1260_v58 = vpop.f32.mrb[3].mxu0  ;;  %v1298_v56 = vld [vmem:[#allocation2 + $0x28] sm:$0xff] }
 0x1ee   : > { %v2026_v59 = vadd.f32 %v1260_v58, %v1115_v54  ;;  %v1299_v58 = vld [vmem:[#allocation2 + $0x30] sm:$0xff] }
 0x1ef   : > { %v1309_v60 = vpack.c.bf16 %v2024_v57, %v2020_v52 }
 0x1f0   : > { %v1310_v62 = vpack.c.bf16 %v2026_v59, %v2022_v55  ;;  %v1297_v55 = vld [vmem:[#allocation2 + $0x20] sm:$0xff] }
 0x1f2   : > { %v1264_v0 = vpop.f32.mrb[4].mxu0  ;;  %1541 = vmatprep.mubr.bf16.mxu1 %v1310_v62 }
 0x1f3   : > { %v2028_v2 = vadd.f32 %v1264_v0, %v1119_v61  ;;  %v1266_v3 = vpop.f32.mrb[5].mxu0  ;;  %1542 = vmatmul.mubr.bf16.vlgmr.msra.gmra.mrb[16].mxu1 %v1309_v60  ;;  %v1300_v61 = vld [vmem:[#allocation2 + $0x38] sm:$0xff] }
 0x1f4   : > { %v2030_v5 = vadd.f32 %v1266_v3, %v1121_v63  ;;  %v1268_v6 = vpop.f32.mrb[6].mxu0  ;;  %v1301_v3 = vld [vmem:[#allocation2 + $0x40] sm:$0xff] }
 0x1f5   : > { %v2032_v7 = vadd.f32 %v1268_v6, %v1123_v1  ;;  %v1270_v8 = vpop.f32.mrb[7].mxu0  ;;  %v1303_v6 = vld [vmem:[#allocation2 + $0x50] sm:$0xff] }
 0x1f6   : > { %v2034_v9 = vadd.f32 %v1270_v8, %v1125_v4  ;;  %v1302_v4 = vld [vmem:[#allocation2 + $0x48] sm:$0xff] }
 0x1f7   : > { %v1311_v10 = vpack.c.bf16 %v2032_v7, %v2028_v2 }
 0x1f8   : > { %v1312_v12 = vpack.c.bf16 %v2034_v9, %v2030_v5  ;;  %v1304_v9 = vld [vmem:[#allocation2 + $0x58] sm:$0xff] }
 0x1fa   : > { %v1274_v14 = vpop.f32.mrb[8].mxu0  ;;  %1551 = vmatprep.mubr.bf16.mxu1 %v1312_v12 }
 0x1fb   : > { %v2036_v16 = vadd.f32 %v1274_v14, %v1129_v11  ;;  %v1276_v17 = vpop.f32.mrb[9].mxu0  ;;  %1552 = vmatmul.mubr.bf16.gmra.mrb[20].mxu1 %v1311_v10 }
 0x1fc   : > { %v2038_v19 = vadd.f32 %v1276_v17, %v1131_v13  ;;  %v1278_v20 = vpop.f32.mrb[10].mxu0 }
 0x1fd   : > { %v2040_v21 = vadd.f32 %v1278_v20, %v1133_v15  ;;  %v1280_v22 = vpop.f32.mrb[11].mxu0  ;;  %v1305_v15 = vld [vmem:[#allocation2 + $0x60] sm:$0xff] }
 0x1fe   : > { %v2042_v23 = vadd.f32 %v1280_v22, %v1135_v18  ;;  %v1307_v18 = vld [vmem:[#allocation2 + $0x70] sm:$0xff] }
 0x1ff   : > { %v1313_v24 = vpack.c.bf16 %v2040_v21, %v2036_v16  ;;  %v1306_v16 = vld [vmem:[#allocation2 + $0x68] sm:$0xff]  ;;  %v1308_v21 = vld [vmem:[#allocation2 + $0x78] sm:$0xff] }
 0x200   : > { %v1314_v26 = vpack.c.bf16 %v2042_v23, %v2038_v19 }
 0x202   : > { %v1284_v28 = vpop.f32.mrb[12].mxu0  ;;  %1561 = vmatprep.mubr.bf16.mxu1 %v1314_v26 }
 0x203   : > { %v2044_v30 = vadd.f32 %v1284_v28, %v1139_v25  ;;  %v1286_v31 = vpop.f32.mrb[13].mxu0  ;;  %1562 = vmatmul.mubr.bf16.gmra.mrb[24].mxu1 %v1313_v24 }
 0x204   : > { %v2046_v33 = vadd.f32 %v1286_v31, %v1141_v27  ;;  %v1288_v34 = vpop.f32.mrb[14].mxu0 }
 0x205   : > { %v2048_v35 = vadd.f32 %v1288_v34, %v1143_v29  ;;  %v1290_v36 = vpop.f32.mrb[15].mxu0  ;;  %v1634_v29 = vld [vmem:[#allocation8] sm:$0x3] (!%p1996_p0) }
 0x206   : > { %v2050_v37 = vadd.f32 %v1290_v36, %v1145_v32  ;;  %v1643_v31 = vrot.slane (!%p1996_p0), %v1634_v29, %v470_v45 }
 0x207   : > { %v1315_v44 = vpack.c.bf16 %v2048_v35, %v2044_v30  ;;  %v1639_v30 = vrot.slane (!%p1996_p0), %v1634_v29, %v466_v43 }
 0x208   : > { %v1316_v48 = vpack.c.bf16 %v2050_v37, %v2046_v33 }
 0x20a   : > { %1571 = vmatprep.mubr.bf16.mxu1 %v1316_v48 }
 0x20b   : > { %1572 = vmatmul.mubr.bf16.gmra.mrb[28].mxu1 %v1315_v44 }
 0x2c6   : > { %v1543_v50 = vpop.f32.mrb[16].mxu1 }
 0x2c7   : > { %v1582_v51 = vadd.f32 %v1543_v50, %v1293_v49  ;;  %v1545_v52 = vpop.f32.mrb[17].mxu1 }
 0x2c8   : > { %v1583_v46 = vadd.f32 %v1545_v52, %v1294_v38  ;;  %v1547_v53 = vpop.f32.mrb[18].mxu1 }
 0x2c9   : > { %1598 = vst [vmem:[#allocation2] sm:$0xff] %v1582_v51  ;;  %v1584_v41 = vadd.f32 %v1547_v53, %v1295_v39  ;;  %v1549_v47 = vpop.f32.mrb[19].mxu1 }
 0x2ca   : > { %1599 = vst [vmem:[#allocation2 + $0x8] sm:$0xff] %v1583_v46  ;;  %v1585_v54 = vadd.f32 %v1549_v47, %v1296_v40 }
 0x2cb   : > { %1600 = vst [vmem:[#allocation2 + $0x10] sm:$0xff] %v1584_v41 }
 0x2cc   : > { %1601 = vst [vmem:[#allocation2 + $0x18] sm:$0xff] %v1585_v54 }
 0x2ce   : > { %v1553_v57 = vpop.f32.mrb[20].mxu1 }
 0x2cf   : > { %v1586_v59 = vadd.f32 %v1553_v57, %v1297_v55  ;;  %v1555_v60 = vpop.f32.mrb[21].mxu1 }
 0x2d0   : > { %v1587_v62 = vadd.f32 %v1555_v60, %v1298_v56  ;;  %v1557_v63 = vpop.f32.mrb[22].mxu1  ;;  %v1618_v27 = vld [vmem:[#allocation2] sm:$0xff] (!%p1996_p0) }
 0x2d1   : > { %1602 = vst [vmem:[#allocation2 + $0x20] sm:$0xff] %v1586_v59  ;;  %v1588_v0 = vadd.f32 %v1557_v63, %v1299_v58  ;;  %v1559_v1 = vpop.f32.mrb[23].mxu1  ;;  %v1619_v28 = vld [vmem:[#allocation2 + $0x8] sm:$0xff] (!%p1996_p0)  ;;  %v1646_v44 = vadd.f32 (!%p1996_p0), %v1639_v30, %v1618_v27 }
 0x2d2   : > { %1603 = vst [vmem:[#allocation2 + $0x28] sm:$0xff] %v1587_v62  ;;  %v1589_v2 = vadd.f32 %v1559_v1, %v1300_v61  ;;  %v1620_v32 = vld [vmem:[#allocation2 + $0x10] sm:$0xff] (!%p1996_p0)  ;;  %v1647_v48 = vadd.f32 (!%p1996_p0), %v1643_v31, %v1619_v28 }
 0x2d3   : > { %1604 = vst [vmem:[#allocation2 + $0x30] sm:$0xff] %v1588_v0  ;;  %v1621_v33 = vld [vmem:[#allocation2 + $0x18] sm:$0xff] (!%p1996_p0)  ;;  %v1648_v49 = vadd.f32 (!%p1996_p0), %v1639_v30, %v1620_v32  ;;  %v1662_v43 = vmax.f32 (!%p1996_p0), %v1646_v44, 0.0 }
 0x2d4   : > { %1605 = vst [vmem:[#allocation2 + $0x38] sm:$0xff] %v1589_v2  ;;  %v1649_v38 = vadd.f32 (!%p1996_p0), %v1643_v31, %v1621_v33  ;;  %v1663_v53 = vmax.f32 (!%p1996_p0), %v1647_v48, 0.0 }
 0x2d5   : > { %v1664_v42 = vmax.f32 (!%p1996_p0), %v1648_v49, 0.0 }
 0x2d6   : > { %v1563_v5 = vpop.f32.mrb[24].mxu1  ;;  %v1665_v45 = vmax.f32 (!%p1996_p0), %v1649_v38, 0.0  ;;  %v2011_v60 = vpack.c.bf16 (!%p1996_p0), %v1663_v53, %v1662_v43 }
 0x2d7   : > { %v1590_v7 = vadd.f32 %v1563_v5, %v1301_v3  ;;  %v1565_v8 = vpop.f32.mrb[25].mxu1 }
 0x2d8   : > { %v1591_v10 = vadd.f32 %v1565_v8, %v1302_v4  ;;  %v1567_v11 = vpop.f32.mrb[26].mxu1  ;;  %v1622_v34 = vld [vmem:[#allocation2 + $0x20] sm:$0xff] (!%p1996_p0)  ;;  %v2012_v61 = vpack.c.bf16 (!%p1996_p0), %v1665_v45, %v1664_v42  ;;  %1726 = vst [vmem:[%s3037_s5] sm:$0xff] (!%p1996_p0), %v2011_v60 }
 0x2d9   : > { %1606 = vst [vmem:[#allocation2 + $0x40] sm:$0xff] %v1590_v7  ;;  %v1592_v12 = vadd.f32 %v1567_v11, %v1303_v6  ;;  %v1569_v13 = vpop.f32.mrb[27].mxu1  ;;  %v1623_v35 = vld [vmem:[#allocation2 + $0x28] sm:$0xff] (!%p1996_p0)  ;;  %v1650_v50 = vadd.f32 (!%p1996_p0), %v1639_v30, %v1622_v34 }
 0x2da   : > { %1607 = vst [vmem:[#allocation2 + $0x48] sm:$0xff] %v1591_v10  ;;  %v1593_v14 = vadd.f32 %v1569_v13, %v1304_v9  ;;  %v1624_v36 = vld [vmem:[#allocation2 + $0x30] sm:$0xff] (!%p1996_p0)  ;;  %v1651_v39 = vadd.f32 (!%p1996_p0), %v1643_v31, %v1623_v35  ;;  %1727 = vst [vmem:[%s3037_s5 + $0x8] sm:$0xff] (!%p1996_p0), %v2012_v61 }
 0x2db   : > { %1608 = vst [vmem:[#allocation2 + $0x50] sm:$0xff] %v1592_v12  ;;  %v1625_v37 = vld [vmem:[#allocation2 + $0x38] sm:$0xff] (!%p1996_p0)  ;;  %v1652_v51 = vadd.f32 (!%p1996_p0), %v1639_v30, %v1624_v36  ;;  %v1666_v54 = vmax.f32 (!%p1996_p0), %v1650_v50, 0.0 }
 0x2dc   : > { %1609 = vst [vmem:[#allocation2 + $0x58] sm:$0xff] %v1593_v14  ;;  %v1653_v52 = vadd.f32 (!%p1996_p0), %v1643_v31, %v1625_v37  ;;  %v1667_v55 = vmax.f32 (!%p1996_p0), %v1651_v39, 0.0 }
 0x2dd   : > { %v1668_v56 = vmax.f32 (!%p1996_p0), %v1652_v51, 0.0 }
 0x2de   : > { %v1573_v17 = vpop.f32.mrb[28].mxu1  ;;  %1617 = sbr.rel (%p1996_p0) target bundleno = 755 (0x2f3), region = 64  ;;  %v1669_v57 = vmax.f32 (!%p1996_p0), %v1653_v52, 0.0  ;;  %v2013_v2 = vpack.c.bf16 (!%p1996_p0), %v1667_v55, %v1666_v54 }
 0x2df   : > { %v1594_v19 = vadd.f32 %v1573_v17, %v1305_v15  ;;  %v1575_v20 = vpop.f32.mrb[29].mxu1 }
 0x2e0   : > { %v1595_v22 = vadd.f32 %v1575_v20, %v1306_v16  ;;  %v1577_v23 = vpop.f32.mrb[30].mxu1  ;;  %v1626_v40 = vld [vmem:[#allocation2 + $0x40] sm:$0xff] (!%p1996_p0)  ;;  %v2014_v3 = vpack.c.bf16 (!%p1996_p0), %v1669_v57, %v1668_v56  ;;  %1728 = vst [vmem:[%s3037_s5 + $0x10] sm:$0xff] (!%p1996_p0), %v2013_v2 }
 0x2e1   : > { %1610 = vst [vmem:[#allocation2 + $0x60] sm:$0xff] %v1594_v19  ;;  %v1596_v24 = vadd.f32 %v1577_v23, %v1307_v18  ;;  %v1579_v25 = vpop.f32.mrb[31].mxu1  ;;  %v1627_v46 = vld [vmem:[#allocation2 + $0x48] sm:$0xff] (!%p1996_p0)  ;;  %v1654_v62 = vadd.f32 (!%p1996_p0), %v1639_v30, %v1626_v40 }
 0x2e2   : > { %1611 = vst [vmem:[#allocation2 + $0x68] sm:$0xff] %v1595_v22  ;;  %v1597_v26 = vadd.f32 %v1579_v25, %v1308_v21  ;;  %v1628_v41 = vld [vmem:[#allocation2 + $0x50] sm:$0xff] (!%p1996_p0)  ;;  %v1655_v63 = vadd.f32 (!%p1996_p0), %v1643_v31, %v1627_v46  ;;  %1729 = vst [vmem:[%s3037_s5 + $0x18] sm:$0xff] (!%p1996_p0), %v2014_v3 }
 0x2e3   : > { %1612 = vst [vmem:[#allocation2 + $0x70] sm:$0xff] %v1596_v24  ;;  %v1629_v47 = vld [vmem:[#allocation2 + $0x58] sm:$0xff] (!%p1996_p0)  ;;  %v1656_v4 = vadd.f32 (!%p1996_p0), %v1639_v30, %v1628_v41  ;;  %v1670_v6 = vmax.f32 (!%p1996_p0), %v1654_v62, 0.0 }
 0x2e4   : > { %1613 = vst [vmem:[#allocation2 + $0x78] sm:$0xff] %v1597_v26  ;;  %v1657_v5 = vadd.f32 (!%p1996_p0), %v1643_v31, %v1629_v47  ;;  %v1671_v7 = vmax.f32 (!%p1996_p0), %v1655_v63, 0.0 }
 0x2e5   : > { %v1672_v10 = vmax.f32 %v1656_v4, 0.0 }
 0x2e6   : > { %v1673_v11 = vmax.f32 %v1657_v5, 0.0  ;;  %v2015_v14 = vpack.c.bf16 %v1671_v7, %v1670_v6 }
 0x2e8   : > { %v1630_v58 = vld [vmem:[#allocation2 + $0x60] sm:$0xff]  ;;  %v2016_v17 = vpack.c.bf16 %v1673_v11, %v1672_v10  ;;  %1730 = vst [vmem:[%s3037_s5 + $0x20] sm:$0xff] %v2015_v14 }
 0x2e9   : > { %v1631_v59 = vld [vmem:[#allocation2 + $0x68] sm:$0xff]  ;;  %v1658_v8 = vadd.f32 %v1639_v30, %v1630_v58 }
 0x2ea   : > { %v1632_v0 = vld [vmem:[#allocation2 + $0x70] sm:$0xff]  ;;  %v1659_v9 = vadd.f32 %v1643_v31, %v1631_v59  ;;  %1731 = vst [vmem:[%s3037_s5 + $0x28] sm:$0xff] %v2016_v17 }
 0x2eb   : > { %v1633_v1 = vld [vmem:[#allocation2 + $0x78] sm:$0xff]  ;;  %v1660_v12 = vadd.f32 %v1639_v30, %v1632_v0  ;;  %v1674_v15 = vmax.f32 %v1658_v8, 0.0 }
 0x2ec   : > { %v1661_v13 = vadd.f32 %v1643_v31, %v1633_v1  ;;  %v1675_v16 = vmax.f32 %v1659_v9, 0.0 }
 0x2ed   : > { %v1676_v18 = vmax.f32 %v1660_v12, 0.0 }
 0x2ee   : > { %v1677_v19 = vmax.f32 %v1661_v13, 0.0  ;;  %v2017_v20 = vpack.c.bf16 %v1675_v16, %v1674_v15 }
 0x2f0   : > { %v2018_v21 = vpack.c.bf16 %v1677_v19, %v1676_v18  ;;  %1732 = vst [vmem:[%s3037_s5 + $0x30] sm:$0xff] %v2017_v20 }
 0x2f2   : > { %1733 = vst [vmem:[%s3037_s5 + $0x38] sm:$0xff] %v2018_v21 }
 0x2f3 PF: > { %p19_p4 = scmp.ge.s32.totalorder %s2582_s22, 6   ;;  %s3060_s18 = smov %s2513_s19 }
 0x2f4   : > { %s3061_s19 = smov %s2517_s20  ;;  %s3062_s20 = smov %s2592_s25 }
 0x2f5   : > { %s3063_s21 = smov %s2582_s22  ;;  %21 = sbr.rel (!%p19_p4) target bundleno = 8 (0x8), region = 112 }
 0x2fc   :  { %1745 = vsyncpa [#allocation4], 1 }
 0x2fd   :  { %1747 = vsyncpa [#allocation4 + $0x1], 1 }
 0x2fe   :  { %1748 = vsyncpa [#allocation6], 1 }
 0x2ff   :  { %1750 = vsyncpa [#allocation6 + $0x1], 1 }
 0x300   :  { %1751 = vsyncpa [#allocation9], 1 }

// kernel: _trn_forward.3
= control target key start
LH: loop header
LB: loop body
LE: loop exit
PB: predicated region body
PF: predicated region fallthrough
CT: control target
= control target key end

     0   :  { %s4976_s0 = inlined_call_operand.hbm [shape: s32[168], index: 0, kind: input, shape index: {}]   ;;  %s4977_s2 = inlined_call_operand.vmem [shape: bf16[8,8,256], index: 2, kind: input, shape index: {}]   ;;  %s4978_s3 = inlined_call_operand.hbm [shape: bf16[7,2048,256], index: 3, kind: input, shape index: {}]   ;;  %s4979_s4 = inlined_call_operand.hbm [shape: f32[7,1,256], index: 4, kind: input, shape index: {}]   ;;  %s4980_s5 = inlined_call_operand.hbm [shape: bf16[7,256,128], index: 5, kind: input, shape index: {}]   ;;  %s4981_s6 = inlined_call_operand.hbm [shape: f32[7,1,128], index: 6, kind: input, shape index: {}]   ;;  %s4982_s7 = inlined_call_operand.vmem [shape: f32[8,128], index: 7, kind: output, shape index: {}]   ;;  %s4983_s1 = inlined_call_operand.hbm [shape: s32[7], index: 1, kind: input, shape index: {}]  }
   0x1   :  { %4986 = sst [smem:[#allocation17_spill]] %s4978_s3  ;;  %s3979_s26 = scalar_lea.hbm %s4976_s0, 32 }
   0x2   :  { %4987 = sst [smem:[#allocation18_spill]] %s4979_s4  ;;  %p3980_p0 = scmp.ne.s32.totalorder %s4976_s0, %s3979_s26 }
   0x3   :  { %p3983_p1 = scmp.lt.u32.totalorder %s3979_s26, %s4976_s0 }
   0x5   :  { %p3985_p2 = pnand %p3983_p1, %p3980_p0 }
   0x7   :  { %3988 = shalt.err (!%p3985_p2)  }
   0x8   :  { %s4165_s8 = smov [#allocation4]   ;;  %s3989_s13 = scalar_lea.hbm %s4983_s1, 16 }
   0x9   :  { %13 = dma.hbm_to_smem %s4976_s0, 32, %s4165_s8, [#allocation3] }
   0xa   :  { %p3990_p3 = scmp.ne.s32.totalorder %s4983_s1, %s3989_s13  ;;  %p3993_p4 = scmp.lt.u32.totalorder %s3989_s13, %s4983_s1 }
   0xc   :  { %p3995_p5 = pnand %p3993_p4, %p3990_p3 }
   0xe   :  { %3998 = shalt.err (!%p3995_p5)  }
   0xf   :  { %s4166_s18 = smov [#allocation5]  }
  0x10   :  { %15 = dma.hbm_to_smem %s4983_s1, 16, %s4166_s18, [#allocation3] }
  0x11   :  { %4135 = dma.done.wait [#allocation3], 48 }
  0x12   :  { %4136 = vsyncadd [#allocation3], 4294967248 }
  0x13   :  { %17 = sfence }
  0x14   :  { %18 = vsyncpa [#allocation7], 0 }
  0x15   :  { %20 = vsyncpa [#allocation7 + $0x1], 0 }
  0x16   :  { %21 = vsyncpa [#allocation9], 0 }
  0x17   :  { %23 = vsyncpa [#allocation9 + $0x1], 0 }
  0x18   :  { %24 = vsyncpa [#allocation12], 0 }
  0x19   :  { %26 = vsyncpa [#allocation12 + $0x1], 0  ;;  %s4240_s0 = smov 0   ;;  %s4242_s21 = smov 0  }
  0x1a   :  { %s4244_s22 = smov 0   ;;  %s4246_s23 = smov 0  }
  0x1b LB: > { %s4259_s1 = sadd.s32 4294967295, %s4163_s23   ;;  %s4262_s24 = sadd.s32 1, %s4163_s23   ;;  %s4163_s23 = sphi %s4246_s23, %s5001_s23   ;;  %s4159_s22 = sphi %s4244_s22, %s5000_s22   ;;  %s4155_s21 = sphi %s4242_s21, %s4999_s21   ;;  %s4151_s0 = sphi %s4240_s0, %s4998_s0  }
  0x1c   : > { %s57_s25 = ssub.s32 %s4163_s23, %s4262_s24  ;;  %s60_s26 = sadd.s32 1, %s4159_s22 }
  0x1d   : > { %p58_p6 = scmp.eq.s32.totalorder %s57_s25, 0  ;;  %p67_p7 = scmp.ne.s32.totalorder %s4159_s22, %s4155_s21 }
  0x1e   : > { %p68_p8 = scmp.eq.s32.totalorder %s4163_s23, 0  ;;  %p73_p9 = scmp.ne.s32.totalorder %s4155_s21, %s4151_s0 }
  0x1f   : > { %s4272_s27 = scalar_select %p58_p6, %s4159_s22, %s60_s26  }
  0x20   : > { %p69_p10 = por %p68_p8, %p67_p7  ;;  %p74_p11 = scmp.eq.s32.totalorder %s4259_s1, 0 }
  0x21   : > { %p3523_p12 = scmp.lt.s32.totalorder %s4163_s23, 7  ;;  %s4281_s29 = sand.u32 1, %s4159_s22  }
  0x22   : > { %p4276_p13 = por %p74_p11, %p73_p9  ;;  %s220_s8 = sand.u32 1, %s4163_s23  }
  0x23   : > { %p4283_p0 = pnand %p3523_p12, %p69_p10  ;;  %s3004_s9 = sshll.u32 %s4281_s29, 1 }
  0x24   : > { %s4988_s28 = scalar_select %p4276_p13, 1, 0 }
  0x25   : > { %s4989_s30 = scalar_select %p4283_p0, 1, 0 }
  0x26   : > { %s3372_s10 = sshll.u32 %s4163_s23, 5  ;;  %s224_s11 = scalar_lea.vmem [#allocation8], %s3004_s9 }
  0x27   : > { %s232_s12 = sshll.u32 %s224_s11, 4  ;;  %s4990_s4 = sld [smem:[#allocation18_spill]]  ;;  %s4295_s12 = int_to_ptr.vmem [resolvable:$true] %s232_s12 }
  0x28   : > { %s4297_s16 = scalar_lea.sflag [#allocation9], %s220_s8  ;;  %p4303_p2 = pneg %p4283_p0 }
  0x2d   : > { %s4293_s15 = scalar_lea.hbm %s4990_s4, %s3372_s10  ;;  %s4004_s0 = scalar_lea.hbm %s4990_s4, 224 }
  0x2e   : > { %s3999_s17 = scalar_lea.hbm %s4293_s15, 32  ;;  %p4005_p5 = scmp.lt.u32.totalorder %s4293_s15, %s4990_s4 }
  0x2f   : > { %p4000_p1 = scmp.ne.s32.totalorder %s4293_s15, %s3999_s17  ;;  %p4006_p6 = scmp.lt.u32.totalorder %s4004_s0, %s3999_s17 }
  0x30   : > { %p4008_p8 = scmp.lt.u32.totalorder %s3999_s17, %s4293_s15 }
  0x31   : > { %p4002_p3 = pnand %p4303_p2, %p4000_p1  ;;  %p4007_p7 = por %p4006_p6, %p4005_p5 }
  0x33   : > { %p4003_p4 = pneg %p4002_p3  ;;  %p4009_p9 = por %p4008_p8, %p4007_p7 }
  0x35   : > { %p4010_p10 = pnand %p4009_p9, %p4003_p4 }
  0x37   : > { %4013 = shalt.err (!%p4010_p10)
}
  0x38   : > { %s4014_s8 = scalar_lea.vmem %s4295_s12, 32  ;;  %s4167_s9 = smov [#allocation8]  }
  0x39   : > { %p4015_p11 = scmp.ne.s32.totalorder %s4295_s12, %s4014_s8  ;;  %s4019_s10 = sshll.u32 %s4167_s9, 4  ;;  %s4020_s10 = int_to_ptr.vmem [resolvable:$false] %s4019_s10 }
  0x3a   : > { %s4021_s11 = scalar_lea.vmem %s4020_s10, 64  ;;  %p4022_p3 = scmp.lt.s32.totalorder %s4295_s12, %s4020_s10 }
  0x3b   : > { %p4017_p12 = pnand %p4015_p11, %p4303_p2  ;;  %p4023_p13 = scmp.lt.s32.totalorder %s4021_s11, %s4014_s8 }
  0x3d   : > { %p4018_p1 = pneg %p4017_p12  ;;  %p4024_p5 = por %p4023_p13, %p4022_p3 }
  0x3f   : > { %p4025_p6 = pnand %p4024_p5, %p4018_p1 }
  0x41   : > { %4028 = shalt.err (!%p4025_p6)
}
  0x42   : > { %3516 = dma.hbm_to_vmem [thread:$0]  (!%p4283_p0), %s4293_s15, 32, %s4295_s12, %s4297_s16  }
  0x43   : > { %p3011_p4 = scmp.ge.s32.totalorder %s4163_s23, 1  ;;  %p275_p7 = scmp.lt.s32.totalorder %s4163_s23, 8 }
  0x44   : > { %s3001_s13 = sshll.u32 %s4281_s29, 11  ;;  %s3371_s17 = sshll.u32 %s4163_s23, 15 }
  0x45   : > { %p4330_p8 = pnand %p3011_p4, %p275_p7  ;;  %s203_s19 = scalar_lea.vmem [#allocation6], %s3001_s13 }
  0x46   : > { %s210_s20 = sshll.u32 %s203_s19, 4  ;;  %s4993_s3 = sld [smem:[#allocation17_spill]]  ;;  %s4340_s20 = int_to_ptr.vmem [resolvable:$true] %s210_s20 }
  0x47   : > { %s4992_s14 = scalar_select %p4330_p8, 1, 0 }
  0x48   : > { %s200_s12 = scalar_lea.sflag [#allocation7], %s4281_s29 }
  0x4c   : > { %s4338_s26 = scalar_lea.hbm %s4993_s3, %s3371_s17  ;;  %s4034_s10 = scalar_lea.hbm %s4993_s3, 229376 }
  0x4d   : > { %s4029_s15 = scalar_lea.hbm %s4338_s26, 32768  ;;  %p4035_p11 = scmp.lt.u32.totalorder %s4338_s26, %s4993_s3 }
  0x4e   : > { %p4030_p13 = scmp.ne.s32.totalorder %s4338_s26, %s4029_s15  ;;  %p4036_p12 = scmp.lt.u32.totalorder %s4034_s10, %s4029_s15 }
  0x4f   : > { %p4038_p3 = scmp.lt.u32.totalorder %s4029_s15, %s4338_s26 }
  0x50   : > { %p4032_p9 = pnand %p4030_p13, %p4303_p2  ;;  %p4037_p1 = por %p4036_p12, %p4035_p11 }
  0x52   : > { %p4033_p10 = pneg %p4032_p9  ;;  %p4039_p5 = por %p4038_p3, %p4037_p1 }
  0x54   : > { %p4040_p6 = pnand %p4039_p5, %p4033_p10 }
  0x56   : > { %4043 = shalt.err (!%p4040_p6)
}
  0x57   : > { %s4044_s17 = scalar_lea.vmem %s4340_s20, 32768  ;;  %s4168_s19 = smov [#allocation6]  }
  0x58   : > { %p4045_p4 = scmp.ne.s32.totalorder %s4340_s20, %s4044_s17  ;;  %s4049_s0 = sshll.u32 %s4168_s19, 4  ;;  %s4050_s0 = int_to_ptr.vmem [resolvable:$false] %s4049_s0 }
  0x59   : > { %s4051_s25 = scalar_lea.vmem %s4050_s0, 65536  ;;  %p4052_p9 = scmp.lt.s32.totalorder %s4340_s20, %s4050_s0 }
  0x5a   : > { %p4047_p7 = pnand %p4045_p4, %p4303_p2  ;;  %p4053_p8 = scmp.lt.s32.totalorder %s4051_s25, %s4044_s17 }
  0x5c   : > { %p4048_p13 = pneg %p4047_p7  ;;  %p4054_p11 = por %p4053_p8, %p4052_p9 }
  0x5e   : > { %p4055_p12 = pnand %p4054_p11, %p4048_p13 }
  0x60   : > { %4058 = shalt.err (!%p4055_p12)
}
  0x61   : > { %s4169_s15 = smov 128   ;;  %s4170_s8 = smov 8  }
  0x62   : > { %3513 = dma.hbm_to_vmem [thread:$0]  (!%p4283_p0), %s4338_s26, 32768, %s4340_s20, %s200_s12, %s4169_s15, %s4169_s15, %s4170_s8  }
  0x63   : > { %s3007_s9 = sshll.u32 %s4281_s29, 7  ;;  %s3373_s10 = sshll.u32 %s4163_s23, 11 }
  0x64   : > { %s4371_s17 = scalar_lea.hbm %s4980_s5, %s3373_s10  ;;  %s243_s19 = scalar_lea.vmem [#allocation10], %s3007_s9 }
  0x65   : > { %s250_s0 = sshll.u32 %s243_s19, 4  ;;  %s4059_s25 = scalar_lea.hbm %s4371_s17, 2048  ;;  %s4373_s0 = int_to_ptr.vmem [resolvable:$true] %s250_s0 }
  0x66   : > { %p4060_p8 = scmp.ne.s32.totalorder %s4371_s17, %s4059_s25  ;;  %s4064_s12 = scalar_lea.hbm %s4980_s5, 14336 }
  0x67   : > { %p4065_p3 = scmp.lt.u32.totalorder %s4371_s17, %s4980_s5  ;;  %p4066_p5 = scmp.lt.u32.totalorder %s4064_s12, %s4059_s25 }
  0x68   : > { %p4062_p10 = pnand %p4060_p8, %p4303_p2  ;;  %p4068_p4 = scmp.lt.u32.totalorder %s4059_s25, %s4371_s17 }
  0x69   : > { %p4067_p6 = por %p4066_p5, %p4065_p3 }
  0x6a   : > { %p4063_p1 = pneg %p4062_p10 }
  0x6b   : > { %p4069_p7 = por %p4068_p4, %p4067_p6 }
  0x6d   : > { %p4070_p13 = pnand %p4069_p7, %p4063_p1 }
  0x6f   : > { %4073 = shalt.err (!%p4070_p13)
}
  0x70   : > { %s4074_s9 = scalar_lea.vmem %s4373_s0, 2048  ;;  %s4171_s10 = smov [#allocation10]  }
  0x71   : > { %p4075_p9 = scmp.ne.s32.totalorder %s4373_s0, %s4074_s9  ;;  %s4079_s11 = sshll.u32 %s4171_s10, 4  ;;  %s4080_s11 = int_to_ptr.vmem [resolvable:$false] %s4079_s11 }
  0x72   : > { %s4081_s13 = scalar_lea.vmem %s4080_s11, 4096  ;;  %p4082_p8 = scmp.lt.s32.totalorder %s4373_s0, %s4080_s11 }
  0x73   : > { %p4077_p11 = pnand %p4075_p9, %p4303_p2  ;;  %p4083_p10 = scmp.lt.s32.totalorder %s4081_s13, %s4074_s9 }
  0x75   : > { %p4078_p12 = pneg %p4077_p11  ;;  %p4084_p3 = por %p4083_p10, %p4082_p8 }
  0x77   : > { %p4085_p5 = pnand %p4084_p3, %p4078_p12 }
  0x79   : > { %4088 = shalt.err (!%p4085_p5)
}
  0x7a   : > { %s4172_s19 = smov 64   ;;  %s4173_s25 = smov 4  }
  0x7b   : > { %3519 = dma.hbm_to_vmem [thread:$0]  (!%p4283_p0), %s4371_s17, 2048, %s4373_s0, %s4297_s16, %s4172_s19, %s4172_s19, %s4173_s25  }
  0x7c   : > { %s3010_s20 = sshll.u32 %s4163_s23, 4  ;;  %s263_s26 = scalar_lea.vmem [#allocation11], %s4281_s29 }
  0x7d   : > { %s270_s12 = sshll.u32 %s263_s26, 4  ;;  %s4402_s9 = scalar_lea.hbm %s4981_s6, %s3010_s20  ;;  %s271_s12 = int_to_ptr.vmem [resolvable:$true] %s270_s12 }
  0x7e   : > { %s261_s10 = scalar_lea.sflag [#allocation12], %s4281_s29  ;;  %s4089_s11 = scalar_lea.hbm %s4402_s9, 16 }
  0x7f   : > { %p4090_p1 = scmp.ne.s32.totalorder %s4402_s9, %s4089_s11  ;;  %s4094_s17 = scalar_lea.hbm %s4981_s6, 112 }
  0x80   : > { %p4095_p7 = scmp.lt.u32.totalorder %s4402_s9, %s4981_s6  ;;  %p4096_p13 = scmp.lt.u32.totalorder %s4094_s17, %s4089_s11 }
  0x81   : > { %p4092_p6 = pnand %p4090_p1, %p4303_p2  ;;  %p4098_p11 = scmp.lt.u32.totalorder %s4089_s11, %s4402_s9 }
  0x82   : > { %p4097_p9 = por %p4096_p13, %p4095_p7 }
  0x83   : > { %p4093_p4 = pneg %p4092_p6 }
  0x84   : > { %p4099_p12 = por %p4098_p11, %p4097_p9 }
  0x86   : > { %p4100_p8 = pnand %p4099_p12, %p4093_p4 }
  0x88   : > { %4103 = shalt.err (!%p4100_p8)
}
  0x89   : > { %s4104_s29 = scalar_lea.vmem %s271_s12, 16  ;;  %s4174_s19 = smov [#allocation11]  }
  0x8a   : > { %p4105_p10 = scmp.ne.s32.totalorder %s271_s12, %s4104_s29  ;;  %s4109_s25 = sshll.u32 %s4174_s19, 4  ;;  %s4110_s25 = int_to_ptr.vmem [resolvable:$false] %s4109_s25 }
  0x8b   : > { %s4111_s20 = scalar_lea.vmem %s4110_s25, 32  ;;  %p4112_p1 = scmp.lt.s32.totalorder %s271_s12, %s4110_s25 }
  0x8c   : > { %p4107_p3 = pnand %p4105_p10, %p4303_p2  ;;  %p4113_p6 = scmp.lt.s32.totalorder %s4111_s20, %s4104_s29 }
  0x8e   : > { %p4108_p5 = pneg %p4107_p3  ;;  %p4114_p0 = por %p4113_p6, %p4112_p1 }
  0x90   : > { %p4115_p7 = pnand %p4114_p0, %p4108_p5 }
  0x92   : > { %4118 = shalt.err (!%p4115_p7)
}
  0x93   : > { %p4994_p13 = scmp.ne.s32.totalorder %s4989_s30, 0  ;;  %p4995_p4 = scmp.ne.s32.totalorder %s4992_s14, 0 }
  0x94   : > { %s4425_s18 = sand.u32 (!%p4995_p4), 1, %s4155_s21   ;;  %p4996_p2 = scmp.ne.s32.totalorder (!%p4995_p4), %s4988_s28, 0 }
  0x95   : > { %3522 = dma.hbm_to_vmem [thread:$0]  (!%p4994_p13), %s4402_s9, 16, %s271_s12, %s261_s10  }
  0x96   : > { %279 = sbr.rel (%p4995_p4) target bundleno = 882 (0x372), region = 40  ;;  %s3012_s26 = sshll.u32 (!%p4995_p4), %s4425_s18, 11 }
  0x97   : > { %s282_s15 = scalar_lea.sflag (!%p4995_p4), [#allocation7], %s4425_s18  ;;  %s4429_s8 = scalar_lea.vmem (!%p4995_p4), [#allocation6], %s3012_s26 }
  0x9d   : > { %4138 = dma.done.wait (%p4996_p2), %s282_s15, 32768  }
  0x9e   : > { %4140 = vsyncadd (%p4996_p2), %s282_s15, 4294934528  ;;  %s290_s30 = sand.u32 1, %s4259_s1   ;;  %s3013_s14 = sshll.u32 %s4425_s18, 1 }
  0x9f   : > { %s291_s12 = scalar_lea.sflag [#allocation9], %s290_s30  ;;  %s4437_s9 = scalar_lea.vmem [#allocation8], %s3013_s14 }
  0xa0   : > { %4142 = dma.done.wait (%p4996_p2), %s291_s12, 2080  }
  0xa1   : > { %4144 = vsyncadd (%p4996_p2), %s291_s12, 4294965216  ;;  %s3014_s10 = sshll.u32 %s4425_s18, 7  ;;  %s309_s16 = scalar_lea.sflag [#allocation12], %s4425_s18 }
  0xa2   : > { %s4444_s11 = scalar_lea.vmem [#allocation10], %s3014_s10 }
  0xa3   : > { %4146 = dma.done.wait (%p4996_p2), %s309_s16, 16  }
  0xa4   : > { %4148 = vsyncadd (%p4996_p2), %s309_s16, 4294967280  ;;  %p3015_p0 = scmp.ne.s32.totalorder %s4259_s1, 0 }
  0xa5   : > { %v4175_v0 = vmov (!%p3015_p0), 0.0  }
  0xa6   : > { %351 = sbr.rel (%p3015_p0) target bundleno = 173 (0xad), region = 60  ;;  %352 = vst [vmem:[%s4982_s7] sm:$0xff] (!%p3015_p0), %v4175_v0 }
  0xad PF: > { %v3563_v1 = vld [vmem:[%s4429_s8 + $0x4] ss:$8 sps:$4 sm:$0xff]   ;;  %v3567_v3 = vld [vmem:[%s4429_s8] ss:$8 sps:$4 sm:$0xff]   ;;  %v3569_v5 = vld [vmem:[%s4429_s8 + $0x14] ss:$8 sps:$4 sm:$0xff]  }
  0xae   : > { %v3565_v2 = vld [vmem:[%s4429_s8 + $0x404] ss:$8 sps:$4 sm:$0xff]   ;;  %2229 = vmatprep.subr.bf16.mxu1 %v3563_v1  ;;  %v3568_v4 = vld [vmem:[%s4429_s8 + $0x400] ss:$8 sps:$4 sm:$0xff]   ;;  %v3571_v6 = vld [vmem:[%s4429_s8 + $0x414] ss:$8 sps:$4 sm:$0xff]  }
  0xaf   : > { %2433 = vmatprep.subr.bf16.mxu0 %v3565_v2  ;;  %2230 = vmatpush1.bf16.msra.mxu1 %v3567_v3  ;;  %v3573_v7 = vld [vmem:[%s4429_s8 + $0x10] ss:$8 sps:$4 sm:$0xff]   ;;  %v3575_v9 = vld [vmem:[%s4429_s8 + $0x24] ss:$8 sps:$4 sm:$0xff]   ;;  %v3579_v11 = vld [vmem:[%s4429_s8 + $0x20] ss:$8 sps:$4 sm:$0xff]  }
  0xb0   : > { %2434 = vmatpush1.bf16.msra.mxu0 %v3568_v4  ;;  %2231 = vmatprep.subr.bf16.mxu1 %v3569_v5  ;;  %v3574_v8 = vld [vmem:[%s4429_s8 + $0x410] ss:$8 sps:$4 sm:$0xff]   ;;  %v3577_v10 = vld [vmem:[%s4429_s8 + $0x424] ss:$8 sps:$4 sm:$0xff]   ;;  %v3580_v12 = vld [vmem:[%s4429_s8 + $0x420] ss:$8 sps:$4 sm:$0xff]  }
  0xb1   : > { %2435 = vmatprep.subr.bf16.mxu0 %v3571_v6  ;;  %v3581_v13 = vld [vmem:[%s4429_s8 + $0x34] ss:$8 sps:$4 sm:$0xff]   ;;  %v3585_v15 = vld [vmem:[%s4429_s8 + $0x30] ss:$8 sps:$4 sm:$0xff]   ;;  %v3587_v17 = vld [vmem:[%s4429_s8 + $0x44] ss:$8 sps:$4 sm:$0xff]  }
  0xb2   : > { %v3583_v14 = vld [vmem:[%s4429_s8 + $0x434] ss:$8 sps:$4 sm:$0xff]   ;;  %v3586_v16 = vld [vmem:[%s4429_s8 + $0x430] ss:$8 sps:$4 sm:$0xff]   ;;  %v3589_v18 = vld [vmem:[%s4429_s8 + $0x444] ss:$8 sps:$4 sm:$0xff]  }
  0xb3   : > { %2232 = vmatpush1.bf16.msra.mxu1 %v3573_v7  ;;  %v3591_v19 = vld [vmem:[%s4429_s8 + $0x40] ss:$8 sps:$4 sm:$0xff]   ;;  %v3593_v21 = vld [vmem:[%s4429_s8 + $0x54] ss:$8 sps:$4 sm:$0xff]   ;;  %v3597_v23 = vld [vmem:[%s4429_s8 + $0x50] ss:$8 sps:$4 sm:$0xff]  }
  0xb4   : > { %2436 = vmatpush1.bf16.msra.mxu0 %v3574_v8  ;;  %2233 = vmatprep.subr.bf16.mxu1 %v3575_v9  ;;  %v3592_v20 = vld [vmem:[%s4429_s8 + $0x440] ss:$8 sps:$4 sm:$0xff]   ;;  %v3595_v22 = vld [vmem:[%s4429_s8 + $0x454] ss:$8 sps:$4 sm:$0xff]   ;;  %v3598_v24 = vld [vmem:[%s4429_s8 + $0x450] ss:$8 sps:$4 sm:$0xff]  }
  0xb5   : > { %2437 = vmatprep.subr.bf16.mxu0 %v3577_v10  ;;  %v3599_v25 = vld [vmem:[%s4429_s8 + $0x64] ss:$8 sps:$4 sm:$0xff]   ;;  %s4483_s28 = smul.u32 24, %s4259_s1  ;;  %v3603_v27 = vld [vmem:[%s4429_s8 + $0x60] ss:$8 sps:$4 sm:$0xff]  }
  0xb6   : > { %v3601_v26 = vld [vmem:[%s4429_s8 + $0x464] ss:$8 sps:$4 sm:$0xff]   ;;  %v3604_v28 = vld [vmem:[%s4429_s8 + $0x460] ss:$8 sps:$4 sm:$0xff]   ;;  %v3605_v29 = vld [vmem:[%s4429_s8 + $0x74] ss:$8 sps:$4 sm:$0xff]  }
  0xb7   : > { %2234 = vmatpush1.bf16.msra.mxu1 %v3579_v11  ;;  %v3607_v30 = vld [vmem:[%s4429_s8 + $0x474] ss:$8 sps:$4 sm:$0xff]   ;;  %s409_s13 = sadd.s32 8, %s4483_s28  ;;  %v3609_v31 = vld [vmem:[%s4429_s8 + $0x70] ss:$8 sps:$4 sm:$0xff]   ;;  %s4492_s29 = sld [smem:[#allocation4 + %s4483_s28]] }
  0xb8   : > { %2438 = vmatpush1.bf16.msra.mxu0 %v3580_v12  ;;  %2235 = vmatprep.subr.bf16.mxu1 %v3581_v13  ;;  %s381_s19 = sadd.s32 4, %s4483_s28  ;;  %v3610_v32 = vld [vmem:[%s4429_s8 + $0x470] ss:$8 sps:$4 sm:$0xff]   ;;  %v3611_v33 = vld [vmem:[%s4429_s8 + $0x84] ss:$8 sps:$4 sm:$0xff]   ;;  %s437_s25 = sadd.s32 12, %s4483_s28 }
  0xb9   : > { %2439 = vmatprep.subr.bf16.mxu0 %v3583_v14  ;;  %v3613_v34 = vld [vmem:[%s4429_s8 + $0x484] ss:$8 sps:$4 sm:$0xff]   ;;  %s4499_s20 = sld [smem:[#allocation4 + %s409_s13]]  ;;  %v3615_v35 = vld [vmem:[%s4429_s8 + $0x80] ss:$8 sps:$4 sm:$0xff]   ;;  %s493_s16 = sadd.s32 20, %s4483_s28 }
  0xba   : > { %s4501_s26 = sld [smem:[#allocation4 + %s381_s19]]  ;;  %v3616_v36 = vld [vmem:[%s4429_s8 + $0x480] ss:$8 sps:$4 sm:$0xff]   ;;  %v3617_v37 = vld [vmem:[%s4429_s8 + $0x94] ss:$8 sps:$4 sm:$0xff]   ;;  %s416_s13 = sadd.s32 9, %s4483_s28 }
  0xbb   : > { %2236 = vmatpush1.bf16.msra.mxu1 %v3585_v15  ;;  %s4505_s15 = sld [smem:[#allocation4 + %s437_s25]]  ;;  %v3619_v38 = vld [vmem:[%s4429_s8 + $0x494] ss:$8 sps:$4 sm:$0xff]   ;;  %v3621_v39 = vld [vmem:[%s4429_s8 + $0x90] ss:$8 sps:$4 sm:$0xff]   ;;  %s507_s23 = sadd.s32 22, %s4483_s28 }
  0xbc   : > { %2440 = vmatpush1.bf16.msra.mxu0 %v3586_v16  ;;  %2237 = vmatprep.subr.bf16.mxu1 %v3587_v17  ;;  %v3622_v40 = vld [vmem:[%s4429_s8 + $0x490] ss:$8 sps:$4 sm:$0xff]   ;;  %v3623_v41 = vld [vmem:[%s4429_s8 + $0xa4] ss:$8 sps:$4 sm:$0xff]   ;;  %v3627_v43 = vld [vmem:[%s4429_s8 + $0xa0] ss:$8 sps:$4 sm:$0xff]  }
  0xbd   : > { %2441 = vmatprep.subr.bf16.mxu0 %v3589_v18  ;;  %s3374_s30 = sshll.u32 %s4492_s29, 3  ;;  %v3625_v42 = vld [vmem:[%s4429_s8 + $0x4a4] ss:$8 sps:$4 sm:$0xff]   ;;  %v3628_v44 = vld [vmem:[%s4429_s8 + $0x4a0] ss:$8 sps:$4 sm:$0xff]   ;;  %s388_s29 = sadd.s32 5, %s4483_s28 }
  0xbe   : > { %s357_s17 = scalar_lea.vmem %s4977_s2, %s3374_s30  ;;  %v3629_v45 = vld [vmem:[%s4429_s8 + $0xb4] ss:$8 sps:$4 sm:$0xff]   ;;  %v3633_v47 = vld [vmem:[%s4429_s8 + $0xb0] ss:$8 sps:$4 sm:$0xff]   ;;  %v3635_v51 = vld [vmem:[%s4429_s8 + $0xc4] ss:$8 sps:$4 sm:$0xff]  }
  0xbf   : > { %2238 = vmatpush1.bf16.msra.mxu1 %v3591_v19  ;;  %s3382_s14 = sshll.u32 %s4499_s20, 3  ;;  %v3631_v46 = vld [vmem:[%s4429_s8 + $0x4b4] ss:$8 sps:$4 sm:$0xff]   ;;  %v3634_v48 = vld [vmem:[%s4429_s8 + $0x4b0] ss:$8 sps:$4 sm:$0xff]   ;;  %v358_v49 = vld [vmem:[%s357_s17] sm:$0xff] }
  0xc0   : > { %2442 = vmatpush1.bf16.msra.mxu0 %v3592_v20  ;;  %2239 = vmatprep.subr.bf16.mxu1 %v3593_v21  ;;  %s3378_s12 = sshll.u32 %s4501_s26, 3  ;;  %s413_s19 = scalar_lea.vmem %s4977_s2, %s3382_s14  ;;  %v3637_v52 = vld [vmem:[%s4429_s8 + $0x4c4] ss:$8 sps:$4 sm:$0xff]   ;;  %v3639_v57 = vld [vmem:[%s4429_s8 + $0xc0] ss:$8 sps:$4 sm:$0xff]  }
  0xc1   : > { %2443 = vmatprep.subr.bf16.mxu0 %v3595_v22  ;;  %s3386_s0 = sshll.u32 %s4505_s15, 3  ;;  %s385_s26 = scalar_lea.vmem %s4977_s2, %s3378_s12  ;;  %v414_v50 = vld [vmem:[%s413_s19] sm:$0xff]  ;;  %v3641_v59 = vld [vmem:[%s4429_s8 + $0xd4] ss:$8 sps:$4 sm:$0xff]   ;;  %v3645_v61 = vld [vmem:[%s4429_s8 + $0xd0] ss:$8 sps:$4 sm:$0xff]  }
  0xc2   : > { %s441_s10 = scalar_lea.vmem %s4977_s2, %s3386_s0  ;;  %v3065_v53 = vcombine.high %v358_v49, %v414_v50  ;;  %v386_v54 = vld [vmem:[%s385_s26] sm:$0xff]  ;;  %v3643_v60 = vld [vmem:[%s4429_s8 + $0x4d4] ss:$8 sps:$4 sm:$0xff]   ;;  %v3646_v62 = vld [vmem:[%s4429_s8 + $0x4d0] ss:$8 sps:$4 sm:$0xff]   ;;  %v3064_v9 = vcombine.low %v358_v49, %v414_v50  ;;  %s465_s14 = sadd.s32 16, %s4483_s28 }
  0xc3   : > { %2240 = vmatpush1.bf16.msra.mxu1 %v3597_v23  ;;  %v442_v55 = vld [vmem:[%s441_s10] sm:$0xff]  ;;  %v3653_v3 = vld [vmem:[%s4429_s8 + $0xf4] ss:$8 sps:$4 sm:$0xff]   ;;  %v3657_v5 = vld [vmem:[%s4429_s8 + $0xf0] ss:$8 sps:$4 sm:$0xff]   ;;  %s4558_s12 = sld [smem:[#allocation4 + %s465_s14]] }
  0xc4   : > { %2444 = vmatpush1.bf16.msra.mxu0 %v3598_v24  ;;  %2241 = vmatprep.subr.bf16.mxu1 %v3599_v25  ;;  %v3073_v56 = vcombine.high %v386_v54, %v442_v55  ;;  %v3640_v58 = vld [vmem:[%s4429_s8 + $0x4c0] ss:$8 sps:$4 sm:$0xff]   ;;  %v3647_v63 = vld [vmem:[%s4429_s8 + $0xe4] ss:$8 sps:$4 sm:$0xff]   ;;  %v3655_v4 = vld [vmem:[%s4429_s8 + $0x4f4] ss:$8 sps:$4 sm:$0xff]   ;;  %v3072_v11 = vcombine.low %v386_v54, %v442_v55 }
  0xc5   : > { %2445 = vmatprep.subr.bf16.mxu0 %v3601_v26  ;;  %2261 = vmatprep.mubr.bf16.mxu1 %v3065_v53  ;;  %v3649_v0 = vld [vmem:[%s4429_s8 + $0x4e4] ss:$8 sps:$4 sm:$0xff]   ;;  %v3651_v1 = vld [vmem:[%s4429_s8 + $0xe0] ss:$8 sps:$4 sm:$0xff]   ;;  %v3658_v6 = vld [vmem:[%s4429_s8 + $0x4f0] ss:$8 sps:$4 sm:$0xff]  }
  0xc6   : > { %2465 = vmatprep.mubr.bf16.mxu0 %v3073_v56  ;;  %v3652_v2 = vld [vmem:[%s4429_s8 + $0x4e0] ss:$8 sps:$4 sm:$0xff]   ;;  %v3661_v7 = vld [vmem:[%s4429_s8 + $0x104] ss:$8 sps:$4 sm:$0xff]   ;;  %v3667_v13 = vld [vmem:[%s4429_s8 + $0x114] ss:$8 sps:$4 sm:$0xff]  }
  0xc7   : > { %2242 = vmatpush1.bf16.msra.mxu1 %v3603_v27  ;;  %v3664_v8 = vld [vmem:[%s4429_s8 + $0x504] ss:$8 sps:$4 sm:$0xff]   ;;  %v3659_v10 = vld [vmem:[%s4429_s8 + $0x100] ss:$8 sps:$4 sm:$0xff]   ;;  %v3670_v14 = vld [vmem:[%s4429_s8 + $0x514] ss:$8 sps:$4 sm:$0xff]  }
  0xc8   : > { %2446 = vmatpush1.bf16.msra.mxu0 %v3604_v28  ;;  %2243 = vmatprep.subr.bf16.mxu1 %v3605_v29  ;;  %v3662_v12 = vld [vmem:[%s4429_s8 + $0x500] ss:$8 sps:$4 sm:$0xff]   ;;  %v3665_v15 = vld [vmem:[%s4429_s8 + $0x110] ss:$8 sps:$4 sm:$0xff]   ;;  %v3673_v17 = vld [vmem:[%s4429_s8 + $0x124] ss:$8 sps:$4 sm:$0xff]  }
  0xc9   : > { %2447 = vmatprep.subr.bf16.mxu0 %v3607_v30  ;;  %v3668_v16 = vld [vmem:[%s4429_s8 + $0x510] ss:$8 sps:$4 sm:$0xff]   ;;  %v3676_v18 = vld [vmem:[%s4429_s8 + $0x524] ss:$8 sps:$4 sm:$0xff]   ;;  %s4565_s17 = sld [smem:[#allocation4 + %s493_s16]]  ;;  %s360_s0 = sadd.s32 1, %s4483_s28 }
  0xca   : > { %v3671_v19 = vld [vmem:[%s4429_s8 + $0x120] ss:$8 sps:$4 sm:$0xff]   ;;  %v3679_v21 = vld [vmem:[%s4429_s8 + $0x134] ss:$8 sps:$4 sm:$0xff]   ;;  %s444_s19 = sadd.s32 13, %s4483_s28  ;;  %s4575_s25 = sld [smem:[#allocation4 + %s360_s0]] }
  0xcb   : > { %2244 = vmatpush1.bf16.msra.mxu1 %v3609_v31  ;;  %v3674_v20 = vld [vmem:[%s4429_s8 + $0x520] ss:$8 sps:$4 sm:$0xff]   ;;  %v3682_v22 = vld [vmem:[%s4429_s8 + $0x534] ss:$8 sps:$4 sm:$0xff]   ;;  %s4577_s20 = sld [smem:[#allocation4 + %s416_s13]]  ;;  %s3390_s26 = sshll.u32 %s4558_s12, 3 }
  0xcc   : > { %2448 = vmatpush1.bf16.msra.mxu0 %v3610_v32  ;;  %2245 = vmatprep.subr.bf16.mxu1 %v3611_v33  ;;  %s4580_s15 = sld [smem:[#allocation4 + %s388_s29]]  ;;  %v3677_v23 = vld [vmem:[%s4429_s8 + $0x130] ss:$8 sps:$4 sm:$0xff]   ;;  %v3685_v25 = vld [vmem:[%s4429_s8 + $0x144] ss:$8 sps:$4 sm:$0xff]   ;;  %s469_s12 = scalar_lea.vmem %s4977_s2, %s3390_s26 }
  0xcd   : > { %2449 = vmatprep.subr.bf16.mxu0 %v3613_v34  ;;  %v3680_v24 = vld [vmem:[%s4429_s8 + $0x530] ss:$8 sps:$4 sm:$0xff]   ;;  %s4584_s30 = sld [smem:[#allocation4 + %s444_s19]]  ;;  %v3688_v26 = vld [vmem:[%s4429_s8 + $0x544] ss:$8 sps:$4 sm:$0xff]   ;;  %s486_s4 = sadd.s32 19, %s4483_s28 }
  0xce   : > { %v3683_v27 = vld [vmem:[%s4429_s8 + $0x140] ss:$8 sps:$4 sm:$0xff]   ;;  %v3691_v29 = vld [vmem:[%s4429_s8 + $0x154] ss:$8 sps:$4 sm:$0xff]   ;;  %v3709_v53 = vld [vmem:[%s4429_s8 + $0x184] ss:$8 sps:$4 sm:$0xff]  }
  0xcf   : > { %2246 = vmatpush1.bf16.msra.mxu1 %v3615_v35  ;;  %s3394_s10 = sshll.u32 %s4565_s17, 3  ;;  %v3686_v28 = vld [vmem:[%s4429_s8 + $0x540] ss:$8 sps:$4 sm:$0xff]   ;;  %v3694_v30 = vld [vmem:[%s4429_s8 + $0x554] ss:$8 sps:$4 sm:$0xff]  }
  0xd0   : > { %2450 = vmatpush1.bf16.msra.mxu0 %v3616_v36  ;;  %2247 = vmatprep.subr.bf16.mxu1 %v3617_v37  ;;  %s497_s29 = scalar_lea.vmem %s4977_s2, %s3394_s10  ;;  %v470_v31 = vld [vmem:[%s469_s12] sm:$0xff]  ;;  %s3375_s17 = sshll.u32 %s4575_s25, 3  ;;  %v3689_v35 = vld [vmem:[%s4429_s8 + $0x150] ss:$8 sps:$4 sm:$0xff]  }
  0xd1   : > { %2451 = vmatprep.subr.bf16.mxu0 %v3619_v38  ;;  %s3383_s19 = sshll.u32 %s4577_s20, 3  ;;  %v3081_v32 = vcombine.high %v470_v31, %v470_v31  ;;  %v498_v33 = vld [vmem:[%s497_s29] sm:$0xff]  ;;  %v3080_v34 = vcombine.low %v470_v31, %v470_v31  ;;  %v3692_v36 = vld [vmem:[%s4429_s8 + $0x550] ss:$8 sps:$4 sm:$0xff]   ;;  %s364_s25 = scalar_lea.vmem %s4977_s2, %s3375_s17 }
  0xd2   : > { %s3379_s26 = sshll.u32 %s4580_s15, 3  ;;  %v3089_v37 = vcombine.high %v498_v33, %v498_v33  ;;  %v3088_v38 = vcombine.low %v498_v33, %v498_v33  ;;  %s420_s0 = scalar_lea.vmem %s4977_s2, %s3383_s19  ;;  %v3712_v54 = vld [vmem:[%s4429_s8 + $0x584] ss:$8 sps:$4 sm:$0xff]   ;;  %v3707_v55 = vld [vmem:[%s4429_s8 + $0x180] ss:$8 sps:$4 sm:$0xff]  }
  0xd3   : > { %2248 = vmatpush1.bf16.msra.mxu1 %v3621_v39  ;;  %s3387_s14 = sshll.u32 %s4584_s30, 3  ;;  %v3697_v39 = vld [vmem:[%s4429_s8 + $0x164] ss:$8 sps:$4 sm:$0xff]   ;;  %s392_s13 = scalar_lea.vmem %s4977_s2, %s3379_s26  ;;  %v3710_v56 = vld [vmem:[%s4429_s8 + $0x580] ss:$8 sps:$4 sm:$0xff]  }
  0xd4   : > { %2452 = vmatpush1.bf16.msra.mxu0 %v3622_v40  ;;  %2249 = vmatprep.subr.bf16.mxu1 %v3623_v41  ;;  %v3700_v40 = vld [vmem:[%s4429_s8 + $0x564] ss:$8 sps:$4 sm:$0xff]   ;;  %v3695_v41 = vld [vmem:[%s4429_s8 + $0x160] ss:$8 sps:$4 sm:$0xff]   ;;  %s448_s17 = scalar_lea.vmem %s4977_s2, %s3387_s14  ;;  %s472_s19 = sadd.s32 17, %s4483_s28 }
  0xd5   : > { %2453 = vmatprep.subr.bf16.mxu0 %v3625_v42  ;;  %v3698_v42 = vld [vmem:[%s4429_s8 + $0x560] ss:$8 sps:$4 sm:$0xff]   ;;  %s4652_s26 = sld [smem:[#allocation4 + %s472_s19]]  ;;  %s500_s14 = sadd.s32 21, %s4483_s28  ;;  %v3765_v33 = vld [vmem:[%s4429_s8 + $0x210] ss:$8 sps:$4 sm:$0xff]  }
  0xd6   : > { %v4631_v49 = vld [vmem:[%s448_s17] sm:$0xff]  ;;  %s4659_s16 = sld [smem:[#allocation4 + %s500_s14]]  ;;  %s367_s20 = sadd.s32 2, %s4483_s28 }
  0xd7   : > { %2250 = vmatpush1.bf16.msra.mxu1 %v3627_v43  ;;  %v4621_v43 = vld [vmem:[%s364_s25] sm:$0xff]  ;;  %s423_s12 = sadd.s32 10, %s4483_s28  ;;  %s451_s30 = sadd.s32 14, %s4483_s28 }
  0xd8   : > { %2454 = vmatpush1.bf16.msra.mxu0 %v3628_v44  ;;  %2251 = vmatprep.subr.bf16.mxu1 %v3629_v45  ;;  %v4623_v44 = vld [vmem:[%s420_s0] sm:$0xff]  ;;  %v3703_v45 = vld [vmem:[%s4429_s8 + $0x174] ss:$8 sps:$4 sm:$0xff]   ;;  %s395_s0 = sadd.s32 6, %s4483_s28  ;;  %s4677_s29 = sld [smem:[#allocation4 + %s423_s12]] }
  0xd9   : > { %2455 = vmatprep.subr.bf16.mxu0 %v3631_v46  ;;  %v3067_v46 = vcombine.high %v4621_v43, %v4623_v44  ;;  %s4681_s10 = sld [smem:[#allocation4 + %s395_s0]] }
  0xda   : > { %s4685_s17 = sld [smem:[#allocation4 + %s451_s30]] }
  0xdb   : > { %2252 = vmatpush1.bf16.msra.mxu1 %v3633_v47  ;;  %v3706_v47 = vld [vmem:[%s4429_s8 + $0x574] ss:$8 sps:$4 sm:$0xff]   ;;  %s3391_s25 = sshll.u32 %s4652_s26, 3 }
  0xdc   : > { %2456 = vmatpush1.bf16.msra.mxu0 %v3634_v48  ;;  %2253 = vmatprep.subr.bf16.mxu1 %v3635_v51  ;;  %v4629_v48 = vld [vmem:[%s392_s13] sm:$0xff]  ;;  %v3701_v51 = vld [vmem:[%s4429_s8 + $0x170] ss:$8 sps:$4 sm:$0xff]   ;;  %s3395_s15 = sshll.u32 %s4659_s16, 3  ;;  %s4675_s13 = sld [smem:[#allocation4 + %s367_s20]] }
  0xdd   : > { %2457 = vmatprep.subr.bf16.mxu0 %v3637_v52  ;;  %v3075_v50 = vcombine.high %v4629_v48, %v4631_v49  ;;  %v3704_v52 = vld [vmem:[%s4429_s8 + $0x570] ss:$8 sps:$4 sm:$0xff]   ;;  %s476_s16 = scalar_lea.vmem %s4977_s2, %s3391_s25  ;;  %s504_s0 = scalar_lea.vmem %s4977_s2, %s3395_s15 }
  0xde   : > { %s3384_s25 = sshll.u32 %s4677_s29, 3 }
  0xdf   : > { %2254 = vmatpush1.bf16.msra.mxu1 %v3639_v57  ;;  %v3715_v57 = vld [vmem:[%s4429_s8 + $0x194] ss:$8 sps:$4 sm:$0xff]   ;;  %s3380_s15 = sshll.u32 %s4681_s10, 3  ;;  %s427_s29 = scalar_lea.vmem %s4977_s2, %s3384_s25 }
  0xe0   : > { %2458 = vmatpush1.bf16.msra.mxu0 %v3640_v58  ;;  %2255 = vmatprep.subr.bf16.mxu1 %v3641_v59  ;;  %v3718_v58 = vld [vmem:[%s4429_s8 + $0x594] ss:$8 sps:$4 sm:$0xff]   ;;  %v3713_v59 = vld [vmem:[%s4429_s8 + $0x190] ss:$8 sps:$4 sm:$0xff]   ;;  %s3388_s30 = sshll.u32 %s4685_s17, 3  ;;  %s399_s12 = scalar_lea.vmem %s4977_s2, %s3380_s15 }
  0xe1   : > { %2459 = vmatprep.subr.bf16.mxu0 %v3643_v60  ;;  %v3716_v60 = vld [vmem:[%s4429_s8 + $0x590] ss:$8 sps:$4 sm:$0xff]   ;;  %s455_s3 = scalar_lea.vmem %s4977_s2, %s3388_s30  ;;  %s4779_s25 = sld [smem:[#allocation4 + %s507_s23]] }
  0xe2   : > { %s3376_s26 = sshll.u32 %s4675_s13, 3  ;;  %s374_s15 = sadd.s32 3, %s4483_s28 }
  0xe3   : > { %2256 = vmatpush1.bf16.msra.mxu1 %v3645_v61  ;;  %v3721_v61 = vld [vmem:[%s4429_s8 + $0x1a4] ss:$8 sps:$4 sm:$0xff]   ;;  %s430_s30 = sadd.s32 11, %s4483_s28  ;;  %s4787_s19 = sld [smem:[#allocation4 + %s374_s15]] }
  0xe4   : > { %2460 = vmatpush1.bf16.msra.mxu0 %v3646_v62  ;;  %2257 = vmatprep.subr.bf16.mxu1 %v3647_v63  ;;  %v3724_v62 = vld [vmem:[%s4429_s8 + $0x5a4] ss:$8 sps:$4 sm:$0xff]   ;;  %v3719_v63 = vld [vmem:[%s4429_s8 + $0x1a0] ss:$8 sps:$4 sm:$0xff]   ;;  %s4789_s14 = sld [smem:[#allocation4 + %s430_s30]]  ;;  %s458_s13 = sadd.s32 15, %s4483_s28 }
  0xe5   : > { %2461 = vmatprep.subr.bf16.mxu0 %v3649_v0  ;;  %v3722_v0 = vld [vmem:[%s4429_s8 + $0x5a0] ss:$8 sps:$4 sm:$0xff]   ;;  %s4802_s17 = sld [smem:[#allocation4 + %s458_s13]] }
  0xe7   : > { %2258 = vmatpush1.bf16.msra.mxu1 %v3651_v1  ;;  %v3727_v1 = vld [vmem:[%s4429_s8 + $0x1b4] ss:$8 sps:$4 sm:$0xff]  }
  0xe8   : > { %2462 = vmatpush1.bf16.msra.mxu0 %v3652_v2  ;;  %2259 = vmatprep.subr.bf16.mxu1 %v3653_v3  ;;  %v3730_v2 = vld [vmem:[%s4429_s8 + $0x5b4] ss:$8 sps:$4 sm:$0xff]   ;;  %v3725_v3 = vld [vmem:[%s4429_s8 + $0x1b0] ss:$8 sps:$4 sm:$0xff]  }
  0xe9   : > { %2463 = vmatprep.subr.bf16.mxu0 %v3655_v4  ;;  %v3728_v4 = vld [vmem:[%s4429_s8 + $0x5b0] ss:$8 sps:$4 sm:$0xff]  }
  0xeb   : > { %2260 = vmatpush1.bf16.msra.mxu1 %v3657_v5  ;;  %v3733_v5 = vld [vmem:[%s4429_s8 + $0x1c4] ss:$8 sps:$4 sm:$0xff]   ;;  %s3389_s13 = sshll.u32 %s4802_s17, 3 }
  0xec   : > { %2464 = vmatpush1.bf16.msra.mxu0 %v3658_v6  ;;  %2280 = vmatprep.subr.bf16.mxu1 %v3661_v7  ;;  %v3736_v6 = vld [vmem:[%s4429_s8 + $0x5c4] ss:$8 sps:$4 sm:$0xff]   ;;  %v3731_v7 = vld [vmem:[%s4429_s8 + $0x1c0] ss:$8 sps:$4 sm:$0xff]  }
  0xed   : > { %2484 = vmatprep.subr.bf16.mxu0 %v3664_v8  ;;  %v3734_v8 = vld [vmem:[%s4429_s8 + $0x5c0] ss:$8 sps:$4 sm:$0xff]  }
  0xee   : > { %2262 = vmatmul.mubr.bf16.vlgmr.msra.gmra.mrb[0].mxu1 %v3064_v9  ;;  %v3739_v9 = vld [vmem:[%s4429_s8 + $0x1d4] ss:$8 sps:$4 sm:$0xff]  }
  0xef   : > { %2466 = vmatmul.mubr.bf16.vlgmr.msra.gmra.mrb[0].mxu0 %v3072_v11  ;;  %2281 = vmatpush1.bf16.msra.mxu1 %v3659_v10  ;;  %v3742_v10 = vld [vmem:[%s4429_s8 + $0x5d4] ss:$8 sps:$4 sm:$0xff]   ;;  %v3737_v11 = vld [vmem:[%s4429_s8 + $0x1d0] ss:$8 sps:$4 sm:$0xff]  }
  0xf0   : > { %2485 = vmatpush1.bf16.msra.mxu0 %v3662_v12  ;;  %2282 = vmatprep.subr.bf16.mxu1 %v3667_v13  ;;  %v3740_v12 = vld [vmem:[%s4429_s8 + $0x5d0] ss:$8 sps:$4 sm:$0xff]   ;;  %v3746_v13 = vld [vmem:[%s4429_s8 + $0x1e4] ss:$8 sps:$4 sm:$0xff]  }
  0xf1   : > { %2486 = vmatprep.subr.bf16.mxu0 %v3670_v14  ;;  %2271 = vmatprep.mubr.bf16.mxu1 %v3081_v32  ;;  %v3750_v14 = vld [vmem:[%s4429_s8 + $0x5e4] ss:$8 sps:$4 sm:$0xff]  }
  0xf2   : > { %2475 = vmatprep.mubr.bf16.mxu0 %v3089_v37  ;;  %v3771_v37 = vld [vmem:[%s4429_s8 + $0x220] ss:$8 sps:$4 sm:$0xff]  }
  0xf3   : > { %2283 = vmatpush1.bf16.msra.mxu1 %v3665_v15  ;;  %v3744_v15 = vld [vmem:[%s4429_s8 + $0x1e0] ss:$8 sps:$4 sm:$0xff]  }
  0xf4   : > { %2487 = vmatpush1.bf16.msra.mxu0 %v3668_v16  ;;  %2284 = vmatprep.subr.bf16.mxu1 %v3673_v17  ;;  %v3748_v16 = vld [vmem:[%s4429_s8 + $0x5e0] ss:$8 sps:$4 sm:$0xff]   ;;  %v3755_v17 = vld [vmem:[%s4429_s8 + $0x1f4] ss:$8 sps:$4 sm:$0xff]  }
  0xf5   : > { %2488 = vmatprep.subr.bf16.mxu0 %v3676_v18  ;;  %v3758_v18 = vld [vmem:[%s4429_s8 + $0x5f4] ss:$8 sps:$4 sm:$0xff]  }
  0xf6   : > { %2272 = vmatmul.mubr.bf16.gmra.mrb[4].mxu1 %v3080_v34  ;;  %v3768_v34 = vld [vmem:[%s4429_s8 + $0x610] ss:$8 sps:$4 sm:$0xff]  }
  0xf7   : > { %2285 = vmatpush1.bf16.msra.mxu1 %v3671_v19  ;;  %2476 = vmatmul.mubr.bf16.gmra.mrb[4].mxu0 %v3088_v38  ;;  %v3753_v19 = vld [vmem:[%s4429_s8 + $0x1f0] ss:$8 sps:$4 sm:$0xff]   ;;  %v3774_v38 = vld [vmem:[%s4429_s8 + $0x620] ss:$8 sps:$4 sm:$0xff]  }
  0xf8   : > { %2489 = vmatpush1.bf16.msra.mxu0 %v3674_v20  ;;  %2286 = vmatprep.subr.bf16.mxu1 %v3679_v21  ;;  %v3756_v20 = vld [vmem:[%s4429_s8 + $0x5f0] ss:$8 sps:$4 sm:$0xff]   ;;  %v3761_v21 = vld [vmem:[%s4429_s8 + $0x204] ss:$8 sps:$4 sm:$0xff]  }
  0xf9   : > { %2490 = vmatprep.subr.bf16.mxu0 %v3682_v22  ;;  %2312 = vmatprep.mubr.bf16.mxu1 %v3067_v46  ;;  %v3764_v22 = vld [vmem:[%s4429_s8 + $0x604] ss:$8 sps:$4 sm:$0xff]   ;;  %v3782_v46 = vld [vmem:[%s4429_s8 + $0x634] ss:$8 sps:$4 sm:$0xff]  }
  0xfa   : > { %2516 = vmatprep.mubr.bf16.mxu0 %v3075_v50  ;;  %v3780_v50 = vld [vmem:[%s4429_s8 + $0x630] ss:$8 sps:$4 sm:$0xff]  }
  0xfb   : > { %2287 = vmatpush1.bf16.msra.mxu1 %v3677_v23  ;;  %v3759_v23 = vld [vmem:[%s4429_s8 + $0x200] ss:$8 sps:$4 sm:$0xff]  }
  0xfc   : > { %2491 = vmatpush1.bf16.msra.mxu0 %v3680_v24  ;;  %2288 = vmatprep.subr.bf16.mxu1 %v3685_v25  ;;  %v3066_v24 = vcombine.low %v4621_v43, %v4623_v44  ;;  %v3074_v25 = vcombine.low %v4629_v48, %v4631_v49  ;;  %v4733_v43 = vld [vmem:[%s399_s12] sm:$0xff]  ;;  %v3777_v49 = vld [vmem:[%s4429_s8 + $0x230] ss:$8 sps:$4 sm:$0xff]   ;;  %s3377_s12 = sshll.u32 %s4787_s19, 3  ;;  %s462_s19 = scalar_lea.vmem %s4977_s2, %s3389_s13 }
  0xfd   : > { %2492 = vmatprep.subr.bf16.mxu0 %v3688_v26  ;;  %v3762_v26 = vld [vmem:[%s4429_s8 + $0x600] ss:$8 sps:$4 sm:$0xff]  }
  0xfe   : > { %v4735_v44 = vld [vmem:[%s455_s3] sm:$0xff]  ;;  %s479_s3 = sadd.s32 18, %s4483_s28 }
  0xff   : > { %2289 = vmatpush1.bf16.msra.mxu1 %v3683_v27  ;;  %v477_v27 = vld [vmem:[%s476_s16] sm:$0xff]  ;;  %s371_s16 = scalar_lea.vmem %s4977_s2, %s3376_s26  ;;  %v3077_v48 = vcombine.high %v4733_v43, %v4735_v44  ;;  %s4777_s26 = sld [smem:[#allocation4 + %s479_s3]] }
 0x100   : > { %2493 = vmatpush1.bf16.msra.mxu0 %v3686_v28  ;;  %2290 = vmatprep.subr.bf16.mxu1 %v3691_v29  ;;  %v505_v28 = vld [vmem:[%s504_s0] sm:$0xff]  ;;  %v3767_v29 = vld [vmem:[%s4429_s8 + $0x214] ss:$8 sps:$4 sm:$0xff]   ;;  %v3083_v31 = vcombine.high %v477_v27, %v477_v27  ;;  %s3385_s0 = sshll.u32 %s4789_s14, 3  ;;  %s378_s3 = scalar_lea.vmem %s4977_s2, %s3377_s12 }
 0x101   : > { %2494 = vmatprep.subr.bf16.mxu0 %v3694_v30  ;;  %v3770_v30 = vld [vmem:[%s4429_s8 + $0x614] ss:$8 sps:$4 sm:$0xff]   ;;  %v3091_v32 = vcombine.high %v505_v28, %v505_v28  ;;  %s514_s14 = sadd.s32 23, %s4483_s28  ;;  %s4907_s12 = sld [smem:[#allocation4 + %s486_s4]] }
 0x103   : > { %2291 = vmatpush1.bf16.msra.mxu1 %v3689_v35  ;;  %v3773_v35 = vld [vmem:[%s4429_s8 + $0x224] ss:$8 sps:$4 sm:$0xff]  }
 0x104   : > { %2495 = vmatpush1.bf16.msra.mxu0 %v3692_v36  ;;  %2292 = vmatprep.subr.bf16.mxu1 %v3697_v39  ;;  %v3776_v36 = vld [vmem:[%s4429_s8 + $0x624] ss:$8 sps:$4 sm:$0xff]  }
 0x105   : > { %2496 = vmatprep.subr.bf16.mxu0 %v3700_v40  ;;  %v4729_v39 = vld [vmem:[%s371_s16] sm:$0xff]  ;;  %s402_s16 = sadd.s32 7, %s4483_s28  ;;  %s3392_s20 = sshll.u32 %s4777_s26, 3 }
 0x106   : > { %v4731_v40 = vld [vmem:[%s427_s29] sm:$0xff]  ;;  %s3396_s29 = sshll.u32 %s4779_s25, 3  ;;  %s4800_s10 = sld [smem:[#allocation4 + %s402_s16]] }
 0x107   : > { %2293 = vmatpush1.bf16.msra.mxu1 %v3695_v41  ;;  %v3082_v41 = vcombine.low %v477_v27, %v477_v27  ;;  %v3846_v27 = vld [vmem:[%s4429_s8 + $0x2e4] ss:$8 sps:$4 sm:$0xff]   ;;  %s483_s26 = scalar_lea.vmem %s4977_s2, %s3392_s20  ;;  %s511_s30 = scalar_lea.vmem %s4977_s2, %s3396_s29 }
 0x108   : > { %2497 = vmatpush1.bf16.msra.mxu0 %v3698_v42  ;;  %2294 = vmatprep.subr.bf16.mxu1 %v3703_v45  ;;  %v3090_v42 = vcombine.low %v505_v28, %v505_v28  ;;  %v3779_v45 = vld [vmem:[%s4429_s8 + $0x234] ss:$8 sps:$4 sm:$0xff]   ;;  %v3850_v28 = vld [vmem:[%s4429_s8 + $0x6e4] ss:$8 sps:$4 sm:$0xff]   ;;  %s434_s25 = scalar_lea.vmem %s4977_s2, %s3385_s0  ;;  %s4909_s0 = sld [smem:[#allocation4 + %s514_s14]] }
 0x109   : > { %2498 = vmatprep.subr.bf16.mxu0 %v3706_v47  ;;  %v3069_v47 = vcombine.high %v4729_v39, %v4731_v40  ;;  %s3393_s28 = sshll.u32 %s4907_s12, 3 }
 0x10a   : > { %s490_s29 = scalar_lea.vmem %s4977_s2, %s3393_s28 }
 0x10b   : > { %2295 = vmatpush1.bf16.msra.mxu1 %v3701_v51  ;;  %v3785_v51 = vld [vmem:[%s4429_s8 + $0x244] ss:$8 sps:$4 sm:$0xff]  }
 0x10c   : > { %2499 = vmatpush1.bf16.msra.mxu0 %v3704_v52  ;;  %2296 = vmatprep.subr.bf16.mxu1 %v3709_v53  ;;  %v3788_v52 = vld [vmem:[%s4429_s8 + $0x644] ss:$8 sps:$4 sm:$0xff]   ;;  %v3783_v53 = vld [vmem:[%s4429_s8 + $0x240] ss:$8 sps:$4 sm:$0xff]   ;;  %s3381_s16 = sshll.u32 %s4800_s10, 3 }
 0x10d   : > { %2500 = vmatprep.subr.bf16.mxu0 %v3712_v54  ;;  %v3786_v54 = vld [vmem:[%s4429_s8 + $0x640] ss:$8 sps:$4 sm:$0xff]   ;;  %s406_s15 = scalar_lea.vmem %s4977_s2, %s3381_s16 }
 0x10e   : > { %s3397_s16 = sshll.u32 %s4909_s0, 3 }
 0x10f   : > { %2297 = vmatpush1.bf16.msra.mxu1 %v3707_v55  ;;  %v3791_v55 = vld [vmem:[%s4429_s8 + $0x254] ss:$8 sps:$4 sm:$0xff]  }
 0x110   : > { %2501 = vmatpush1.bf16.msra.mxu0 %v3710_v56  ;;  %2298 = vmatprep.subr.bf16.mxu1 %v3715_v57  ;;  %v3794_v56 = vld [vmem:[%s4429_s8 + $0x654] ss:$8 sps:$4 sm:$0xff]   ;;  %v3789_v57 = vld [vmem:[%s4429_s8 + $0x250] ss:$8 sps:$4 sm:$0xff]  }
 0x111   : > { %2502 = vmatprep.subr.bf16.mxu0 %v3718_v58  ;;  %v3792_v58 = vld [vmem:[%s4429_s8 + $0x650] ss:$8 sps:$4 sm:$0xff]  }
 0x113   : > { %2299 = vmatpush1.bf16.msra.mxu1 %v3713_v59  ;;  %v3797_v59 = vld [vmem:[%s4429_s8 + $0x264] ss:$8 sps:$4 sm:$0xff]  }
 0x114   : > { %2503 = vmatpush1.bf16.msra.mxu0 %v3716_v60  ;;  %2300 = vmatprep.subr.bf16.mxu1 %v3721_v61  ;;  %v3800_v60 = vld [vmem:[%s4429_s8 + $0x664] ss:$8 sps:$4 sm:$0xff]   ;;  %v3795_v61 = vld [vmem:[%s4429_s8 + $0x260] ss:$8 sps:$4 sm:$0xff]  }
 0x115   : > { %2504 = vmatprep.subr.bf16.mxu0 %v3724_v62  ;;  %v3798_v62 = vld [vmem:[%s4429_s8 + $0x660] ss:$8 sps:$4 sm:$0xff]  }
 0x117   : > { %2301 = vmatpush1.bf16.msra.mxu1 %v3719_v63  ;;  %v3803_v63 = vld [vmem:[%s4429_s8 + $0x274] ss:$8 sps:$4 sm:$0xff]  }
 0x118   : > { %2505 = vmatpush1.bf16.msra.mxu0 %v3722_v0  ;;  %2302 = vmatprep.subr.bf16.mxu1 %v3727_v1  ;;  %v3806_v0 = vld [vmem:[%s4429_s8 + $0x674] ss:$8 sps:$4 sm:$0xff]   ;;  %v3801_v1 = vld [vmem:[%s4429_s8 + $0x270] ss:$8 sps:$4 sm:$0xff]  }
 0x119   : > { %2506 = vmatprep.subr.bf16.mxu0 %v3730_v2  ;;  %v3804_v2 = vld [vmem:[%s4429_s8 + $0x670] ss:$8 sps:$4 sm:$0xff]  }
 0x11b   : > { %2303 = vmatpush1.bf16.msra.mxu1 %v3725_v3  ;;  %v3809_v3 = vld [vmem:[%s4429_s8 + $0x284] ss:$8 sps:$4 sm:$0xff]  }
 0x11c   : > { %2507 = vmatpush1.bf16.msra.mxu0 %v3728_v4  ;;  %2304 = vmatprep.subr.bf16.mxu1 %v3733_v5  ;;  %v3812_v4 = vld [vmem:[%s4429_s8 + $0x684] ss:$8 sps:$4 sm:$0xff]   ;;  %v3807_v5 = vld [vmem:[%s4429_s8 + $0x280] ss:$8 sps:$4 sm:$0xff]  }
 0x11d   : > { %2508 = vmatprep.subr.bf16.mxu0 %v3736_v6  ;;  %v3810_v6 = vld [vmem:[%s4429_s8 + $0x680] ss:$8 sps:$4 sm:$0xff]  }
 0x11f   : > { %2305 = vmatpush1.bf16.msra.mxu1 %v3731_v7  ;;  %v3815_v7 = vld [vmem:[%s4429_s8 + $0x294] ss:$8 sps:$4 sm:$0xff]  }
 0x120   : > { %2509 = vmatpush1.bf16.msra.mxu0 %v3734_v8  ;;  %2306 = vmatprep.subr.bf16.mxu1 %v3739_v9  ;;  %v3818_v8 = vld [vmem:[%s4429_s8 + $0x694] ss:$8 sps:$4 sm:$0xff]   ;;  %v3813_v9 = vld [vmem:[%s4429_s8 + $0x290] ss:$8 sps:$4 sm:$0xff]  }
 0x121   : > { %2510 = vmatprep.subr.bf16.mxu0 %v3742_v10  ;;  %v3816_v10 = vld [vmem:[%s4429_s8 + $0x690] ss:$8 sps:$4 sm:$0xff]  }
 0x123   : > { %2307 = vmatpush1.bf16.msra.mxu1 %v3737_v11  ;;  %v3821_v11 = vld [vmem:[%s4429_s8 + $0x2a4] ss:$8 sps:$4 sm:$0xff]  }
 0x124   : > { %2511 = vmatpush1.bf16.msra.mxu0 %v3740_v12  ;;  %2308 = vmatprep.subr.bf16.mxu1 %v3746_v13  ;;  %v3824_v12 = vld [vmem:[%s4429_s8 + $0x6a4] ss:$8 sps:$4 sm:$0xff]   ;;  %v3819_v13 = vld [vmem:[%s4429_s8 + $0x2a0] ss:$8 sps:$4 sm:$0xff]  }
 0x125   : > { %2512 = vmatprep.subr.bf16.mxu0 %v3750_v14  ;;  %v3822_v14 = vld [vmem:[%s4429_s8 + $0x6a0] ss:$8 sps:$4 sm:$0xff]  }
 0x127   : > { %2309 = vmatpush1.bf16.msra.mxu1 %v3744_v15  ;;  %v3827_v15 = vld [vmem:[%s4429_s8 + $0x2b4] ss:$8 sps:$4 sm:$0xff]  }
 0x128   : > { %2513 = vmatpush1.bf16.msra.mxu0 %v3748_v16  ;;  %2310 = vmatprep.subr.bf16.mxu1 %v3755_v17  ;;  %v3830_v16 = vld [vmem:[%s4429_s8 + $0x6b4] ss:$8 sps:$4 sm:$0xff]   ;;  %v3825_v17 = vld [vmem:[%s4429_s8 + $0x2b0] ss:$8 sps:$4 sm:$0xff]  }
 0x129   : > { %2514 = vmatprep.subr.bf16.mxu0 %v3758_v18  ;;  %v3828_v18 = vld [vmem:[%s4429_s8 + $0x6b0] ss:$8 sps:$4 sm:$0xff]  }
 0x12b   : > { %2311 = vmatpush1.bf16.msra.mxu1 %v3753_v19  ;;  %v3833_v19 = vld [vmem:[%s4429_s8 + $0x2c4] ss:$8 sps:$4 sm:$0xff]  }
 0x12c   : > { %2515 = vmatpush1.bf16.msra.mxu0 %v3756_v20  ;;  %2331 = vmatprep.subr.bf16.mxu1 %v3761_v21  ;;  %v3836_v20 = vld [vmem:[%s4429_s8 + $0x6c4] ss:$8 sps:$4 sm:$0xff]   ;;  %v3831_v21 = vld [vmem:[%s4429_s8 + $0x2c0] ss:$8 sps:$4 sm:$0xff]  }
 0x12d   : > { %2535 = vmatprep.subr.bf16.mxu0 %v3764_v22  ;;  %v3834_v22 = vld [vmem:[%s4429_s8 + $0x6c0] ss:$8 sps:$4 sm:$0xff]  }
 0x12e   : > { %2313 = vmatmul.mubr.bf16.vlgmr.msra.gmra.mrb[0].mxu1 %v3066_v24  ;;  %v3842_v24 = vld [vmem:[%s4429_s8 + $0x6d4] ss:$8 sps:$4 sm:$0xff]  }
 0x12f   : > { %2517 = vmatmul.mubr.bf16.vlgmr.msra.gmra.mrb[0].mxu0 %v3074_v25  ;;  %2332 = vmatpush1.bf16.msra.mxu1 %v3759_v23  ;;  %v3839_v23 = vld [vmem:[%s4429_s8 + $0x2d4] ss:$8 sps:$4 sm:$0xff]   ;;  %v3837_v25 = vld [vmem:[%s4429_s8 + $0x2d0] ss:$8 sps:$4 sm:$0xff]  }
 0x130   : > { %2536 = vmatpush1.bf16.msra.mxu0 %v3762_v26  ;;  %2333 = vmatprep.subr.bf16.mxu1 %v3767_v29  ;;  %v3840_v26 = vld [vmem:[%s4429_s8 + $0x6d0] ss:$8 sps:$4 sm:$0xff]   ;;  %v3844_v29 = vld [vmem:[%s4429_s8 + $0x2e0] ss:$8 sps:$4 sm:$0xff]  }
 0x131   : > { %2537 = vmatprep.subr.bf16.mxu0 %v3770_v30  ;;  %2322 = vmatprep.mubr.bf16.mxu1 %v3083_v31  ;;  %v3848_v30 = vld [vmem:[%s4429_s8 + $0x6e0] ss:$8 sps:$4 sm:$0xff]   ;;  %v3855_v31 = vld [vmem:[%s4429_s8 + $0x2f4] ss:$8 sps:$4 sm:$0xff]  }
 0x132   : > { %2526 = vmatprep.mubr.bf16.mxu0 %v3091_v32  ;;  %v3858_v32 = vld [vmem:[%s4429_s8 + $0x6f4] ss:$8 sps:$4 sm:$0xff]  }
 0x133   : > { %2334 = vmatpush1.bf16.msra.mxu1 %v3765_v33  ;;  %v3853_v33 = vld [vmem:[%s4429_s8 + $0x2f0] ss:$8 sps:$4 sm:$0xff]  }
 0x134   : > { %2538 = vmatpush1.bf16.msra.mxu0 %v3768_v34  ;;  %2335 = vmatprep.subr.bf16.mxu1 %v3773_v35  ;;  %v3856_v34 = vld [vmem:[%s4429_s8 + $0x6f0] ss:$8 sps:$4 sm:$0xff]   ;;  %v3861_v35 = vld [vmem:[%s4429_s8 + $0x304] ss:$8 sps:$4 sm:$0xff]  }
 0x135   : > { %2539 = vmatprep.subr.bf16.mxu0 %v3776_v36  ;;  %v3864_v36 = vld [vmem:[%s4429_s8 + $0x704] ss:$8 sps:$4 sm:$0xff]  }
 0x136   : > { %2323 = vmatmul.mubr.bf16.gmra.mrb[4].mxu1 %v3082_v41  ;;  %v3859_v41 = vld [vmem:[%s4429_s8 + $0x300] ss:$8 sps:$4 sm:$0xff]  }
 0x137   : > { %2527 = vmatmul.mubr.bf16.gmra.mrb[4].mxu0 %v3090_v42  ;;  %2336 = vmatpush1.bf16.msra.mxu1 %v3771_v37  ;;  %v484_v37 = vld [vmem:[%s483_s26] sm:$0xff]  ;;  %s518_s26 = scalar_lea.vmem %s4977_s2, %s3397_s16 }
 0x138   : > { %2540 = vmatpush1.bf16.msra.mxu0 %v3774_v38  ;;  %2337 = vmatprep.subr.bf16.mxu1 %v3779_v45  ;;  %v512_v38 = vld [vmem:[%s511_s30] sm:$0xff]  ;;  %v3068_v45 = vcombine.low %v4729_v39, %v4731_v40  ;;  %v3865_v39 = vld [vmem:[%s4429_s8 + $0x310] ss:$8 sps:$4 sm:$0xff]  }
 0x139   : > { %2541 = vmatprep.subr.bf16.mxu0 %v3782_v46  ;;  %2363 = vmatprep.mubr.bf16.mxu1 %v3069_v47  ;;  %v3862_v42 = vld [vmem:[%s4429_s8 + $0x700] ss:$8 sps:$4 sm:$0xff]   ;;  %v3076_v46 = vcombine.low %v4733_v43, %v4735_v44  ;;  %v3867_v47 = vld [vmem:[%s4429_s8 + $0x314] ss:$8 sps:$4 sm:$0xff]   ;;  %v3868_v40 = vld [vmem:[%s4429_s8 + $0x710] ss:$8 sps:$4 sm:$0xff]  }
 0x13a   : > { %2567 = vmatprep.mubr.bf16.mxu0 %v3077_v48  ;;  %v3870_v48 = vld [vmem:[%s4429_s8 + $0x714] ss:$8 sps:$4 sm:$0xff]   ;;  %v3873_v43 = vld [vmem:[%s4429_s8 + $0x324] ss:$8 sps:$4 sm:$0xff]  }
 0x13b   : > { %2338 = vmatpush1.bf16.msra.mxu1 %v3777_v49  ;;  %v3085_v49 = vcombine.high %v484_v37, %v484_v37  ;;  %v3876_v44 = vld [vmem:[%s4429_s8 + $0x724] ss:$8 sps:$4 sm:$0xff]  }
 0x13c   : > { %2542 = vmatpush1.bf16.msra.mxu0 %v3780_v50  ;;  %2339 = vmatprep.subr.bf16.mxu1 %v3785_v51  ;;  %v3093_v50 = vcombine.high %v512_v38, %v512_v38  ;;  %v4853_v51 = vld [vmem:[%s378_s3] sm:$0xff] }
 0x13d   : > { %2543 = vmatprep.subr.bf16.mxu0 %v3788_v52  ;;  %v3084_v52 = vcombine.low %v484_v37, %v484_v37  ;;  %v3939_v37 = vld [vmem:[%s4429_s8 + $0x3d4] ss:$8 sps:$4 sm:$0xff]  }
 0x13f   : > { %2340 = vmatpush1.bf16.msra.mxu1 %v3783_v53  ;;  %v3092_v53 = vcombine.low %v512_v38, %v512_v38  ;;  %v3942_v38 = vld [vmem:[%s4429_s8 + $0x7d4] ss:$8 sps:$4 sm:$0xff]  }
 0x140   : > { %2544 = vmatpush1.bf16.msra.mxu0 %v3786_v54  ;;  %2341 = vmatprep.subr.bf16.mxu1 %v3791_v55  ;;  %v4855_v54 = vld [vmem:[%s434_s25] sm:$0xff]  ;;  %s4997_s25 = scalar_lea.vmem [#allocation11], %s4425_s18 }
 0x141   : > { %2545 = vmatprep.subr.bf16.mxu0 %v3794_v56  ;;  %v4857_v55 = vld [vmem:[%s406_s15] sm:$0xff] }
 0x142   : > { %v4859_v56 = vld [vmem:[%s462_s19] sm:$0xff] }
 0x143   : > { %2342 = vmatpush1.bf16.msra.mxu1 %v3789_v57  ;;  %v3871_v57 = vld [vmem:[%s4429_s8 + $0x320] ss:$8 sps:$4 sm:$0xff]  }
 0x144   : > { %2546 = vmatpush1.bf16.msra.mxu0 %v3792_v58  ;;  %2343 = vmatprep.subr.bf16.mxu1 %v3797_v59  ;;  %v3874_v58 = vld [vmem:[%s4429_s8 + $0x720] ss:$8 sps:$4 sm:$0xff]   ;;  %v3879_v59 = vld [vmem:[%s4429_s8 + $0x334] ss:$8 sps:$4 sm:$0xff]  }
 0x145   : > { %2547 = vmatprep.subr.bf16.mxu0 %v3800_v60  ;;  %v3882_v60 = vld [vmem:[%s4429_s8 + $0x734] ss:$8 sps:$4 sm:$0xff]  }
 0x147   : > { %2344 = vmatpush1.bf16.msra.mxu1 %v3795_v61  ;;  %v3071_v61 = vcombine.high %v4853_v51, %v4855_v54 }
 0x148   : > { %2548 = vmatpush1.bf16.msra.mxu0 %v3798_v62  ;;  %2345 = vmatprep.subr.bf16.mxu1 %v3803_v63  ;;  %v3079_v62 = vcombine.high %v4857_v55, %v4859_v56  ;;  %v3877_v63 = vld [vmem:[%s4429_s8 + $0x330] ss:$8 sps:$4 sm:$0xff]  }
 0x149   : > { %2549 = vmatprep.subr.bf16.mxu0 %v3806_v0  ;;  %v3880_v0 = vld [vmem:[%s4429_s8 + $0x730] ss:$8 sps:$4 sm:$0xff]  }
 0x14b   : > { %2346 = vmatpush1.bf16.msra.mxu1 %v3801_v1  ;;  %v3885_v1 = vld [vmem:[%s4429_s8 + $0x344] ss:$8 sps:$4 sm:$0xff]  }
 0x14c   : > { %2550 = vmatpush1.bf16.msra.mxu0 %v3804_v2  ;;  %2347 = vmatprep.subr.bf16.mxu1 %v3809_v3  ;;  %v3888_v2 = vld [vmem:[%s4429_s8 + $0x744] ss:$8 sps:$4 sm:$0xff]   ;;  %v3883_v3 = vld [vmem:[%s4429_s8 + $0x340] ss:$8 sps:$4 sm:$0xff]  }
 0x14d   : > { %2551 = vmatprep.subr.bf16.mxu0 %v3812_v4  ;;  %v3886_v4 = vld [vmem:[%s4429_s8 + $0x740] ss:$8 sps:$4 sm:$0xff]  }
 0x14f   : > { %2348 = vmatpush1.bf16.msra.mxu1 %v3807_v5  ;;  %v3891_v5 = vld [vmem:[%s4429_s8 + $0x354] ss:$8 sps:$4 sm:$0xff]  }
 0x150   : > { %2552 = vmatpush1.bf16.msra.mxu0 %v3810_v6  ;;  %2349 = vmatprep.subr.bf16.mxu1 %v3815_v7  ;;  %v3894_v6 = vld [vmem:[%s4429_s8 + $0x754] ss:$8 sps:$4 sm:$0xff]   ;;  %v3889_v7 = vld [vmem:[%s4429_s8 + $0x350] ss:$8 sps:$4 sm:$0xff]  }
 0x151   : > { %2553 = vmatprep.subr.bf16.mxu0 %v3818_v8  ;;  %v3892_v8 = vld [vmem:[%s4429_s8 + $0x750] ss:$8 sps:$4 sm:$0xff]  }
 0x153   : > { %2350 = vmatpush1.bf16.msra.mxu1 %v3813_v9  ;;  %v3897_v9 = vld [vmem:[%s4429_s8 + $0x364] ss:$8 sps:$4 sm:$0xff]  }
 0x154   : > { %2554 = vmatpush1.bf16.msra.mxu0 %v3816_v10  ;;  %2351 = vmatprep.subr.bf16.mxu1 %v3821_v11  ;;  %v3900_v10 = vld [vmem:[%s4429_s8 + $0x764] ss:$8 sps:$4 sm:$0xff]   ;;  %v3895_v11 = vld [vmem:[%s4429_s8 + $0x360] ss:$8 sps:$4 sm:$0xff]  }
 0x155   : > { %2555 = vmatprep.subr.bf16.mxu0 %v3824_v12  ;;  %v3898_v12 = vld [vmem:[%s4429_s8 + $0x760] ss:$8 sps:$4 sm:$0xff]  }
 0x157   : > { %2352 = vmatpush1.bf16.msra.mxu1 %v3819_v13  ;;  %v3903_v13 = vld [vmem:[%s4429_s8 + $0x374] ss:$8 sps:$4 sm:$0xff]  }
 0x158   : > { %2556 = vmatpush1.bf16.msra.mxu0 %v3822_v14  ;;  %2353 = vmatprep.subr.bf16.mxu1 %v3827_v15  ;;  %v3906_v14 = vld [vmem:[%s4429_s8 + $0x774] ss:$8 sps:$4 sm:$0xff]   ;;  %v3901_v15 = vld [vmem:[%s4429_s8 + $0x370] ss:$8 sps:$4 sm:$0xff]  }
 0x159   : > { %2557 = vmatprep.subr.bf16.mxu0 %v3830_v16  ;;  %v3904_v16 = vld [vmem:[%s4429_s8 + $0x770] ss:$8 sps:$4 sm:$0xff]  }
 0x15b   : > { %2354 = vmatpush1.bf16.msra.mxu1 %v3825_v17  ;;  %v3909_v17 = vld [vmem:[%s4429_s8 + $0x384] ss:$8 sps:$4 sm:$0xff]  }
 0x15c   : > { %2558 = vmatpush1.bf16.msra.mxu0 %v3828_v18  ;;  %2355 = vmatprep.subr.bf16.mxu1 %v3833_v19  ;;  %v3912_v18 = vld [vmem:[%s4429_s8 + $0x784] ss:$8 sps:$4 sm:$0xff]   ;;  %v3907_v19 = vld [vmem:[%s4429_s8 + $0x380] ss:$8 sps:$4 sm:$0xff]  }
 0x15d   : > { %2559 = vmatprep.subr.bf16.mxu0 %v3836_v20  ;;  %v3910_v20 = vld [vmem:[%s4429_s8 + $0x780] ss:$8 sps:$4 sm:$0xff]  }
 0x15f   : > { %2356 = vmatpush1.bf16.msra.mxu1 %v3831_v21  ;;  %v3915_v21 = vld [vmem:[%s4429_s8 + $0x394] ss:$8 sps:$4 sm:$0xff]  }
 0x160   : > { %2560 = vmatpush1.bf16.msra.mxu0 %v3834_v22  ;;  %2357 = vmatprep.subr.bf16.mxu1 %v3839_v23  ;;  %v3918_v22 = vld [vmem:[%s4429_s8 + $0x794] ss:$8 sps:$4 sm:$0xff]   ;;  %v3913_v23 = vld [vmem:[%s4429_s8 + $0x390] ss:$8 sps:$4 sm:$0xff]  }
 0x161   : > { %2561 = vmatprep.subr.bf16.mxu0 %v3842_v24  ;;  %v3916_v24 = vld [vmem:[%s4429_s8 + $0x790] ss:$8 sps:$4 sm:$0xff]  }
 0x163   : > { %2358 = vmatpush1.bf16.msra.mxu1 %v3837_v25  ;;  %v3921_v25 = vld [vmem:[%s4429_s8 + $0x3a4] ss:$8 sps:$4 sm:$0xff]  }
 0x164   : > { %2562 = vmatpush1.bf16.msra.mxu0 %v3840_v26  ;;  %2359 = vmatprep.subr.bf16.mxu1 %v3846_v27  ;;  %v3924_v26 = vld [vmem:[%s4429_s8 + $0x7a4] ss:$8 sps:$4 sm:$0xff]   ;;  %v3919_v27 = vld [vmem:[%s4429_s8 + $0x3a0] ss:$8 sps:$4 sm:$0xff]  }
 0x165   : > { %2563 = vmatprep.subr.bf16.mxu0 %v3850_v28  ;;  %v3922_v28 = vld [vmem:[%s4429_s8 + $0x7a0] ss:$8 sps:$4 sm:$0xff]  }
 0x167   : > { %2360 = vmatpush1.bf16.msra.mxu1 %v3844_v29  ;;  %v3927_v29 = vld [vmem:[%s4429_s8 + $0x3b4] ss:$8 sps:$4 sm:$0xff]  }
 0x168   : > { %2564 = vmatpush1.bf16.msra.mxu0 %v3848_v30  ;;  %2361 = vmatprep.subr.bf16.mxu1 %v3855_v31  ;;  %v3930_v30 = vld [vmem:[%s4429_s8 + $0x7b4] ss:$8 sps:$4 sm:$0xff]   ;;  %v3925_v31 = vld [vmem:[%s4429_s8 + $0x3b0] ss:$8 sps:$4 sm:$0xff]  }
 0x169   : > { %2565 = vmatprep.subr.bf16.mxu0 %v3858_v32  ;;  %v3928_v32 = vld [vmem:[%s4429_s8 + $0x7b0] ss:$8 sps:$4 sm:$0xff]  }
 0x16b   : > { %2362 = vmatpush1.bf16.msra.mxu1 %v3853_v33  ;;  %v3933_v33 = vld [vmem:[%s4429_s8 + $0x3c4] ss:$8 sps:$4 sm:$0xff]  }
 0x16c   : > { %2566 = vmatpush1.bf16.msra.mxu0 %v3856_v34  ;;  %2382 = vmatprep.subr.bf16.mxu1 %v3861_v35  ;;  %v3936_v34 = vld [vmem:[%s4429_s8 + $0x7c4] ss:$8 sps:$4 sm:$0xff]   ;;  %v3931_v35 = vld [vmem:[%s4429_s8 + $0x3c0] ss:$8 sps:$4 sm:$0xff]  }
 0x16d   : > { %2586 = vmatprep.subr.bf16.mxu0 %v3864_v36  ;;  %v3934_v36 = vld [vmem:[%s4429_s8 + $0x7c0] ss:$8 sps:$4 sm:$0xff]  }
 0x16e   : > { %2364 = vmatmul.mubr.bf16.vlgmr.msra.gmra.mrb[0].mxu1 %v3068_v45  ;;  %v3948_v45 = vld [vmem:[%s4429_s8 + $0x3e4] ss:$8 sps:$4 sm:$0xff]  }
 0x16f   : > { %2568 = vmatmul.mubr.bf16.vlgmr.msra.gmra.mrb[0].mxu0 %v3076_v46  ;;  %2383 = vmatpush1.bf16.msra.mxu1 %v3859_v41  ;;  %v3937_v41 = vld [vmem:[%s4429_s8 + $0x3d0] ss:$8 sps:$4 sm:$0xff]   ;;  %v3952_v46 = vld [vmem:[%s4429_s8 + $0x7e4] ss:$8 sps:$4 sm:$0xff]  }
 0x170   : > { %2587 = vmatpush1.bf16.msra.mxu0 %v3862_v42  ;;  %2384 = vmatprep.subr.bf16.mxu1 %v3867_v47  ;;  %v3940_v42 = vld [vmem:[%s4429_s8 + $0x7d0] ss:$8 sps:$4 sm:$0xff]   ;;  %v3946_v47 = vld [vmem:[%s4429_s8 + $0x3e0] ss:$8 sps:$4 sm:$0xff]  }
 0x171   : > { %2588 = vmatprep.subr.bf16.mxu0 %v3870_v48  ;;  %2373 = vmatprep.mubr.bf16.mxu1 %v3085_v49  ;;  %v3950_v48 = vld [vmem:[%s4429_s8 + $0x7e0] ss:$8 sps:$4 sm:$0xff]   ;;  %v3955_v49 = vld [vmem:[%s4429_s8 + $0x3f4] ss:$8 sps:$4 sm:$0xff]  }
 0x172   : > { %2577 = vmatprep.mubr.bf16.mxu0 %v3093_v50  ;;  %v3958_v50 = vld [vmem:[%s4429_s8 + $0x7f4] ss:$8 sps:$4 sm:$0xff]  }
 0x173   : > { %2385 = vmatpush1.bf16.msra.mxu1 %v3865_v39  ;;  %v3953_v39 = vld [vmem:[%s4429_s8 + $0x3f0] ss:$8 sps:$4 sm:$0xff]  }
 0x174   : > { %2589 = vmatpush1.bf16.msra.mxu0 %v3868_v40  ;;  %2386 = vmatprep.subr.bf16.mxu1 %v3873_v43  ;;  %v3956_v40 = vld [vmem:[%s4429_s8 + $0x7f0] ss:$8 sps:$4 sm:$0xff]   ;;  %v491_v43 = vld [vmem:[%s490_s29] sm:$0xff]  ;;  %s2830_s8 = sld [smem:[#allocation5 + %s4259_s1]] }
 0x175   : > { %2590 = vmatprep.subr.bf16.mxu0 %v3876_v44  ;;  %v519_v44 = vld [vmem:[%s518_s26] sm:$0xff] }
 0x176   : > { %2374 = vmatmul.mubr.bf16.gmra.mrb[4].mxu1 %v3084_v52  ;;  %v3963_v52 = vld [vmem:[%s4444_s11 + $0x40] sm:$0xff]  }
 0x177   : > { %2578 = vmatmul.mubr.bf16.gmra.mrb[4].mxu0 %v3092_v53  ;;  %2387 = vmatpush1.bf16.msra.mxu1 %v3871_v57  ;;  %v3070_v53 = vcombine.low %v4853_v51, %v4855_v54  ;;  %v3078_v57 = vcombine.low %v4857_v55, %v4859_v56  ;;  %v3966_v51 = vld [vmem:[%s4444_s11 + $0x8] sm:$0xff]   ;;  %v3967_v54 = vld [vmem:[%s4444_s11 + $0x50] sm:$0xff]   ;;  %v3086_v55 = vcombine.low %v491_v43, %v491_v43 }
 0x178   : > { %2591 = vmatpush1.bf16.msra.mxu0 %v3874_v58  ;;  %2388 = vmatprep.subr.bf16.mxu1 %v3879_v59  ;;  %v3087_v58 = vcombine.high %v491_v43, %v491_v43  ;;  %v3095_v59 = vcombine.high %v519_v44, %v519_v44  ;;  %v3094_v56 = vcombine.low %v519_v44, %v519_v44 }
 0x179   : > { %2592 = vmatprep.subr.bf16.mxu0 %v3882_v60  ;;  %2414 = vmatprep.mubr.bf16.mxu1 %v3071_v61  ;;  %v3964_v60 = vld [vmem:[%s4444_s11] sm:$0xff]   ;;  %v3965_v61 = vld [vmem:[%s4444_s11 + $0x48] sm:$0xff]  }
 0x17a   : > { %2618 = vmatprep.mubr.bf16.mxu0 %v3079_v62  ;;  %v3968_v62 = vld [vmem:[%s4444_s11 + $0x10] sm:$0xff]   ;;  %p2832_p9 = scmp.gt.s32.totalorder %s2830_s8, 0  ;;  %p2837_p11 = scmp.gt.s32.totalorder %s2830_s8, 1 }
 0x17b   : > { %2389 = vmatpush1.bf16.msra.mxu1 %v3877_v63  ;;  %v3969_v63 = vld [vmem:[%s4444_s11 + $0x58] sm:$0xff]   ;;  %p2842_p12 = scmp.gt.s32.totalorder %s2830_s8, 2 }
 0x17c   : > { %2593 = vmatpush1.bf16.msra.mxu0 %v3880_v0  ;;  %2390 = vmatprep.subr.bf16.mxu1 %v3885_v1  ;;  %v3970_v0 = vld [vmem:[%s4444_s11 + $0x18] sm:$0xff]   ;;  %v3971_v1 = vld [vmem:[%s4444_s11 + $0x60] sm:$0xff]  }
 0x17d   : > { %2594 = vmatprep.subr.bf16.mxu0 %v3888_v2  ;;  %v3972_v2 = vld [vmem:[%s4444_s11 + $0x20] sm:$0xff]   ;;  %s2843_s1 = scalar_select %p2842_p12, 1.0, 0.0 }
 0x17f   : > { %2391 = vmatpush1.bf16.msra.mxu1 %v3883_v3  ;;  %v3973_v3 = vld [vmem:[%s4444_s11 + $0x68] sm:$0xff]  }
 0x180   : > { %2595 = vmatpush1.bf16.msra.mxu0 %v3886_v4  ;;  %2392 = vmatprep.subr.bf16.mxu1 %v3891_v5  ;;  %v3974_v4 = vld [vmem:[%s4444_s11 + $0x28] sm:$0xff]   ;;  %v3975_v5 = vld [vmem:[%s4444_s11 + $0x70] sm:$0xff]  }
 0x181   : > { %2596 = vmatprep.subr.bf16.mxu0 %v3894_v6  ;;  %v3976_v6 = vld [vmem:[%s4444_s11 + $0x30] sm:$0xff]  }
 0x183   : > { %2393 = vmatpush1.bf16.msra.mxu1 %v3889_v7  ;;  %v3977_v7 = vld [vmem:[%s4444_s11 + $0x78] sm:$0xff]  }
 0x184   : > { %2597 = vmatpush1.bf16.msra.mxu0 %v3892_v8  ;;  %2394 = vmatprep.subr.bf16.mxu1 %v3897_v9  ;;  %v3978_v8 = vld [vmem:[%s4444_s11 + $0x38] sm:$0xff]   ;;  %v803_v9 = vlaneseq  ;;  %s2838_s11 = scalar_select %p2837_p11, 1.0, 0.0 }
 0x185   : > { %2598 = vmatprep.subr.bf16.mxu0 %v3900_v10 }
 0x186   : > { %v804_v10 = vshrl.u32 %v803_v9, 7  ;;  %v2844_v9 = vstv %s2843_s1 }
 0x187   : > { %2395 = vmatpush1.bf16.msra.mxu1 %v3895_v11 }
 0x188   : > { %2599 = vmatpush1.bf16.msra.mxu0 %v3898_v12  ;;  %2396 = vmatprep.subr.bf16.mxu1 %v3903_v13  ;;  %v805_v11 = vsub.s32 0, %v804_v10  ;;  %v801_v12 = vld [vmem:[%s4437_s9] sm:$0x3]  ;;  %v809_v13 = vsub.s32 1, %v804_v10  ;;  %s2833_s9 = scalar_select %p2832_p9, 1.0, 0.0 }
 0x189   : > { %2600 = vmatprep.subr.bf16.mxu0 %v3906_v14 }
 0x18a   : > { %v806_v14 = vrot.slane %v801_v12, %v805_v11 }
 0x18b   : > { %2397 = vmatpush1.bf16.msra.mxu1 %v3901_v15  ;;  %v810_v15 = vrot.slane %v801_v12, %v809_v13 }
 0x18c   : > { %2601 = vmatpush1.bf16.msra.mxu0 %v3904_v16  ;;  %2398 = vmatprep.subr.bf16.mxu1 %v3909_v17 }
 0x18d   : > { %2602 = vmatprep.subr.bf16.mxu0 %v3912_v18 }
 0x18f   : > { %2399 = vmatpush1.bf16.msra.mxu1 %v3907_v19 }
 0x190   : > { %2603 = vmatpush1.bf16.msra.mxu0 %v3910_v20  ;;  %2400 = vmatprep.subr.bf16.mxu1 %v3915_v21 }
 0x191   : > { %2604 = vmatprep.subr.bf16.mxu0 %v3918_v22 }
 0x193   : > { %2401 = vmatpush1.bf16.msra.mxu1 %v3913_v23 }
 0x194   : > { %2605 = vmatpush1.bf16.msra.mxu0 %v3916_v24  ;;  %2402 = vmatprep.subr.bf16.mxu1 %v3921_v25 }
 0x195   : > { %2606 = vmatprep.subr.bf16.mxu0 %v3924_v26 }
 0x197   : > { %2403 = vmatpush1.bf16.msra.mxu1 %v3919_v27 }
 0x198   : > { %2607 = vmatpush1.bf16.msra.mxu0 %v3922_v28  ;;  %2404 = vmatprep.subr.bf16.mxu1 %v3927_v29 }
 0x199   : > { %2608 = vmatprep.subr.bf16.mxu0 %v3930_v30 }
 0x19b   : > { %2405 = vmatpush1.bf16.msra.mxu1 %v3925_v31 }
 0x19c   : > { %2609 = vmatpush1.bf16.msra.mxu0 %v3928_v32  ;;  %2406 = vmatprep.subr.bf16.mxu1 %v3933_v33 }
 0x19d   : > { %2610 = vmatprep.subr.bf16.mxu0 %v3936_v34 }
 0x19f   : > { %2407 = vmatpush1.bf16.msra.mxu1 %v3931_v35 }
 0x1a0   : > { %2611 = vmatpush1.bf16.msra.mxu0 %v3934_v36  ;;  %2408 = vmatprep.subr.bf16.mxu1 %v3939_v37 }
 0x1a1   : > { %2612 = vmatprep.subr.bf16.mxu0 %v3942_v38 }
 0x1a3   : > { %2409 = vmatpush1.bf16.msra.mxu1 %v3937_v41 }
 0x1a4   : > { %2613 = vmatpush1.bf16.msra.mxu0 %v3940_v42  ;;  %2410 = vmatprep.subr.bf16.mxu1 %v3948_v45 }
 0x1a5   : > { %2614 = vmatprep.subr.bf16.mxu0 %v3952_v46 }
 0x1a7   : > { %2411 = vmatpush1.bf16.msra.mxu1 %v3946_v47 }
 0x1a8   : > { %2615 = vmatpush1.bf16.msra.mxu0 %v3950_v48  ;;  %2412 = vmatprep.subr.bf16.mxu1 %v3955_v49 }
 0x1a9   : > { %2616 = vmatprep.subr.bf16.mxu0 %v3958_v50 }
 0x1ab   : > { %2413 = vmatpush1.bf16.msra.mxu1 %v3953_v39 }
 0x1ac   : > { %2617 = vmatpush1.bf16.msra.mxu0 %v3956_v40  ;;  %3426 = vmatprep.subr.bf16.mxu1 %v3963_v52 }
 0x1ad   : > { %3398 = vmatprep.subr.bf16.mxu0 %v3963_v52 }
 0x1ae   : > { %2415 = vmatmul.mubr.bf16.vlgmr.msra.gmra.mrb[0].mxu1 %v3070_v53 }
 0x1af   : > { %2619 = vmatmul.mubr.bf16.vlgmr.msra.gmra.mrb[0].mxu0 %v3078_v57  ;;  %2424 = vmatprep.mubr.bf16.mxu1 %v3087_v58 }
 0x1b0   : > { %2628 = vmatprep.mubr.bf16.mxu0 %v3095_v59  ;;  %3399 = vmatpush3.bf16.msra.mxu0 %v3964_v60  ;;  %v3352_v59 = vld [vmem:[%s4997_s25] ss:$0 sm:$0xff] }
 0x1b1   : > { %3434 = vmatpush3.bf16.msra.mxu1 %v3964_v60  ;;  %3400 = vmatprep.subr.bf16.mxu0 %v3965_v61 }
 0x1b2   : > { %3427 = vmatprep.subr.bf16.mxu1 %v3965_v61 }
 0x1b4   : > { %3401 = vmatpush3.bf16.msra.mxu0 %v3966_v51 }
 0x1b5   : > { %3435 = vmatpush3.bf16.msra.mxu1 %v3966_v51  ;;  %3402 = vmatprep.subr.bf16.mxu0 %v3967_v54 }
 0x1b6   : > { %3428 = vmatprep.subr.bf16.mxu1 %v3967_v54  ;;  %2425 = vmatmul.mubr.bf16.gmra.mrb[4].mxu1 %v3086_v55  ;;  %v2834_v54 = vstv %s2833_s9 }
 0x1b7   : > { %2629 = vmatmul.mubr.bf16.gmra.mrb[4].mxu0 %v3094_v56 }
 0x1b8   : > { %3403 = vmatpush3.bf16.msra.mxu0 %v3968_v62 }
 0x1b9   : > { %3436 = vmatpush3.bf16.msra.mxu1 %v3968_v62  ;;  %3404 = vmatprep.subr.bf16.mxu0 %v3969_v63 }
 0x1ba   : > { %3429 = vmatprep.subr.bf16.mxu1 %v3969_v63  ;;  %v2831_v63 = vld [vmem:[%s4982_s7] sm:$0xff] }
 0x1bc   : > { %3405 = vmatpush3.bf16.msra.mxu0 %v3970_v0 }
 0x1bd   : > { %3437 = vmatpush3.bf16.msra.mxu1 %v3970_v0  ;;  %3406 = vmatprep.subr.bf16.mxu0 %v3971_v1  ;;  %v2839_v0 = vstv %s2838_s11 }
 0x1be   : > { %3430 = vmatprep.subr.bf16.mxu1 %v3971_v1 }
 0x1c0   : > { %3407 = vmatpush3.bf16.msra.mxu0 %v3972_v2 }
 0x1c1   : > { %3438 = vmatpush3.bf16.msra.mxu1 %v3972_v2  ;;  %3408 = vmatprep.subr.bf16.mxu0 %v3973_v3 }
 0x1c2   : > { %3431 = vmatprep.subr.bf16.mxu1 %v3973_v3 }
 0x1c4   : > { %3409 = vmatpush3.bf16.msra.mxu0 %v3974_v4 }
 0x1c5   : > { %3439 = vmatpush3.bf16.msra.mxu1 %v3974_v4  ;;  %3410 = vmatprep.subr.bf16.mxu0 %v3975_v5 }
 0x1c6   : > { %3432 = vmatprep.subr.bf16.mxu1 %v3975_v5 }
 0x1c8   : > { %3411 = vmatpush3.bf16.msra.mxu0 %v3976_v6 }
 0x1c9   : > { %3440 = vmatpush3.bf16.msra.mxu1 %v3976_v6  ;;  %3412 = vmatprep.subr.bf16.mxu0 %v3977_v7 }
 0x1ca   : > { %3433 = vmatprep.subr.bf16.mxu1 %v3977_v7 }
 0x1cc   : > { %3413 = vmatpush3.bf16.msra.mxu0 %v3978_v8 }
 0x1cd   : > { %3441 = vmatpush3.bf16.msra.mxu1 %v3978_v8 }
 0x281   : > { %v2416_v16 = vpop.f32.mrb[0].mxu1 }
 0x282   : > { %v2620_v17 = vpop.f32.mrb[0].mxu0  ;;  %v3442_v18 = vadd.f32 %v2416_v16, %v806_v14  ;;  %v2418_v19 = vpop.f32.mrb[1].mxu1 }
 0x283   : > { %v2622_v20 = vpop.f32.mrb[1].mxu0  ;;  %v3444_v21 = vadd.f32 %v2418_v19, %v810_v15  ;;  %v2420_v22 = vpop.f32.mrb[2].mxu1 }
 0x284   : > { %v2624_v23 = vpop.f32.mrb[2].mxu0  ;;  %v3443_v24 = vadd.f32 %v3442_v18, %v2620_v17  ;;  %v3446_v25 = vadd.f32 %v2420_v22, %v806_v14  ;;  %v2422_v26 = vpop.f32.mrb[3].mxu1 }
 0x285   : > { %v2626_v27 = vpop.f32.mrb[3].mxu0  ;;  %v3445_v28 = vadd.f32 %v3444_v21, %v2622_v20  ;;  %v3448_v29 = vadd.f32 %v2422_v26, %v810_v15 }
 0x286   : > { %v3447_v30 = vadd.f32 %v3446_v25, %v2624_v23  ;;  %v2637_v32 = vmax.f32 %v3443_v24, 0.0 }
 0x287   : > { %v3449_v31 = vadd.f32 %v3448_v29, %v2626_v27  ;;  %v2638_v34 = vmax.f32 %v3445_v28, 0.0 }
 0x288   : > { %v2639_v33 = vmax.f32 %v3447_v30, 0.0 }
 0x289   : > { %v2640_v35 = vmax.f32 %v3449_v31, 0.0  ;;  %v2426_v36 = vpop.f32.mrb[4].mxu1 }
 0x28a   : > { %v2630_v37 = vpop.f32.mrb[4].mxu0  ;;  %v2643_v38 = vpack.c.bf16 %v2639_v33, %v2637_v32  ;;  %v3450_v41 = vadd.f32 %v2426_v36, %v806_v14  ;;  %v2428_v42 = vpop.f32.mrb[5].mxu1 }
 0x28b   : > { %v2632_v45 = vpop.f32.mrb[5].mxu0  ;;  %v2644_v46 = vpack.c.bf16 %v2640_v35, %v2638_v34  ;;  %v3452_v47 = vadd.f32 %v2428_v42, %v810_v15  ;;  %v2430_v48 = vpop.f32.mrb[6].mxu1 }
 0x28c   : > { %v2634_v49 = vpop.f32.mrb[6].mxu0  ;;  %v3451_v50 = vadd.f32 %v3450_v41, %v2630_v37  ;;  %v2431_v39 = vpop.f32.mrb[7].mxu1 }
 0x28d   : > { %v2635_v40 = vpop.f32.mrb[7].mxu0  ;;  %v3453_v43 = vadd.f32 %v3452_v47, %v2632_v45  ;;  %2814 = vmatprep.mubr.bf16.mxu0 %v2644_v46 }
 0x28e   : > { %v2641_v44 = vmax.f32 %v3451_v50, 0.0  ;;  %2815 = vmatmul.mubr.bf16.vlgmr.msra.gmra.mrb[8].mxu0 %v2643_v38 }
 0x28f   : > { %v2642_v52 = vmax.f32 %v3453_v43, 0.0 }
 0x290   : > { %v2645_v57 = vpack.c.bf16 %v2641_v44, %v2641_v44 }
 0x291   : > { %v2646_v53 = vpack.c.bf16 %v2642_v52, %v2642_v52 }
 0x293   : > { %2822 = vmatprep.mubr.bf16.mxu1 %v2646_v53 }
 0x294   : > { %2823 = vmatmul.mubr.bf16.vlgmr.msra.gmra.mrb[8].mxu1 %v2645_v57 }
 0x361   : > { %v3414_v58 = vpop.f32.mrb[8].mxu0 }
 0x362   : > { %v3415_v60 = vpop.f32.mrb[9].mxu0 }
 0x363   : > { %v3416_v61 = vadd.f32 %v3415_v60, %v3414_v58  ;;  %v3417_v51 = vpop.f32.mrb[10].mxu0 }
 0x364   : > { %v3418_v55 = vpop.f32.mrb[11].mxu0 }
 0x365   : > { %v2817_v56 = vadd.f32 %v3416_v61, %v3352_v59  ;;  %v3419_v62 = vadd.f32 %v3418_v55, %v3417_v51 }
 0x367   : > { %v2835_v1 = vmul.f32 %v2834_v54, %v2817_v56  ;;  %v2820_v2 = vadd.f32 %v3419_v62, %v3352_v59  ;;  %v3420_v3 = vpop.f32.mrb[8].mxu1 }
 0x368   : > { %v3421_v4 = vpop.f32.mrb[9].mxu1 }
 0x369   : > { %v2836_v5 = vadd.f32 %v2835_v1, %v2831_v63  ;;  %v2840_v6 = vmul.f32 %v2839_v0, %v2820_v2  ;;  %v3422_v7 = vadd.f32 %v3421_v4, %v3420_v3  ;;  %v3423_v8 = vpop.f32.mrb[10].mxu1 }
 0x36a   : > { %v3424_v10 = vpop.f32.mrb[11].mxu1 }
 0x36b   : > { %v2841_v11 = vadd.f32 %v2840_v6, %v2836_v5  ;;  %v2825_v12 = vadd.f32 %v3422_v7, %v3352_v59 }
 0x36d   : > { %v2845_v13 = vmul.f32 %v2844_v9, %v2825_v12 }
 0x36f   : > { %v2846_v14 = vadd.f32 %v2845_v13, %v2841_v11 }
 0x371   : > { %2847 = vst [vmem:[%s4982_s7] sm:$0xff] %v2846_v14 }
 0x372 PF: > { %p29_p8 = scmp.ge.s32.totalorder %s4262_s24, 9   ;;  %s4998_s0 = smov %s4155_s21 }
 0x373   : > { %s4999_s21 = smov %s4159_s22  ;;  %s5000_s22 = smov %s4272_s27 }
 0x374   : > { %s5001_s23 = smov %s4262_s24  ;;  %31 = sbr.rel (!%p29_p8) target bundleno = 27 (0x1b), region = 141 }
 0x37b   :  { %2859 = vsyncpa [#allocation7], 1 }
 0x37c   :  { %2861 = vsyncpa [#allocation7 + $0x1], 1 }
 0x37d   :  { %2862 = vsyncpa [#allocation9], 1 }
 0x37e   :  { %2864 = vsyncpa [#allocation9 + $0x1], 1 }
 0x37f   :  { %2865 = vsyncpa [#allocation12], 1 }
 0x380   :  { %2867 = vsyncpa [#allocation12 + $0x1], 1 }

</bundles_post_ra>
